<compile_context>
chip_gen: v7x
topology: tpu7x:2x2x1
jax: 0.10.0
libtpu: 0.0.40
codegen_flags: <defaults>
</compile_context>

<pallas_src>
import functools

import jax
import jax.numpy as jnp
from jax import lax
from jax.experimental import pallas as pl
from jax.experimental.pallas import tpu as pltpu


_VMEM_LIMIT_BYTES = 40 * 1024 * 1024        # explicit scoped-VMEM limit
_RECUR_TILE_BUDGET = 24 * 1024 * 1024       # recurrence block budget
_PROJ_BLOCK_BUDGET = 8 * 1024 * 1024        # per-operand projection block budget


def _round_up(x, m):
    return (x + m - 1) // m * m


def _cdiv(a, b):
    return (a + b - 1) // b


# ---------------------------------------------------------------------------
# Bulk input projection: gx[d] = x @ W_ih[d] + b[d]
# Output is produced directly in the (D, T*B, 4*H_lane) bf16 layout consumed
# by the recurrence -- no transpose / concat afterwards.
# ---------------------------------------------------------------------------
def _proj_kernel(x_ref, w_ref, b_ref, o_ref):
    x = x_ref[...].astype(jnp.bfloat16)              # cast in-kernel (1 HBM pass)
    acc = jnp.dot(x, w_ref[...], preferred_element_type=jnp.float32)
    o_ref[...] = (acc + b_ref[...]).astype(o_ref.dtype)


def _input_projection(x2d, w_stack, b_stack, tm, tn):
    """x2d: (M, K) f32, w_stack: (D, K, G) bf16, b_stack: (D, 1, G) f32.

    Returns gx: (D, M, G) bf16.
    """
    M, K = x2d.shape
    D, _, G = w_stack.shape
    return pl.pallas_call(
        _proj_kernel,
        out_shape=jax.ShapeDtypeStruct((D, M, G), jnp.bfloat16),
        grid_spec=pltpu.PrefetchScalarGridSpec(
            num_scalar_prefetch=0,
            grid=(D, G // tn, M // tm),              # m innermost: weight resident
            in_specs=[
                pl.BlockSpec((tm, K), lambda d, n, m: (m, 0)),
                pl.BlockSpec((None, K, tn), lambda d, n, m: (d, 0, n)),
                pl.BlockSpec((None, 1, tn), lambda d, n, m: (d, 0, n)),
            ],
            out_specs=pl.BlockSpec((None, tm, tn), lambda d, n, m: (d, m, n)),
        ),
        compiler_params=pltpu.CompilerParams(
            dimension_semantics=("parallel", "parallel", "parallel"),
            vmem_limit_bytes=_VMEM_LIMIT_BYTES),
    )(x2d, w_stack, b_stack)


# ---------------------------------------------------------------------------
# Recurrent kernel: both directions fused, time blocked, one MXU matmul per
# timestep, statically-indexed unrolled steps per direction branch.
# ---------------------------------------------------------------------------
def _lstm_recurrent_kernel(gx_ref, h0_ref, c0_ref, whh_ref, out_ref,
                           h_scr, c_scr, *, tt, nb, hl, t_real, num_dir):
    blk = pl.program_id(1)

    @pl.when(blk == 0)
    def _():
        h_scr[...] = h0_ref[...]
        c_scr[...] = c0_ref[...]

    w_hh = whh_ref[...]                               # (H_lane, 4*H_lane) bf16

    def run_block(reverse):
        h = h_scr[...]
        c = c_scr[...]
        order = range(tt - 1, -1, -1) if reverse else range(tt)
        for j in order:                               # static, fully unrolled
            gates = gx_ref[j].astype(jnp.float32) + jnp.dot(
                h.astype(jnp.bfloat16), w_hh,
                preferred_element_type=jnp.float32)   # (B, 4*H_lane) f32
            # PyTorch gate order [i | f | g | o]; lane-aligned (128) slices.
            i_g = jax.nn.sigmoid(gates[:, 0 * hl:1 * hl])
            f_g = jax.nn.sigmoid(gates[:, 1 * hl:2 * hl])
            g_g = jnp.tanh(gates[:, 2 * hl:3 * hl])
            o_g = jax.nn.sigmoid(gates[:, 3 * hl:4 * hl])
            c_new = f_g * c + i_g * g_g
            h_new = o_g * jnp.tanh(c_new)
            if reverse and (nb - 1) * tt + j >= t_real:
                # Padded tail timesteps exist only in the first grid block of
                # the reverse pass; freeze the state there so h0/c0 reach the
                # last *real* timestep untouched.
                valid = blk != 0
                c_new = jnp.where(valid, c_new, c)
                h_new = jnp.where(valid, h_new, h)
            out_ref[j] = h_new
            h, c = h_new, c_new
        h_scr[...] = h
        c_scr[...] = c

    if num_dir == 1:
        run_block(reverse=False)
    else:
        d = pl.program_id(0)

        @pl.when(d == 0)
        def _():
            run_block(reverse=False)

        @pl.when(d == 1)
        def _():
            run_block(reverse=True)


def _run_recurrence(gx, h0, c0, w_hh, tt, t_real):
    """gx: (D, T_pad, B, 4*H_lane) bf16, h0/c0: (D, B, H_lane) f32,
    w_hh: (D, H_lane, 4*H_lane) bf16.

    Returns lane-packed output (T_pad, B, D*H_lane) f32 ([fwd | bwd] lanes).
    """
    D, T_pad, B, G = gx.shape
    hl = G // 4
    nb = T_pad // tt

    def in_time_map(d, b):
        # forward: time block b; reverse: time block nb-1-b (no [::-1] copies)
        return (d, b + d * (nb - 1 - 2 * b), 0, 0)

    def dir_map(d, b):
        return (d, 0, 0)

    def out_map(d, b):
        return (b + d * (nb - 1 - 2 * b), 0, d)       # lane block offset = d

    kernel = functools.partial(_lstm_recurrent_kernel, tt=tt, nb=nb, hl=hl,
                               t_real=t_real, num_dir=D)

    return pl.pallas_call(
        kernel,
        out_shape=jax.ShapeDtypeStruct((T_pad, B, D * hl), jnp.float32),
        grid_spec=pltpu.PrefetchScalarGridSpec(
            num_scalar_prefetch=0,
            grid=(D, nb),
            in_specs=[
                pl.BlockSpec((None, tt, B, G), in_time_map),   # gates_x block
                pl.BlockSpec((None, B, hl), dir_map),          # h0 (this dir)
                pl.BlockSpec((None, B, hl), dir_map),          # c0 (this dir)
                pl.BlockSpec((None, hl, G), dir_map),          # W_hh (this dir)
            ],
            out_specs=pl.BlockSpec((tt, B, hl), out_map),
            scratch_shapes=[
                pltpu.VMEM((B, hl), jnp.float32),              # h carry
                pltpu.VMEM((B, hl), jnp.float32),              # c carry
            ],
        ),
        compiler_params=pltpu.CompilerParams(
            dimension_semantics=("parallel", "arbitrary"),
            vmem_limit_bytes=_VMEM_LIMIT_BYTES),
    )(gx, h0, c0, w_hh)


# ---------------------------------------------------------------------------
# VMEM-budgeted tile selection
# ---------------------------------------------------------------------------
def _pick_time_tile(T, B_pad, H_lane, cap):
    G = 4 * H_lane
    fixed = (H_lane * G * 2 * 2                 # W_hh block, bf16, 2 buffers
             + 2 * B_pad * H_lane * 4 * 2       # h0/c0 blocks
             + 2 * B_pad * H_lane * 4)          # h/c scratch
    per_tt = B_pad * (G * 2 * 2                 # gx block, bf16, 2 buffers
                      + H_lane * 4 * 2)         # out block, f32, 2 buffers
    budget_tt = max(1, (_RECUR_TILE_BUDGET - fixed) // per_tt)
    tt_cap = max(1, min(cap, budget_tt, T))
    nb = _cdiv(T, tt_cap)                       # ceil-div grid: no divisor search
    tt = _cdiv(T, nb)                           # balanced tile, <= nb-1 pad steps
    return tt, nb


def _pick_proj_tiles(T_pad, B_pad, K, G):
    budget = _PROJ_BLOCK_BUDGET
    tn_cap = max(128, budget // (K * 2 * 2))    # bf16 weight block, 2 buffers
    tn = 128
    for cand in range(128, min(G, tn_cap) + 1, 128):
        if G % cand == 0:
            tn = cand
    rows_cap = min(budget // (K * 4 * 2),       # f32 x block, 2 buffers
                   budget // (tn * 2 * 2),      # bf16 out block, 2 buffers
                   2048)
    tpb_cap = max(1, min(T_pad, rows_cap // B_pad))
    tpb = 1
    for cand in range(1, tpb_cap + 1):          # whole timesteps per block
        if T_pad % cand == 0:
            tpb = cand
    return tpb * B_pad, tn


# ---------------------------------------------------------------------------
# Weight packing to the lane-aligned gate layout
# ---------------------------------------------------------------------------
def _pack_gate_cols(a, H, H_lane):
    """(..., 4H) -> (..., 4*H_lane): gate k at columns [k*H_lane, k*H_lane+H)."""
    if H == H_lane:
        return a
    parts = jnp.split(a, 4, axis=-1)
    pad = [(0, 0)] * (a.ndim - 1) + [(0, H_lane - H)]
    return jnp.concatenate([jnp.pad(p, pad) for p in parts], axis=-1)


def _pack_input_rows(w, n_src, H, H_lane):
    """(n_src*H, G) -> (n_src*H_lane, G): rows of source dir d' at d'*H_lane."""
    if H == H_lane:
        return w
    parts = jnp.split(w, n_src, axis=0)
    pad = [(0, H_lane - H)] + [(0, 0)] * (w.ndim - 1)
    return jnp.concatenate([jnp.pad(p, pad) for p in parts], axis=0)


# ---------------------------------------------------------------------------
# Parameters & forward wrapper
# ---------------------------------------------------------------------------
def init_lstm_params(key, feature_dim, n_hidden, n_layers, bidirectional):
    """Uniform(-1/sqrt(H), 1/sqrt(H)) init, mimicking nn.LSTM.

    Weights are stored pre-transposed as (in_dim, 4H); the two PyTorch biases
    (b_ih, b_hh) are combined into a single (1, 4H) bias.
    """
    num_dir = 2 if bidirectional else 1
    bound = 1.0 / jnp.sqrt(jnp.float32(n_hidden))
    params = []
    for layer in range(n_layers):
        in_dim = feature_dim if layer == 0 else num_dir * n_hidden
        for _ in range(num_dir):
            key, k1, k2, k3, k4 = jax.random.split(key, 5)
            w_ih = jax.random.uniform(k1, (in_dim, 4 * n_hidden),
                                      jnp.float32, -bound, bound)
            w_hh = jax.random.uniform(k2, (n_hidden, 4 * n_hidden),
                                      jnp.float32, -bound, bound)
            b_ih = jax.random.uniform(k3, (4 * n_hidden,),
                                      jnp.float32, -bound, bound)
            b_hh = jax.random.uniform(k4, (4 * n_hidden,),
                                      jnp.float32, -bound, bound)
            params.append((w_ih, w_hh, (b_ih + b_hh)[None, :]))
    return params


@functools.partial(jax.jit,
                   static_argnames=("n_layers", "bidirectional", "transposed",
                                    "time_tile_cap"))
def lstm_forward(X, params, h0, c0, *, n_layers, bidirectional,
                 transposed=False, time_tile_cap=32):
    """Forward pass matching the PyTorch module: returns (T, B, num_dir*H)."""
    inp = X if transposed else jnp.transpose(X, (1, 0, 2))       # (T, B, F)
    num_dir = 2 if bidirectional else 1
    T, B, _ = inp.shape
    H = h0.shape[-1]

    H_lane = _round_up(H, 128)            # lane-aligned per-gate width
    G = 4 * H_lane
    B_pad = max(8, _round_up(B, 8))       # >= 8 sublanes
    tt, nb = _pick_time_tile(T, B_pad, H_lane, time_tile_cap)
    T_pad = tt * nb

    # Pad once up front; pad rows/steps/lanes stay zero and are sliced at end.
    layer_in = jnp.pad(inp, ((0, T_pad - T), (0, B_pad - B), (0, 0)))

    for layer in range(n_layers):
        idx0 = layer * num_dir
        w_ih_l, w_hh_l, b_l = [], [], []
        for dd in range(num_dir):
            w_ih, w_hh, b = params[idx0 + dd]
            w_ih_p = _pack_gate_cols(w_ih, H, H_lane)
            if layer > 0:
                w_ih_p = _pack_input_rows(w_ih_p, num_dir, H, H_lane)
            w_hh_p = jnp.pad(_pack_gate_cols(w_hh, H, H_lane),
                             ((0, H_lane - H), (0, 0)))
            w_ih_l.append(w_ih_p)
            w_hh_l.append(w_hh_p)
            b_l.append(_pack_gate_cols(b, H, H_lane))
        w_ih_stack = jnp.stack(w_ih_l).astype(jnp.bfloat16)      # (D, K, G)
        w_hh_stack = jnp.stack(w_hh_l).astype(jnp.bfloat16)      # (D, HL, G)
        b_stack = jnp.stack(b_l)                                 # (D, 1, G) f32

        K = layer_in.shape[-1]
        tm, tn = _pick_proj_tiles(T_pad, B_pad, K, G)
        x2d = layer_in.reshape(T_pad * B_pad, K)
        gx = _input_projection(x2d, w_ih_stack, b_stack, tm, tn)  # (D, M, G)
        gx = gx.reshape(num_dir, T_pad, B_pad, G)   # free split of the M axis

        h0_l = jnp.pad(h0[idx0:idx0 + num_dir],
                       ((0, 0), (0, B_pad - B), (0, H_lane - H)))
        c0_l = jnp.pad(c0[idx0:idx0 + num_dir],
                       ((0, 0), (0, B_pad - B), (0, H_lane - H)))
        layer_in = _run_recurrence(gx, h0_l, c0_l, w_hh_stack, tt, T)

    out = layer_in[:T, :B]
    if H_lane != H:                      # only for H not a multiple of 128
        pieces = [out[..., d * H_lane:d * H_lane + H] for d in range(num_dir)]
        out = pieces[0] if num_dir == 1 else jnp.concatenate(pieces, axis=-1)
    return out


# ---------------------------------------------------------------------------
# Pure-JAX reference (f32) for correctness checking
# ---------------------------------------------------------------------------
def _lstm_reference(X, params, h0, c0, n_layers, bidirectional, transposed):
    inp = X if transposed else jnp.transpose(X, (1, 0, 2))
    num_dir = 2 if bidirectional else 1
    H = h0.shape[-1]
    layer_in = inp
    for layer in range(n_layers):
        outs = []
        for dd in range(num_dir):
            w_ih, w_hh, b = params[layer * num_dir + dd]

            def cell(carry, x_t, w_ih=w_ih, w_hh=w_hh, b=b):
                h, c = carry
                gates = x_t @ w_ih + h @ w_hh + b[0]
                i = jax.nn.sigmoid(gates[:, :H])
                f = jax.nn.sigmoid(gates[:, H:2 * H])
                g = jnp.tanh(gates[:, 2 * H:3 * H])
                o = jax.nn.sigmoid(gates[:, 3 * H:])
                c = f * c + i * g
                h = o * jnp.tanh(c)
                return (h, c), h

            seq = layer_in if dd == 0 else layer_in[::-1]
            init = (h0[layer * num_dir + dd], c0[layer * num_dir + dd])
            _, hs = lax.scan(cell, init, seq)
            outs.append(hs if dd == 0 else hs[::-1])
        layer_in = outs[0] if num_dir == 1 else jnp.concatenate(outs, axis=-1)
    return layer_in


if __name__ == "__main__":
    feature_dim = 16
    n_hidden = 32
    n_layers = 2
    bidirectional = True
    batch = 2
    seq = 8
    num_dir = 2 if bidirectional else 1

    key = jax.random.PRNGKey(0)
    k_x, k_h0, k_c0, k_p = jax.random.split(key, 4)

    # X is (batch, seq, feature) since transposed=False in the module.
    X = jax.random.normal(k_x, (batch, seq, feature_dim), jnp.float32)

    # PyTorch draws random initial states in forward(); here they are
    # deterministic standard-normal draws from a fixed key.
    h0 = jax.random.normal(k_h0, (num_dir * n_layers, batch, n_hidden),
                           jnp.float32)
    c0 = jax.random.normal(k_c0, (num_dir * n_layers, batch, n_hidden),
                           jnp.float32)

    params = init_lstm_params(k_p, feature_dim, n_hidden, n_layers,
                              bidirectional)

    out = lstm_forward(X, params, h0, c0, n_layers=n_layers,
                       bidirectional=bidirectional, transposed=False)
    out = jax.block_until_ready(out)
    assert out.shape == (seq, batch, num_dir * n_hidden), out.shape
    assert bool(jnp.all(jnp.isfinite(out)))
    ref = _lstm_reference(X, params, h0, c0, n_layers, bidirectional, False)
    err = float(jnp.max(jnp.abs(out - ref)))
    assert err < 8e-2, f"max abs error {err}"

    # Lock in the reverse-direction / tail-padding path: T not a power of two,
    # time tile smaller than T (multi-block recurrence + padded tail steps).
    seq2 = 7
    X2 = jax.random.normal(k_x, (batch, seq2, feature_dim), jnp.float32)
    out2 = lstm_forward(X2, params, h0, c0, n_layers=n_layers,
                        bidirectional=bidirectional, transposed=False,
                        time_tile_cap=3)
    out2 = jax.block_until_ready(out2)
    assert out2.shape == (seq2, batch, num_dir * n_hidden), out2.shape
    ref2 = _lstm_reference(X2, params, h0, c0, n_layers, bidirectional, False)
    err2 = float(jnp.max(jnp.abs(out2 - ref2)))
    assert err2 < 8e-2, f"max abs error {err2}"

    print("KERNEL_OK")
</pallas_src>

<mosaic_0001>
module attributes {stable_mosaic.version = 11 : i64} {
  func.func @_proj_kernel(%arg0: i32, %arg1: i32, %arg2: i32, %arg3: memref<64x16xf32, #tpu.memory_space<vmem>>, %arg4: memref<1x16x512xbf16, #tpu.memory_space<vmem>>, %arg5: memref<1x1x512xf32, #tpu.memory_space<vmem>>, %arg6: memref<1x64x512xbf16, #tpu.memory_space<vmem>>) attributes {dimension_semantics = [#tpu.dimension_semantics<parallel>, #tpu.dimension_semantics<parallel>, #tpu.dimension_semantics<parallel>], iteration_bounds = array<i64: 2, 1, 1>, scalar_prefetch = 0 : i64, scratch_operands = 0 : i64, tpu.core_type = #tpu.core_type<tc>, window_params = [{transform_indices = @transform_0, window_bounds = array<i64: 64, 16>}, {transform_indices = @transform_1, window_bounds = array<i64: 1, 16, 512>}, {transform_indices = @transform_2, window_bounds = array<i64: 1, 1, 512>}, {transform_indices = @transform_3, window_bounds = array<i64: 1, 64, 512>}]} {
    %c0 = arith.constant 0 : index
    %c0_0 = arith.constant 0 : index
    %0 = vector.load %arg3[%c0, %c0_0] : memref<64x16xf32, #tpu.memory_space<vmem>>, vector<64x16xf32>
    %1 = arith.truncf %0 : vector<64x16xf32> to vector<64x16xbf16>
    %c0_1 = arith.constant 0 : index
    %c0_2 = arith.constant 0 : index
    %c0_3 = arith.constant 0 : index
    %2 = vector.load %arg4[%c0_1, %c0_2, %c0_3] : memref<1x16x512xbf16, #tpu.memory_space<vmem>>, vector<1x16x512xbf16>
    %3 = vector.shape_cast %2 : vector<1x16x512xbf16> to vector<16x512xbf16>
    %cst = arith.constant dense<0.000000e+00> : vector<64x512xf32>
    %4 = tpu.matmul %1, %3, %cst {dimension_numbers = #tpu.dot_dimension_numbers<[1], [0], [0], [1], [0, 0, 1, 1], [], []>} : vector<64x16xbf16>, vector<16x512xbf16>, vector<64x512xf32> -> vector<64x512xf32>
    %c0_4 = arith.constant 0 : index
    %c0_5 = arith.constant 0 : index
    %c0_6 = arith.constant 0 : index
    %5 = vector.load %arg5[%c0_4, %c0_5, %c0_6] : memref<1x1x512xf32, #tpu.memory_space<vmem>>, vector<1x1x512xf32>
    %6 = vector.shape_cast %5 : vector<1x1x512xf32> to vector<1x512xf32>
    %7 = vector.broadcast %6 : vector<1x512xf32> to vector<64x512xf32>
    %8 = arith.addf %4, %7 : vector<64x512xf32>
    %9 = arith.truncf %8 : vector<64x512xf32> to vector<64x512xbf16>
    %c0_7 = arith.constant 0 : index
    %c0_8 = arith.constant 0 : index
    %c0_9 = arith.constant 0 : index
    %10 = vector.load %arg6[%c0_7, %c0_8, %c0_9] : memref<1x64x512xbf16, #tpu.memory_space<vmem>>, vector<1x64x512xbf16>
    %11 = vector.shape_cast %10 : vector<1x64x512xbf16> to vector<64x512xbf16>
    %12 = vector.shape_cast %9 : vector<64x512xbf16> to vector<1x64x512xbf16>
    tpu.vector_store %arg6[%c0_7, %c0_8, %c0_9], %12 {strides = array<i32>} : memref<1x64x512xbf16, #tpu.memory_space<vmem>>, vector<1x64x512xbf16>,
    return
  }
  func.func @transform_0(%arg0: i32, %arg1: i32, %arg2: i32) -> (i32, i32) {
    %c0_i32 = arith.constant 0 : i32
    %c0_i32_0 = arith.constant 0 : i32
    return %arg2, %c0_i32 : i32, i32
  }
  func.func @transform_1(%arg0: i32, %arg1: i32, %arg2: i32) -> (i32, i32, i32) {
    %c0_i32 = arith.constant 0 : i32
    %c0_i32_0 = arith.constant 0 : i32
    return %arg0, %c0_i32, %arg1 : i32, i32, i32
  }
  func.func @transform_2(%arg0: i32, %arg1: i32, %arg2: i32) -> (i32, i32, i32) {
    %c0_i32 = arith.constant 0 : i32
    %c0_i32_0 = arith.constant 0 : i32
    return %arg0, %c0_i32, %arg1 : i32, i32, i32
  }
  func.func @transform_3(%arg0: i32, %arg1: i32, %arg2: i32) -> (i32, i32, i32) {
    %c0_i32 = arith.constant 0 : i32
    return %arg0, %arg2, %arg1 : i32, i32, i32
  }
}

module attributes {stable_mosaic.version = 11 : i64} {
  func.func @_lstm_recurrent_kernel(%arg0: i32, %arg1: i32, %arg2: memref<1x8x8x512xbf16, #tpu.memory_space<vmem>>, %arg3: memref<1x8x128xf32, #tpu.memory_space<vmem>>, %arg4: memref<1x8x128xf32, #tpu.memory_space<vmem>>, %arg5: memref<1x128x512xbf16, #tpu.memory_space<vmem>>, %arg6: memref<8x8x128xf32, #tpu.memory_space<vmem>>, %arg7: memref<8x128xf32, #tpu.memory_space<vmem>>, %arg8: memref<8x128xf32, #tpu.memory_space<vmem>>) attributes {dimension_semantics = [#tpu.dimension_semantics<parallel>, #tpu.dimension_semantics<arbitrary>], iteration_bounds = array<i64: 2, 1>, scalar_prefetch = 0 : i64, scratch_operands = 2 : i64, tpu.core_type = #tpu.core_type<tc>, window_params = [{transform_indices = @transform_0, window_bounds = array<i64: 1, 8, 8, 512>}, {transform_indices = @transform_1, window_bounds = array<i64: 1, 8, 128>}, {transform_indices = @transform_2, window_bounds = array<i64: 1, 8, 128>}, {transform_indices = @transform_3, window_bounds = array<i64: 1, 128, 512>}, {transform_indices = @transform_4, window_bounds = array<i64: 8, 8, 128>}]} {
    %c0_i32 = arith.constant 0 : i32
    %0 = arith.cmpi eq, %arg1, %c0_i32 : i32
    %1 = arith.extui %0 : i1 to i32
    %c0_i32_0 = arith.constant 0 : i32
    %2 = arith.cmpi ne, %1, %c0_i32_0 : i32
    scf.if %2 {
      %c0_6 = arith.constant 0 : index
      %c0_7 = arith.constant 0 : index
      %c0_8 = arith.constant 0 : index
      %11 = vector.load %arg3[%c0_6, %c0_7, %c0_8] : memref<1x8x128xf32, #tpu.memory_space<vmem>>, vector<1x8x128xf32>
      %12 = vector.shape_cast %11 : vector<1x8x128xf32> to vector<8x128xf32>
      %c0_9 = arith.constant 0 : index
      %c0_10 = arith.constant 0 : index
      %13 = vector.load %arg7[%c0_9, %c0_10] : memref<8x128xf32, #tpu.memory_space<vmem>>, vector<8x128xf32>
      tpu.vector_store %arg7[%c0_9, %c0_10], %12 {strides = array<i32>} : memref<8x128xf32, #tpu.memory_space<vmem>>, vector<8x128xf32>,
      %c0_11 = arith.constant 0 : index
      %c0_12 = arith.constant 0 : index
      %c0_13 = arith.constant 0 : index
      %14 = vector.load %arg4[%c0_11, %c0_12, %c0_13] : memref<1x8x128xf32, #tpu.memory_space<vmem>>, vector<1x8x128xf32>
      %15 = vector.shape_cast %14 : vector<1x8x128xf32> to vector<8x128xf32>
      %c0_14 = arith.constant 0 : index
      %c0_15 = arith.constant 0 : index
      %16 = vector.load %arg8[%c0_14, %c0_15] : memref<8x128xf32, #tpu.memory_space<vmem>>, vector<8x128xf32>
      tpu.vector_store %arg8[%c0_14, %c0_15], %15 {strides = array<i32>} : memref<8x128xf32, #tpu.memory_space<vmem>>, vector<8x128xf32>,
    } else {
    }
    %c0 = arith.constant 0 : index
    %c0_1 = arith.constant 0 : index
    %c0_2 = arith.constant 0 : index
    %3 = vector.load %arg5[%c0, %c0_1, %c0_2] : memref<1x128x512xbf16, #tpu.memory_space<vmem>>, vector<1x128x512xbf16>
    %4 = vector.shape_cast %3 : vector<1x128x512xbf16> to vector<128x512xbf16>
    %c0_i32_3 = arith.constant 0 : i32
    %5 = arith.cmpi eq, %arg0, %c0_i32_3 : i32
    %6 = arith.extui %5 : i1 to i32
    %c0_i32_4 = arith.constant 0 : i32
    %7 = arith.cmpi ne, %6, %c0_i32_4 : i32
    scf.if %7 {
      %c0_6 = arith.constant 0 : index
      %c0_7 = arith.constant 0 : index
      %11 = vector.load %arg7[%c0_6, %c0_7] : memref<8x128xf32, #tpu.memory_space<vmem>>, vector<8x128xf32>
      %c0_8 = arith.constant 0 : index
      %c0_9 = arith.constant 0 : index
      %12 = vector.load %arg8[%c0_8, %c0_9] : memref<8x128xf32, #tpu.memory_space<vmem>>, vector<8x128xf32>
      %c0_10 = arith.constant 0 : index
      %c0_11 = arith.constant 0 : index
      %c0_12 = arith.constant 0 : index
      %c0_13 = arith.constant 0 : index
      %13 = vector.load %arg2[%c0_10, %c0_11, %c0_12, %c0_13] : memref<1x8x8x512xbf16, #tpu.memory_space<vmem>>, vector<1x1x8x512xbf16>
      %14 = vector.shape_cast %13 : vector<1x1x8x512xbf16> to vector<8x512xbf16>
      %15 = arith.extf %14 : vector<8x512xbf16> to vector<8x512xf32>
      %16 = arith.truncf %11 : vector<8x128xf32> to vector<8x128xbf16>
      %cst = arith.constant dense<0.000000e+00> : vector<8x512xf32>
      %17 = tpu.matmul %16, %4, %cst {dimension_numbers = #tpu.dot_dimension_numbers<[1], [0], [0], [1], [0, 0, 1, 1], [], []>} : vector<8x128xbf16>, vector<128x512xbf16>, vector<8x512xf32> -> vector<8x512xf32>
      %18 = arith.addf %15, %17 : vector<8x512xf32>
      %19 = vector.extract_strided_slice %18 {offsets = [0, 0], sizes = [8, 128], strides = [1, 1]} : vector<8x512xf32> to vector<8x128xf32>
      %20 = arith.negf %19 : vector<8x128xf32>
      %21 = math.exp %20 : vector<8x128xf32>
      %cst_14 = arith.constant 1.000000e+00 : f32
      %22 = vector.broadcast %cst_14 : f32 to vector<8x128xf32>
      %23 = arith.addf %22, %21 : vector<8x128xf32>
      %24 = arith.divf %22, %23 : vector<8x128xf32>
      %25 = vector.extract_strided_slice %18 {offsets = [0, 128], sizes = [8, 128], strides = [1, 1]} : vector<8x512xf32> to vector<8x128xf32>
      %26 = arith.negf %25 : vector<8x128xf32>
      %27 = math.exp %26 : vector<8x128xf32>
      %cst_15 = arith.constant 1.000000e+00 : f32
      %28 = vector.broadcast %cst_15 : f32 to vector<8x128xf32>
      %29 = arith.addf %28, %27 : vector<8x128xf32>
      %30 = arith.divf %28, %29 : vector<8x128xf32>
      %31 = vector.extract_strided_slice %18 {offsets = [0, 256], sizes = [8, 128], strides = [1, 1]} : vector<8x512xf32> to vector<8x128xf32>
      %32 = math.tanh %31 : vector<8x128xf32>
      %33 = vector.extract_strided_slice %18 {offsets = [0, 384], sizes = [8, 128], strides = [1, 1]} : vector<8x512xf32> to vector<8x128xf32>
      %34 = arith.negf %33 : vector<8x128xf32>
      %35 = math.exp %34 : vector<8x128xf32>
      %cst_16 = arith.constant 1.000000e+00 : f32
      %36 = vector.broadcast %cst_16 : f32 to vector<8x128xf32>
      %37 = arith.addf %36, %35 : vector<8x128xf32>
      %38 = arith.divf %36, %37 : vector<8x128xf32>
      %39 = arith.mulf %30, %12 : vector<8x128xf32>
      %40 = arith.mulf %24, %32 : vector<8x128xf32>
      %41 = arith.addf %39, %40 : vector<8x128xf32>
      %42 = math.tanh %41 : vector<8x128xf32>
      %43 = arith.mulf %38, %42 : vector<8x128xf32>
      %c0_17 = arith.constant 0 : index
      %c0_18 = arith.constant 0 : index
      %c0_19 = arith.constant 0 : index
      %44 = vector.load %arg6[%c0_17, %c0_18, %c0_19] : memref<8x8x128xf32, #tpu.memory_space<vmem>>, vector<1x8x128xf32>
      %45 = vector.shape_cast %44 : vector<1x8x128xf32> to vector<8x128xf32>
      %46 = vector.shape_cast %43 : vector<8x128xf32> to vector<1x8x128xf32>
      tpu.vector_store %arg6[%c0_17, %c0_18, %c0_19], %46 {strides = array<i32>} : memref<8x8x128xf32, #tpu.memory_space<vmem>>, vector<1x8x128xf32>,
      %c0_20 = arith.constant 0 : index
      %c1 = arith.constant 1 : index
      %c0_21 = arith.constant 0 : index
      %c0_22 = arith.constant 0 : index
      %47 = vector.load %arg2[%c0_20, %c1, %c0_21, %c0_22] : memref<1x8x8x512xbf16, #tpu.memory_space<vmem>>, vector<1x1x8x512xbf16>
      %48 = vector.shape_cast %47 : vector<1x1x8x512xbf16> to vector<8x512xbf16>
      %49 = arith.extf %48 : vector<8x512xbf16> to vector<8x512xf32>
      %50 = arith.truncf %43 : vector<8x128xf32> to vector<8x128xbf16>
      %cst_23 = arith.constant dense<0.000000e+00> : vector<8x512xf32>
      %51 = tpu.matmul %50, %4, %cst_23 {dimension_numbers = #tpu.dot_dimension_numbers<[1], [0], [0], [1], [0, 0, 1, 1], [], []>} : vector<8x128xbf16>, vector<128x512xbf16>, vector<8x512xf32> -> vector<8x512xf32>
      %52 = arith.addf %49, %51 : vector<8x512xf32>
      %53 = vector.extract_strided_slice %52 {offsets = [0, 0], sizes = [8, 128], strides = [1, 1]} : vector<8x512xf32> to vector<8x128xf32>
      %54 = arith.negf %53 : vector<8x128xf32>
      %55 = math.exp %54 : vector<8x128xf32>
      %cst_24 = arith.constant 1.000000e+00 : f32
      %56 = vector.broadcast %cst_24 : f32 to vector<8x128xf32>
      %57 = arith.addf %56, %55 : vector<8x128xf32>
      %58 = arith.divf %56, %57 : vector<8x128xf32>
      %59 = vector.extract_strided_slice %52 {offsets = [0, 128], sizes = [8, 128], strides = [1, 1]} : vector<8x512xf32> to vector<8x128xf32>
      %60 = arith.negf %59 : vector<8x128xf32>
      %61 = math.exp %60 : vector<8x128xf32>
      %cst_25 = arith.constant 1.000000e+00 : f32
      %62 = vector.broadcast %cst_25 : f32 to vector<8x128xf32>
      %63 = arith.addf %62, %61 : vector<8x128xf32>
      %64 = arith.divf %62, %63 : vector<8x128xf32>
      %65 = vector.extract_strided_slice %52 {offsets = [0, 256], sizes = [8, 128], strides = [1, 1]} : vector<8x512xf32> to vector<8x128xf32>
      %66 = math.tanh %65 : vector<8x128xf32>
      %67 = vector.extract_strided_slice %52 {offsets = [0, 384], sizes = [8, 128], strides = [1, 1]} : vector<8x512xf32> to vector<8x128xf32>
      %68 = arith.negf %67 : vector<8x128xf32>
      %69 = math.exp %68 : vector<8x128xf32>
      %cst_26 = arith.constant 1.000000e+00 : f32
      %70 = vector.broadcast %cst_26 : f32 to vector<8x128xf32>
      %71 = arith.addf %70, %69 : vector<8x128xf32>
      %72 = arith.divf %70, %71 : vector<8x128xf32>
      %73 = arith.mulf %64, %41 : vector<8x128xf32>
      %74 = arith.mulf %58, %66 : vector<8x128xf32>
      %75 = arith.addf %73, %74 : vector<8x128xf32>
      %76 = math.tanh %75 : vector<8x128xf32>
      %77 = arith.mulf %72, %76 : vector<8x128xf32>
      %c1_27 = arith.constant 1 : index
      %c0_28 = arith.constant 0 : index
      %c0_29 = arith.constant 0 : index
      %78 = vector.load %arg6[%c1_27, %c0_28, %c0_29] : memref<8x8x128xf32, #tpu.memory_space<vmem>>, vector<1x8x128xf32>
      %79 = vector.shape_cast %78 : vector<1x8x128xf32> to vector<8x128xf32>
      %80 = vector.shape_cast %77 : vector<8x128xf32> to vector<1x8x128xf32>
      tpu.vector_store %arg6[%c1_27, %c0_28, %c0_29], %80 {strides = array<i32>} : memref<8x8x128xf32, #tpu.memory_space<vmem>>, vector<1x8x128xf32>,
      %c0_30 = arith.constant 0 : index
      %c2 = arith.constant 2 : index
      %c0_31 = arith.constant 0 : index
      %c0_32 = arith.constant 0 : index
      %81 = vector.load %arg2[%c0_30, %c2, %c0_31, %c0_32] : memref<1x8x8x512xbf16, #tpu.memory_space<vmem>>, vector<1x1x8x512xbf16>
      %82 = vector.shape_cast %81 : vector<1x1x8x512xbf16> to vector<8x512xbf16>
      %83 = arith.extf %82 : vector<8x512xbf16> to vector<8x512xf32>
      %84 = arith.truncf %77 : vector<8x128xf32> to vector<8x128xbf16>
      %cst_33 = arith.constant dense<0.000000e+00> : vector<8x512xf32>
      %85 = tpu.matmul %84, %4, %cst_33 {dimension_numbers = #tpu.dot_dimension_numbers<[1], [0], [0], [1], [0, 0, 1, 1], [], []>} : vector<8x128xbf16>, vector<128x512xbf16>, vector<8x512xf32> -> vector<8x512xf32>
      %86 = arith.addf %83, %85 : vector<8x512xf32>
      %87 = vector.extract_strided_slice %86 {offsets = [0, 0], sizes = [8, 128], strides = [1, 1]} : vector<8x512xf32> to vector<8x128xf32>
      %88 = arith.negf %87 : vector<8x128xf32>
      %89 = math.exp %88 : vector<8x128xf32>
      %cst_34 = arith.constant 1.000000e+00 : f32
      %90 = vector.broadcast %cst_34 : f32 to vector<8x128xf32>
      %91 = arith.addf %90, %89 : vector<8x128xf32>
      %92 = arith.divf %90, %91 : vector<8x128xf32>
      %93 = vector.extract_strided_slice %86 {offsets = [0, 128], sizes = [8, 128], strides = [1, 1]} : vector<8x512xf32> to vector<8x128xf32>
      %94 = arith.negf %93 : vector<8x128xf32>
      %95 = math.exp %94 : vector<8x128xf32>
      %cst_35 = arith.constant 1.000000e+00 : f32
      %96 = vector.broadcast %cst_35 : f32 to vector<8x128xf32>
      %97 = arith.addf %96, %95 : vector<8x128xf32>
      %98 = arith.divf %96, %97 : vector<8x128xf32>
      %99 = vector.extract_strided_slice %86 {offsets = [0, 256], sizes = [8, 128], strides = [1, 1]} : vector<8x512xf32> to vector<8x128xf32>
      %100 = math.tanh %99 : vector<8x128xf32>
      %101 = vector.extract_strided_slice %86 {offsets = [0, 384], sizes = [8, 128], strides = [1, 1]} : vector<8x512xf32> to vector<8x128xf32>
      %102 = arith.negf %101 : vector<8x128xf32>
      %103 = math.exp %102 : vector<8x128xf32>
      %cst_36 = arith.constant 1.000000e+00 : f32
      %104 = vector.broadcast %cst_36 : f32 to vector<8x128xf32>
      %105 = arith.addf %104, %103 : vector<8x128xf32>
      %106 = arith.divf %104, %105 : vector<8x128xf32>
      %107 = arith.mulf %98, %75 : vector<8x128xf32>
      %108 = arith.mulf %92, %100 : vector<8x128xf32>
      %109 = arith.addf %107, %108 : vector<8x128xf32>
      %110 = math.tanh %109 : vector<8x128xf32>
      %111 = arith.mulf %106, %110 : vector<8x128xf32>
      %c2_37 = arith.constant 2 : index
      %c0_38 = arith.constant 0 : index
      %c0_39 = arith.constant 0 : index
      %112 = vector.load %arg6[%c2_37, %c0_38, %c0_39] : memref<8x8x128xf32, #tpu.memory_space<vmem>>, vector<1x8x128xf32>
      %113 = vector.shape_cast %112 : vector<1x8x128xf32> to vector<8x128xf32>
      %114 = vector.shape_cast %111 : vector<8x128xf32> to vector<1x8x128xf32>
      tpu.vector_store %arg6[%c2_37, %c0_38, %c0_39], %114 {strides = array<i32>} : memref<8x8x128xf32, #tpu.memory_space<vmem>>, vector<1x8x128xf32>,
      %c0_40 = arith.constant 0 : index
      %c3 = arith.constant 3 : index
      %c0_41 = arith.constant 0 : index
      %c0_42 = arith.constant 0 : index
      %115 = vector.load %arg2[%c0_40, %c3, %c0_41, %c0_42] : memref<1x8x8x512xbf16, #tpu.memory_space<vmem>>, vector<1x1x8x512xbf16>
      %116 = vector.shape_cast %115 : vector<1x1x8x512xbf16> to vector<8x512xbf16>
      %117 = arith.extf %116 : vector<8x512xbf16> to vector<8x512xf32>
      %118 = arith.truncf %111 : vector<8x128xf32> to vector<8x128xbf16>
      %cst_43 = arith.constant dense<0.000000e+00> : vector<8x512xf32>
      %119 = tpu.matmul %118, %4, %cst_43 {dimension_numbers = #tpu.dot_dimension_numbers<[1], [0], [0], [1], [0, 0, 1, 1], [], []>} : vector<8x128xbf16>, vector<128x512xbf16>, vector<8x512xf32> -> vector<8x512xf32>
      %120 = arith.addf %117, %119 : vector<8x512xf32>
      %121 = vector.extract_strided_slice %120 {offsets = [0, 0], sizes = [8, 128], strides = [1, 1]} : vector<8x512xf32> to vector<8x128xf32>
      %122 = arith.negf %121 : vector<8x128xf32>
      %123 = math.exp %122 : vector<8x128xf32>
      %cst_44 = arith.constant 1.000000e+00 : f32
      %124 = vector.broadcast %cst_44 : f32 to vector<8x128xf32>
      %125 = arith.addf %124, %123 : vector<8x128xf32>
      %126 = arith.divf %124, %125 : vector<8x128xf32>
      %127 = vector.extract_strided_slice %120 {offsets = [0, 128], sizes = [8, 128], strides = [1, 1]} : vector<8x512xf32> to vector<8x128xf32>
      %128 = arith.negf %127 : vector<8x128xf32>
      %129 = math.exp %128 : vector<8x128xf32>
      %cst_45 = arith.constant 1.000000e+00 : f32
      %130 = vector.broadcast %cst_45 : f32 to vector<8x128xf32>
      %131 = arith.addf %130, %129 : vector<8x128xf32>
      %132 = arith.divf %130, %131 : vector<8x128xf32>
      %133 = vector.extract_strided_slice %120 {offsets = [0, 256], sizes = [8, 128], strides = [1, 1]} : vector<8x512xf32> to vector<8x128xf32>
      %134 = math.tanh %133 : vector<8x128xf32>
      %135 = vector.extract_strided_slice %120 {offsets = [0, 384], sizes = [8, 128], strides = [1, 1]} : vector<8x512xf32> to vector<8x128xf32>
      %136 = arith.negf %135 : vector<8x128xf32>
      %137 = math.exp %136 : vector<8x128xf32>
      %cst_46 = arith.constant 1.000000e+00 : f32
      %138 = vector.broadcast %cst_46 : f32 to vector<8x128xf32>
      %139 = arith.addf %138, %137 : vector<8x128xf32>
      %140 = arith.divf %138, %139 : vector<8x128xf32>
      %141 = arith.mulf %132, %109 : vector<8x128xf32>
      %142 = arith.mulf %126, %134 : vector<8x128xf32>
      %143 = arith.addf %141, %142 : vector<8x128xf32>
      %144 = math.tanh %143 : vector<8x128xf32>
      %145 = arith.mulf %140, %144 : vector<8x128xf32>
      %c3_47 = arith.constant 3 : index
      %c0_48 = arith.constant 0 : index
      %c0_49 = arith.constant 0 : index
      %146 = vector.load %arg6[%c3_47, %c0_48, %c0_49] : memref<8x8x128xf32, #tpu.memory_space<vmem>>, vector<1x8x128xf32>
      %147 = vector.shape_cast %146 : vector<1x8x128xf32> to vector<8x128xf32>
      %148 = vector.shape_cast %145 : vector<8x128xf32> to vector<1x8x128xf32>
      tpu.vector_store %arg6[%c3_47, %c0_48, %c0_49], %148 {strides = array<i32>} : memref<8x8x128xf32, #tpu.memory_space<vmem>>, vector<1x8x128xf32>,
      %c0_50 = arith.constant 0 : index
      %c4 = arith.constant 4 : index
      %c0_51 = arith.constant 0 : index
      %c0_52 = arith.constant 0 : index
      %149 = vector.load %arg2[%c0_50, %c4, %c0_51, %c0_52] : memref<1x8x8x512xbf16, #tpu.memory_space<vmem>>, vector<1x1x8x512xbf16>
      %150 = vector.shape_cast %149 : vector<1x1x8x512xbf16> to vector<8x512xbf16>
      %151 = arith.extf %150 : vector<8x512xbf16> to vector<8x512xf32>
      %152 = arith.truncf %145 : vector<8x128xf32> to vector<8x128xbf16>
      %cst_53 = arith.constant dense<0.000000e+00> : vector<8x512xf32>
      %153 = tpu.matmul %152, %4, %cst_53 {dimension_numbers = #tpu.dot_dimension_numbers<[1], [0], [0], [1], [0, 0, 1, 1], [], []>} : vector<8x128xbf16>, vector<128x512xbf16>, vector<8x512xf32> -> vector<8x512xf32>
      %154 = arith.addf %151, %153 : vector<8x512xf32>
      %155 = vector.extract_strided_slice %154 {offsets = [0, 0], sizes = [8, 128], strides = [1, 1]} : vector<8x512xf32> to vector<8x128xf32>
      %156 = arith.negf %155 : vector<8x128xf32>
      %157 = math.exp %156 : vector<8x128xf32>
      %cst_54 = arith.constant 1.000000e+00 : f32
      %158 = vector.broadcast %cst_54 : f32 to vector<8x128xf32>
      %159 = arith.addf %158, %157 : vector<8x128xf32>
      %160 = arith.divf %158, %159 : vector<8x128xf32>
      %161 = vector.extract_strided_slice %154 {offsets = [0, 128], sizes = [8, 128], strides = [1, 1]} : vector<8x512xf32> to vector<8x128xf32>
      %162 = arith.negf %161 : vector<8x128xf32>
      %163 = math.exp %162 : vector<8x128xf32>
      %cst_55 = arith.constant 1.000000e+00 : f32
      %164 = vector.broadcast %cst_55 : f32 to vector<8x128xf32>
      %165 = arith.addf %164, %163 : vector<8x128xf32>
      %166 = arith.divf %164, %165 : vector<8x128xf32>
      %167 = vector.extract_strided_slice %154 {offsets = [0, 256], sizes = [8, 128], strides = [1, 1]} : vector<8x512xf32> to vector<8x128xf32>
      %168 = math.tanh %167 : vector<8x128xf32>
      %169 = vector.extract_strided_slice %154 {offsets = [0, 384], sizes = [8, 128], strides = [1, 1]} : vector<8x512xf32> to vector<8x128xf32>
      %170 = arith.negf %169 : vector<8x128xf32>
      %171 = math.exp %170 : vector<8x128xf32>
      %cst_56 = arith.constant 1.000000e+00 : f32
      %172 = vector.broadcast %cst_56 : f32 to vector<8x128xf32>
      %173 = arith.addf %172, %171 : vector<8x128xf32>
      %174 = arith.divf %172, %173 : vector<8x128xf32>
      %175 = arith.mulf %166, %143 : vector<8x128xf32>
      %176 = arith.mulf %160, %168 : vector<8x128xf32>
      %177 = arith.addf %175, %176 : vector<8x128xf32>
      %178 = math.tanh %177 : vector<8x128xf32>
      %179 = arith.mulf %174, %178 : vector<8x128xf32>
      %c4_57 = arith.constant 4 : index
      %c0_58 = arith.constant 0 : index
      %c0_59 = arith.constant 0 : index
      %180 = vector.load %arg6[%c4_57, %c0_58, %c0_59] : memref<8x8x128xf32, #tpu.memory_space<vmem>>, vector<1x8x128xf32>
      %181 = vector.shape_cast %180 : vector<1x8x128xf32> to vector<8x128xf32>
      %182 = vector.shape_cast %179 : vector<8x128xf32> to vector<1x8x128xf32>
      tpu.vector_store %arg6[%c4_57, %c0_58, %c0_59], %182 {strides = array<i32>} : memref<8x8x128xf32, #tpu.memory_space<vmem>>, vector<1x8x128xf32>,
      %c0_60 = arith.constant 0 : index
      %c5 = arith.constant 5 : index
      %c0_61 = arith.constant 0 : index
      %c0_62 = arith.constant 0 : index
      %183 = vector.load %arg2[%c0_60, %c5, %c0_61, %c0_62] : memref<1x8x8x512xbf16, #tpu.memory_space<vmem>>, vector<1x1x8x512xbf16>
      %184 = vector.shape_cast %183 : vector<1x1x8x512xbf16> to vector<8x512xbf16>
      %185 = arith.extf %184 : vector<8x512xbf16> to vector<8x512xf32>
      %186 = arith.truncf %179 : vector<8x128xf32> to vector<8x128xbf16>
      %cst_63 = arith.constant dense<0.000000e+00> : vector<8x512xf32>
      %187 = tpu.matmul %186, %4, %cst_63 {dimension_numbers = #tpu.dot_dimension_numbers<[1], [0], [0], [1], [0, 0, 1, 1], [], []>} : vector<8x128xbf16>, vector<128x512xbf16>, vector<8x512xf32> -> vector<8x512xf32>
      %188 = arith.addf %185, %187 : vector<8x512xf32>
      %189 = vector.extract_strided_slice %188 {offsets = [0, 0], sizes = [8, 128], strides = [1, 1]} : vector<8x512xf32> to vector<8x128xf32>
      %190 = arith.negf %189 : vector<8x128xf32>
      %191 = math.exp %190 : vector<8x128xf32>
      %cst_64 = arith.constant 1.000000e+00 : f32
      %192 = vector.broadcast %cst_64 : f32 to vector<8x128xf32>
      %193 = arith.addf %192, %191 : vector<8x128xf32>
      %194 = arith.divf %192, %193 : vector<8x128xf32>
      %195 = vector.extract_strided_slice %188 {offsets = [0, 128], sizes = [8, 128], strides = [1, 1]} : vector<8x512xf32> to vector<8x128xf32>
      %196 = arith.negf %195 : vector<8x128xf32>
      %197 = math.exp %196 : vector<8x128xf32>
      %cst_65 = arith.constant 1.000000e+00 : f32
      %198 = vector.broadcast %cst_65 : f32 to vector<8x128xf32>
      %199 = arith.addf %198, %197 : vector<8x128xf32>
      %200 = arith.divf %198, %199 : vector<8x128xf32>
      %201 = vector.extract_strided_slice %188 {offsets = [0, 256], sizes = [8, 128], strides = [1, 1]} : vector<8x512xf32> to vector<8x128xf32>
      %202 = math.tanh %201 : vector<8x128xf32>
      %203 = vector.extract_strided_slice %188 {offsets = [0, 384], sizes = [8, 128], strides = [1, 1]} : vector<8x512xf32> to vector<8x128xf32>
      %204 = arith.negf %203 : vector<8x128xf32>
      %205 = math.exp %204 : vector<8x128xf32>
      %cst_66 = arith.constant 1.000000e+00 : f32
      %206 = vector.broadcast %cst_66 : f32 to vector<8x128xf32>
      %207 = arith.addf %206, %205 : vector<8x128xf32>
      %208 = arith.divf %206, %207 : vector<8x128xf32>
      %209 = arith.mulf %200, %177 : vector<8x128xf32>
      %210 = arith.mulf %194, %202 : vector<8x128xf32>
      %211 = arith.addf %209, %210 : vector<8x128xf32>
      %212 = math.tanh %211 : vector<8x128xf32>
      %213 = arith.mulf %208, %212 : vector<8x128xf32>
      %c5_67 = arith.constant 5 : index
      %c0_68 = arith.constant 0 : index
      %c0_69 = arith.constant 0 : index
      %214 = vector.load %arg6[%c5_67, %c0_68, %c0_69] : memref<8x8x128xf32, #tpu.memory_space<vmem>>, vector<1x8x128xf32>
      %215 = vector.shape_cast %214 : vector<1x8x128xf32> to vector<8x128xf32>
      %216 = vector.shape_cast %213 : vector<8x128xf32> to vector<1x8x128xf32>
      tpu.vector_store %arg6[%c5_67, %c0_68, %c0_69], %216 {strides = array<i32>} : memref<8x8x128xf32, #tpu.memory_space<vmem>>, vector<1x8x128xf32>,
      %c0_70 = arith.constant 0 : index
      %c6 = arith.constant 6 : index
      %c0_71 = arith.constant 0 : index
      %c0_72 = arith.constant 0 : index
      %217 = vector.load %arg2[%c0_70, %c6, %c0_71, %c0_72] : memref<1x8x8x512xbf16, #tpu.memory_space<vmem>>, vector<1x1x8x512xbf16>
      %218 = vector.shape_cast %217 : vector<1x1x8x512xbf16> to vector<8x512xbf16>
      %219 = arith.extf %218 : vector<8x512xbf16> to vector<8x512xf32>
      %220 = arith.truncf %213 : vector<8x128xf32> to vector<8x128xbf16>
      %cst_73 = arith.constant dense<0.000000e+00> : vector<8x512xf32>
      %221 = tpu.matmul %220, %4, %cst_73 {dimension_numbers = #tpu.dot_dimension_numbers<[1], [0], [0], [1], [0, 0, 1, 1], [], []>} : vector<8x128xbf16>, vector<128x512xbf16>, vector<8x512xf32> -> vector<8x512xf32>
      %222 = arith.addf %219, %221 : vector<8x512xf32>
      %223 = vector.extract_strided_slice %222 {offsets = [0, 0], sizes = [8, 128], strides = [1, 1]} : vector<8x512xf32> to vector<8x128xf32>
      %224 = arith.negf %223 : vector<8x128xf32>
      %225 = math.exp %224 : vector<8x128xf32>
      %cst_74 = arith.constant 1.000000e+00 : f32
      %226 = vector.broadcast %cst_74 : f32 to vector<8x128xf32>
      %227 = arith.addf %226, %225 : vector<8x128xf32>
      %228 = arith.divf %226, %227 : vector<8x128xf32>
      %229 = vector.extract_strided_slice %222 {offsets = [0, 128], sizes = [8, 128], strides = [1, 1]} : vector<8x512xf32> to vector<8x128xf32>
      %230 = arith.negf %229 : vector<8x128xf32>
      %231 = math.exp %230 : vector<8x128xf32>
      %cst_75 = arith.constant 1.000000e+00 : f32
      %232 = vector.broadcast %cst_75 : f32 to vector<8x128xf32>
      %233 = arith.addf %232, %231 : vector<8x128xf32>
      %234 = arith.divf %232, %233 : vector<8x128xf32>
      %235 = vector.extract_strided_slice %222 {offsets = [0, 256], sizes = [8, 128], strides = [1, 1]} : vector<8x512xf32> to vector<8x128xf32>
      %236 = math.tanh %235 : vector<8x128xf32>
      %237 = vector.extract_strided_slice %222 {offsets = [0, 384], sizes = [8, 128], strides = [1, 1]} : vector<8x512xf32> to vector<8x128xf32>
      %238 = arith.negf %237 : vector<8x128xf32>
      %239 = math.exp %238 : vector<8x128xf32>
      %cst_76 = arith.constant 1.000000e+00 : f32
      %240 = vector.broadcast %cst_76 : f32 to vector<8x128xf32>
      %241 = arith.addf %240, %239 : vector<8x128xf32>
      %242 = arith.divf %240, %241 : vector<8x128xf32>
      %243 = arith.mulf %234, %211 : vector<8x128xf32>
      %244 = arith.mulf %228, %236 : vector<8x128xf32>
      %245 = arith.addf %243, %244 : vector<8x128xf32>
      %246 = math.tanh %245 : vector<8x128xf32>
      %247 = arith.mulf %242, %246 : vector<8x128xf32>
      %c6_77 = arith.constant 6 : index
      %c0_78 = arith.constant 0 : index
      %c0_79 = arith.constant 0 : index
      %248 = vector.load %arg6[%c6_77, %c0_78, %c0_79] : memref<8x8x128xf32, #tpu.memory_space<vmem>>, vector<1x8x128xf32>
      %249 = vector.shape_cast %248 : vector<1x8x128xf32> to vector<8x128xf32>
      %250 = vector.shape_cast %247 : vector<8x128xf32> to vector<1x8x128xf32>
      tpu.vector_store %arg6[%c6_77, %c0_78, %c0_79], %250 {strides = array<i32>} : memref<8x8x128xf32, #tpu.memory_space<vmem>>, vector<1x8x128xf32>,
      %c0_80 = arith.constant 0 : index
      %c7 = arith.constant 7 : index
      %c0_81 = arith.constant 0 : index
      %c0_82 = arith.constant 0 : index
      %251 = vector.load %arg2[%c0_80, %c7, %c0_81, %c0_82] : memref<1x8x8x512xbf16, #tpu.memory_space<vmem>>, vector<1x1x8x512xbf16>
      %252 = vector.shape_cast %251 : vector<1x1x8x512xbf16> to vector<8x512xbf16>
      %253 = arith.extf %252 : vector<8x512xbf16> to vector<8x512xf32>
      %254 = arith.truncf %247 : vector<8x128xf32> to vector<8x128xbf16>
      %cst_83 = arith.constant dense<0.000000e+00> : vector<8x512xf32>
      %255 = tpu.matmul %254, %4, %cst_83 {dimension_numbers = #tpu.dot_dimension_numbers<[1], [0], [0], [1], [0, 0, 1, 1], [], []>} : vector<8x128xbf16>, vector<128x512xbf16>, vector<8x512xf32> -> vector<8x512xf32>
      %256 = arith.addf %253, %255 : vector<8x512xf32>
      %257 = vector.extract_strided_slice %256 {offsets = [0, 0], sizes = [8, 128], strides = [1, 1]} : vector<8x512xf32> to vector<8x128xf32>
      %258 = arith.negf %257 : vector<8x128xf32>
      %259 = math.exp %258 : vector<8x128xf32>
      %cst_84 = arith.constant 1.000000e+00 : f32
      %260 = vector.broadcast %cst_84 : f32 to vector<8x128xf32>
      %261 = arith.addf %260, %259 : vector<8x128xf32>
      %262 = arith.divf %260, %261 : vector<8x128xf32>
      %263 = vector.extract_strided_slice %256 {offsets = [0, 128], sizes = [8, 128], strides = [1, 1]} : vector<8x512xf32> to vector<8x128xf32>
      %264 = arith.negf %263 : vector<8x128xf32>
      %265 = math.exp %264 : vector<8x128xf32>
      %cst_85 = arith.constant 1.000000e+00 : f32
      %266 = vector.broadcast %cst_85 : f32 to vector<8x128xf32>
      %267 = arith.addf %266, %265 : vector<8x128xf32>
      %268 = arith.divf %266, %267 : vector<8x128xf32>
      %269 = vector.extract_strided_slice %256 {offsets = [0, 256], sizes = [8, 128], strides = [1, 1]} : vector<8x512xf32> to vector<8x128xf32>
      %270 = math.tanh %269 : vector<8x128xf32>
      %271 = vector.extract_strided_slice %256 {offsets = [0, 384], sizes = [8, 128], strides = [1, 1]} : vector<8x512xf32> to vector<8x128xf32>
      %272 = arith.negf %271 : vector<8x128xf32>
      %273 = math.exp %272 : vector<8x128xf32>
      %cst_86 = arith.constant 1.000000e+00 : f32
      %274 = vector.broadcast %cst_86 : f32 to vector<8x128xf32>
      %275 = arith.addf %274, %273 : vector<8x128xf32>
      %276 = arith.divf %274, %275 : vector<8x128xf32>
      %277 = arith.mulf %268, %245 : vector<8x128xf32>
      %278 = arith.mulf %262, %270 : vector<8x128xf32>
      %279 = arith.addf %277, %278 : vector<8x128xf32>
      %280 = math.tanh %279 : vector<8x128xf32>
      %281 = arith.mulf %276, %280 : vector<8x128xf32>
      %c7_87 = arith.constant 7 : index
      %c0_88 = arith.constant 0 : index
      %c0_89 = arith.constant 0 : index
      %282 = vector.load %arg6[%c7_87, %c0_88, %c0_89] : memref<8x8x128xf32, #tpu.memory_space<vmem>>, vector<1x8x128xf32>
      %283 = vector.shape_cast %282 : vector<1x8x128xf32> to vector<8x128xf32>
      %284 = vector.shape_cast %281 : vector<8x128xf32> to vector<1x8x128xf32>
      tpu.vector_store %arg6[%c7_87, %c0_88, %c0_89], %284 {strides = array<i32>} : memref<8x8x128xf32, #tpu.memory_space<vmem>>, vector<1x8x128xf32>,
      %c0_90 = arith.constant 0 : index
      %c0_91 = arith.constant 0 : index
      %285 = vector.load %arg7[%c0_90, %c0_91] : memref<8x128xf32, #tpu.memory_space<vmem>>, vector<8x128xf32>
      tpu.vector_store %arg7[%c0_90, %c0_91], %281 {strides = array<i32>} : memref<8x128xf32, #tpu.memory_space<vmem>>, vector<8x128xf32>,
      %c0_92 = arith.constant 0 : index
      %c0_93 = arith.constant 0 : index
      %286 = vector.load %arg8[%c0_92, %c0_93] : memref<8x128xf32, #tpu.memory_space<vmem>>, vector<8x128xf32>
      tpu.vector_store %arg8[%c0_92, %c0_93], %279 {strides = array<i32>} : memref<8x128xf32, #tpu.memory_space<vmem>>, vector<8x128xf32>,
    } else {
    }
    %c1_i32 = arith.constant 1 : i32
    %8 = arith.cmpi eq, %arg0, %c1_i32 : i32
    %9 = arith.extui %8 : i1 to i32
    %c0_i32_5 = arith.constant 0 : i32
    %10 = arith.cmpi ne, %9, %c0_i32_5 : i32
    scf.if %10 {
      %c0_6 = arith.constant 0 : index
      %c0_7 = arith.constant 0 : index
      %11 = vector.load %arg7[%c0_6, %c0_7] : memref<8x128xf32, #tpu.memory_space<vmem>>, vector<8x128xf32>
      %c0_8 = arith.constant 0 : index
      %c0_9 = arith.constant 0 : index
      %12 = vector.load %arg8[%c0_8, %c0_9] : memref<8x128xf32, #tpu.memory_space<vmem>>, vector<8x128xf32>
      %c0_10 = arith.constant 0 : index
      %c7 = arith.constant 7 : index
      %c0_11 = arith.constant 0 : index
      %c0_12 = arith.constant 0 : index
      %13 = vector.load %arg2[%c0_10, %c7, %c0_11, %c0_12] : memref<1x8x8x512xbf16, #tpu.memory_space<vmem>>, vector<1x1x8x512xbf16>
      %14 = vector.shape_cast %13 : vector<1x1x8x512xbf16> to vector<8x512xbf16>
      %15 = arith.extf %14 : vector<8x512xbf16> to vector<8x512xf32>
      %16 = arith.truncf %11 : vector<8x128xf32> to vector<8x128xbf16>
      %cst = arith.constant dense<0.000000e+00> : vector<8x512xf32>
      %17 = tpu.matmul %16, %4, %cst {dimension_numbers = #tpu.dot_dimension_numbers<[1], [0], [0], [1], [0, 0, 1, 1], [], []>} : vector<8x128xbf16>, vector<128x512xbf16>, vector<8x512xf32> -> vector<8x512xf32>
      %18 = arith.addf %15, %17 : vector<8x512xf32>
      %19 = vector.extract_strided_slice %18 {offsets = [0, 0], sizes = [8, 128], strides = [1, 1]} : vector<8x512xf32> to vector<8x128xf32>
      %20 = arith.negf %19 : vector<8x128xf32>
      %21 = math.exp %20 : vector<8x128xf32>
      %cst_13 = arith.constant 1.000000e+00 : f32
      %22 = vector.broadcast %cst_13 : f32 to vector<8x128xf32>
      %23 = arith.addf %22, %21 : vector<8x128xf32>
      %24 = arith.divf %22, %23 : vector<8x128xf32>
      %25 = vector.extract_strided_slice %18 {offsets = [0, 128], sizes = [8, 128], strides = [1, 1]} : vector<8x512xf32> to vector<8x128xf32>
      %26 = arith.negf %25 : vector<8x128xf32>
      %27 = math.exp %26 : vector<8x128xf32>
      %cst_14 = arith.constant 1.000000e+00 : f32
      %28 = vector.broadcast %cst_14 : f32 to vector<8x128xf32>
      %29 = arith.addf %28, %27 : vector<8x128xf32>
      %30 = arith.divf %28, %29 : vector<8x128xf32>
      %31 = vector.extract_strided_slice %18 {offsets = [0, 256], sizes = [8, 128], strides = [1, 1]} : vector<8x512xf32> to vector<8x128xf32>
      %32 = math.tanh %31 : vector<8x128xf32>
      %33 = vector.extract_strided_slice %18 {offsets = [0, 384], sizes = [8, 128], strides = [1, 1]} : vector<8x512xf32> to vector<8x128xf32>
      %34 = arith.negf %33 : vector<8x128xf32>
      %35 = math.exp %34 : vector<8x128xf32>
      %cst_15 = arith.constant 1.000000e+00 : f32
      %36 = vector.broadcast %cst_15 : f32 to vector<8x128xf32>
      %37 = arith.addf %36, %35 : vector<8x128xf32>
      %38 = arith.divf %36, %37 : vector<8x128xf32>
      %39 = arith.mulf %30, %12 : vector<8x128xf32>
      %40 = arith.mulf %24, %32 : vector<8x128xf32>
      %41 = arith.addf %39, %40 : vector<8x128xf32>
      %42 = math.tanh %41 : vector<8x128xf32>
      %43 = arith.mulf %38, %42 : vector<8x128xf32>
      %c7_16 = arith.constant 7 : index
      %c0_17 = arith.constant 0 : index
      %c0_18 = arith.constant 0 : index
      %44 = vector.load %arg6[%c7_16, %c0_17, %c0_18] : memref<8x8x128xf32, #tpu.memory_space<vmem>>, vector<1x8x128xf32>
      %45 = vector.shape_cast %44 : vector<1x8x128xf32> to vector<8x128xf32>
      %46 = vector.shape_cast %43 : vector<8x128xf32> to vector<1x8x128xf32>
      tpu.vector_store %arg6[%c7_16, %c0_17, %c0_18], %46 {strides = array<i32>} : memref<8x8x128xf32, #tpu.memory_space<vmem>>, vector<1x8x128xf32>,
      %c0_19 = arith.constant 0 : index
      %c6 = arith.constant 6 : index
      %c0_20 = arith.constant 0 : index
      %c0_21 = arith.constant 0 : index
      %47 = vector.load %arg2[%c0_19, %c6, %c0_20, %c0_21] : memref<1x8x8x512xbf16, #tpu.memory_space<vmem>>, vector<1x1x8x512xbf16>
      %48 = vector.shape_cast %47 : vector<1x1x8x512xbf16> to vector<8x512xbf16>
      %49 = arith.extf %48 : vector<8x512xbf16> to vector<8x512xf32>
      %50 = arith.truncf %43 : vector<8x128xf32> to vector<8x128xbf16>
      %cst_22 = arith.constant dense<0.000000e+00> : vector<8x512xf32>
      %51 = tpu.matmul %50, %4, %cst_22 {dimension_numbers = #tpu.dot_dimension_numbers<[1], [0], [0], [1], [0, 0, 1, 1], [], []>} : vector<8x128xbf16>, vector<128x512xbf16>, vector<8x512xf32> -> vector<8x512xf32>
      %52 = arith.addf %49, %51 : vector<8x512xf32>
      %53 = vector.extract_strided_slice %52 {offsets = [0, 0], sizes = [8, 128], strides = [1, 1]} : vector<8x512xf32> to vector<8x128xf32>
      %54 = arith.negf %53 : vector<8x128xf32>
      %55 = math.exp %54 : vector<8x128xf32>
      %cst_23 = arith.constant 1.000000e+00 : f32
      %56 = vector.broadcast %cst_23 : f32 to vector<8x128xf32>
      %57 = arith.addf %56, %55 : vector<8x128xf32>
      %58 = arith.divf %56, %57 : vector<8x128xf32>
      %59 = vector.extract_strided_slice %52 {offsets = [0, 128], sizes = [8, 128], strides = [1, 1]} : vector<8x512xf32> to vector<8x128xf32>
      %60 = arith.negf %59 : vector<8x128xf32>
      %61 = math.exp %60 : vector<8x128xf32>
      %cst_24 = arith.constant 1.000000e+00 : f32
      %62 = vector.broadcast %cst_24 : f32 to vector<8x128xf32>
      %63 = arith.addf %62, %61 : vector<8x128xf32>
      %64 = arith.divf %62, %63 : vector<8x128xf32>
      %65 = vector.extract_strided_slice %52 {offsets = [0, 256], sizes = [8, 128], strides = [1, 1]} : vector<8x512xf32> to vector<8x128xf32>
      %66 = math.tanh %65 : vector<8x128xf32>
      %67 = vector.extract_strided_slice %52 {offsets = [0, 384], sizes = [8, 128], strides = [1, 1]} : vector<8x512xf32> to vector<8x128xf32>
      %68 = arith.negf %67 : vector<8x128xf32>
      %69 = math.exp %68 : vector<8x128xf32>
      %cst_25 = arith.constant 1.000000e+00 : f32
      %70 = vector.broadcast %cst_25 : f32 to vector<8x128xf32>
      %71 = arith.addf %70, %69 : vector<8x128xf32>
      %72 = arith.divf %70, %71 : vector<8x128xf32>
      %73 = arith.mulf %64, %41 : vector<8x128xf32>
      %74 = arith.mulf %58, %66 : vector<8x128xf32>
      %75 = arith.addf %73, %74 : vector<8x128xf32>
      %76 = math.tanh %75 : vector<8x128xf32>
      %77 = arith.mulf %72, %76 : vector<8x128xf32>
      %c6_26 = arith.constant 6 : index
      %c0_27 = arith.constant 0 : index
      %c0_28 = arith.constant 0 : index
      %78 = vector.load %arg6[%c6_26, %c0_27, %c0_28] : memref<8x8x128xf32, #tpu.memory_space<vmem>>, vector<1x8x128xf32>
      %79 = vector.shape_cast %78 : vector<1x8x128xf32> to vector<8x128xf32>
      %80 = vector.shape_cast %77 : vector<8x128xf32> to vector<1x8x128xf32>
      tpu.vector_store %arg6[%c6_26, %c0_27, %c0_28], %80 {strides = array<i32>} : memref<8x8x128xf32, #tpu.memory_space<vmem>>, vector<1x8x128xf32>,
      %c0_29 = arith.constant 0 : index
      %c5 = arith.constant 5 : index
      %c0_30 = arith.constant 0 : index
      %c0_31 = arith.constant 0 : index
      %81 = vector.load %arg2[%c0_29, %c5, %c0_30, %c0_31] : memref<1x8x8x512xbf16, #tpu.memory_space<vmem>>, vector<1x1x8x512xbf16>
      %82 = vector.shape_cast %81 : vector<1x1x8x512xbf16> to vector<8x512xbf16>
      %83 = arith.extf %82 : vector<8x512xbf16> to vector<8x512xf32>
      %84 = arith.truncf %77 : vector<8x128xf32> to vector<8x128xbf16>
      %cst_32 = arith.constant dense<0.000000e+00> : vector<8x512xf32>
      %85 = tpu.matmul %84, %4, %cst_32 {dimension_numbers = #tpu.dot_dimension_numbers<[1], [0], [0], [1], [0, 0, 1, 1], [], []>} : vector<8x128xbf16>, vector<128x512xbf16>, vector<8x512xf32> -> vector<8x512xf32>
      %86 = arith.addf %83, %85 : vector<8x512xf32>
      %87 = vector.extract_strided_slice %86 {offsets = [0, 0], sizes = [8, 128], strides = [1, 1]} : vector<8x512xf32> to vector<8x128xf32>
      %88 = arith.negf %87 : vector<8x128xf32>
      %89 = math.exp %88 : vector<8x128xf32>
      %cst_33 = arith.constant 1.000000e+00 : f32
      %90 = vector.broadcast %cst_33 : f32 to vector<8x128xf32>
      %91 = arith.addf %90, %89 : vector<8x128xf32>
      %92 = arith.divf %90, %91 : vector<8x128xf32>
      %93 = vector.extract_strided_slice %86 {offsets = [0, 128], sizes = [8, 128], strides = [1, 1]} : vector<8x512xf32> to vector<8x128xf32>
      %94 = arith.negf %93 : vector<8x128xf32>
      %95 = math.exp %94 : vector<8x128xf32>
      %cst_34 = arith.constant 1.000000e+00 : f32
      %96 = vector.broadcast %cst_34 : f32 to vector<8x128xf32>
      %97 = arith.addf %96, %95 : vector<8x128xf32>
      %98 = arith.divf %96, %97 : vector<8x128xf32>
      %99 = vector.extract_strided_slice %86 {offsets = [0, 256], sizes = [8, 128], strides = [1, 1]} : vector<8x512xf32> to vector<8x128xf32>
      %100 = math.tanh %99 : vector<8x128xf32>
      %101 = vector.extract_strided_slice %86 {offsets = [0, 384], sizes = [8, 128], strides = [1, 1]} : vector<8x512xf32> to vector<8x128xf32>
      %102 = arith.negf %101 : vector<8x128xf32>
      %103 = math.exp %102 : vector<8x128xf32>
      %cst_35 = arith.constant 1.000000e+00 : f32
      %104 = vector.broadcast %cst_35 : f32 to vector<8x128xf32>
      %105 = arith.addf %104, %103 : vector<8x128xf32>
      %106 = arith.divf %104, %105 : vector<8x128xf32>
      %107 = arith.mulf %98, %75 : vector<8x128xf32>
      %108 = arith.mulf %92, %100 : vector<8x128xf32>
      %109 = arith.addf %107, %108 : vector<8x128xf32>
      %110 = math.tanh %109 : vector<8x128xf32>
      %111 = arith.mulf %106, %110 : vector<8x128xf32>
      %c5_36 = arith.constant 5 : index
      %c0_37 = arith.constant 0 : index
      %c0_38 = arith.constant 0 : index
      %112 = vector.load %arg6[%c5_36, %c0_37, %c0_38] : memref<8x8x128xf32, #tpu.memory_space<vmem>>, vector<1x8x128xf32>
      %113 = vector.shape_cast %112 : vector<1x8x128xf32> to vector<8x128xf32>
      %114 = vector.shape_cast %111 : vector<8x128xf32> to vector<1x8x128xf32>
      tpu.vector_store %arg6[%c5_36, %c0_37, %c0_38], %114 {strides = array<i32>} : memref<8x8x128xf32, #tpu.memory_space<vmem>>, vector<1x8x128xf32>,
      %c0_39 = arith.constant 0 : index
      %c4 = arith.constant 4 : index
      %c0_40 = arith.constant 0 : index
      %c0_41 = arith.constant 0 : index
      %115 = vector.load %arg2[%c0_39, %c4, %c0_40, %c0_41] : memref<1x8x8x512xbf16, #tpu.memory_space<vmem>>, vector<1x1x8x512xbf16>
      %116 = vector.shape_cast %115 : vector<1x1x8x512xbf16> to vector<8x512xbf16>
      %117 = arith.extf %116 : vector<8x512xbf16> to vector<8x512xf32>
      %118 = arith.truncf %111 : vector<8x128xf32> to vector<8x128xbf16>
      %cst_42 = arith.constant dense<0.000000e+00> : vector<8x512xf32>
      %119 = tpu.matmul %118, %4, %cst_42 {dimension_numbers = #tpu.dot_dimension_numbers<[1], [0], [0], [1], [0, 0, 1, 1], [], []>} : vector<8x128xbf16>, vector<128x512xbf16>, vector<8x512xf32> -> vector<8x512xf32>
      %120 = arith.addf %117, %119 : vector<8x512xf32>
      %121 = vector.extract_strided_slice %120 {offsets = [0, 0], sizes = [8, 128], strides = [1, 1]} : vector<8x512xf32> to vector<8x128xf32>
      %122 = arith.negf %121 : vector<8x128xf32>
      %123 = math.exp %122 : vector<8x128xf32>
      %cst_43 = arith.constant 1.000000e+00 : f32
      %124 = vector.broadcast %cst_43 : f32 to vector<8x128xf32>
      %125 = arith.addf %124, %123 : vector<8x128xf32>
      %126 = arith.divf %124, %125 : vector<8x128xf32>
      %127 = vector.extract_strided_slice %120 {offsets = [0, 128], sizes = [8, 128], strides = [1, 1]} : vector<8x512xf32> to vector<8x128xf32>
      %128 = arith.negf %127 : vector<8x128xf32>
      %129 = math.exp %128 : vector<8x128xf32>
      %cst_44 = arith.constant 1.000000e+00 : f32
      %130 = vector.broadcast %cst_44 : f32 to vector<8x128xf32>
      %131 = arith.addf %130, %129 : vector<8x128xf32>
      %132 = arith.divf %130, %131 : vector<8x128xf32>
      %133 = vector.extract_strided_slice %120 {offsets = [0, 256], sizes = [8, 128], strides = [1, 1]} : vector<8x512xf32> to vector<8x128xf32>
      %134 = math.tanh %133 : vector<8x128xf32>
      %135 = vector.extract_strided_slice %120 {offsets = [0, 384], sizes = [8, 128], strides = [1, 1]} : vector<8x512xf32> to vector<8x128xf32>
      %136 = arith.negf %135 : vector<8x128xf32>
      %137 = math.exp %136 : vector<8x128xf32>
      %cst_45 = arith.constant 1.000000e+00 : f32
      %138 = vector.broadcast %cst_45 : f32 to vector<8x128xf32>
      %139 = arith.addf %138, %137 : vector<8x128xf32>
      %140 = arith.divf %138, %139 : vector<8x128xf32>
      %141 = arith.mulf %132, %109 : vector<8x128xf32>
      %142 = arith.mulf %126, %134 : vector<8x128xf32>
      %143 = arith.addf %141, %142 : vector<8x128xf32>
      %144 = math.tanh %143 : vector<8x128xf32>
      %145 = arith.mulf %140, %144 : vector<8x128xf32>
      %c4_46 = arith.constant 4 : index
      %c0_47 = arith.constant 0 : index
      %c0_48 = arith.constant 0 : index
      %146 = vector.load %arg6[%c4_46, %c0_47, %c0_48] : memref<8x8x128xf32, #tpu.memory_space<vmem>>, vector<1x8x128xf32>
      %147 = vector.shape_cast %146 : vector<1x8x128xf32> to vector<8x128xf32>
      %148 = vector.shape_cast %145 : vector<8x128xf32> to vector<1x8x128xf32>
      tpu.vector_store %arg6[%c4_46, %c0_47, %c0_48], %148 {strides = array<i32>} : memref<8x8x128xf32, #tpu.memory_space<vmem>>, vector<1x8x128xf32>,
      %c0_49 = arith.constant 0 : index
      %c3 = arith.constant 3 : index
      %c0_50 = arith.constant 0 : index
      %c0_51 = arith.constant 0 : index
      %149 = vector.load %arg2[%c0_49, %c3, %c0_50, %c0_51] : memref<1x8x8x512xbf16, #tpu.memory_space<vmem>>, vector<1x1x8x512xbf16>
      %150 = vector.shape_cast %149 : vector<1x1x8x512xbf16> to vector<8x512xbf16>
      %151 = arith.extf %150 : vector<8x512xbf16> to vector<8x512xf32>
      %152 = arith.truncf %145 : vector<8x128xf32> to vector<8x128xbf16>
      %cst_52 = arith.constant dense<0.000000e+00> : vector<8x512xf32>
      %153 = tpu.matmul %152, %4, %cst_52 {dimension_numbers = #tpu.dot_dimension_numbers<[1], [0], [0], [1], [0, 0, 1, 1], [], []>} : vector<8x128xbf16>, vector<128x512xbf16>, vector<8x512xf32> -> vector<8x512xf32>
      %154 = arith.addf %151, %153 : vector<8x512xf32>
      %155 = vector.extract_strided_slice %154 {offsets = [0, 0], sizes = [8, 128], strides = [1, 1]} : vector<8x512xf32> to vector<8x128xf32>
      %156 = arith.negf %155 : vector<8x128xf32>
      %157 = math.exp %156 : vector<8x128xf32>
      %cst_53 = arith.constant 1.000000e+00 : f32
      %158 = vector.broadcast %cst_53 : f32 to vector<8x128xf32>
      %159 = arith.addf %158, %157 : vector<8x128xf32>
      %160 = arith.divf %158, %159 : vector<8x128xf32>
      %161 = vector.extract_strided_slice %154 {offsets = [0, 128], sizes = [8, 128], strides = [1, 1]} : vector<8x512xf32> to vector<8x128xf32>
      %162 = arith.negf %161 : vector<8x128xf32>
      %163 = math.exp %162 : vector<8x128xf32>
      %cst_54 = arith.constant 1.000000e+00 : f32
      %164 = vector.broadcast %cst_54 : f32 to vector<8x128xf32>
      %165 = arith.addf %164, %163 : vector<8x128xf32>
      %166 = arith.divf %164, %165 : vector<8x128xf32>
      %167 = vector.extract_strided_slice %154 {offsets = [0, 256], sizes = [8, 128], strides = [1, 1]} : vector<8x512xf32> to vector<8x128xf32>
      %168 = math.tanh %167 : vector<8x128xf32>
      %169 = vector.extract_strided_slice %154 {offsets = [0, 384], sizes = [8, 128], strides = [1, 1]} : vector<8x512xf32> to vector<8x128xf32>
      %170 = arith.negf %169 : vector<8x128xf32>
      %171 = math.exp %170 : vector<8x128xf32>
      %cst_55 = arith.constant 1.000000e+00 : f32
      %172 = vector.broadcast %cst_55 : f32 to vector<8x128xf32>
      %173 = arith.addf %172, %171 : vector<8x128xf32>
      %174 = arith.divf %172, %173 : vector<8x128xf32>
      %175 = arith.mulf %166, %143 : vector<8x128xf32>
      %176 = arith.mulf %160, %168 : vector<8x128xf32>
      %177 = arith.addf %175, %176 : vector<8x128xf32>
      %178 = math.tanh %177 : vector<8x128xf32>
      %179 = arith.mulf %174, %178 : vector<8x128xf32>
      %c3_56 = arith.constant 3 : index
      %c0_57 = arith.constant 0 : index
      %c0_58 = arith.constant 0 : index
      %180 = vector.load %arg6[%c3_56, %c0_57, %c0_58] : memref<8x8x128xf32, #tpu.memory_space<vmem>>, vector<1x8x128xf32>
      %181 = vector.shape_cast %180 : vector<1x8x128xf32> to vector<8x128xf32>
      %182 = vector.shape_cast %179 : vector<8x128xf32> to vector<1x8x128xf32>
      tpu.vector_store %arg6[%c3_56, %c0_57, %c0_58], %182 {strides = array<i32>} : memref<8x8x128xf32, #tpu.memory_space<vmem>>, vector<1x8x128xf32>,
      %c0_59 = arith.constant 0 : index
      %c2 = arith.constant 2 : index
      %c0_60 = arith.constant 0 : index
      %c0_61 = arith.constant 0 : index
      %183 = vector.load %arg2[%c0_59, %c2, %c0_60, %c0_61] : memref<1x8x8x512xbf16, #tpu.memory_space<vmem>>, vector<1x1x8x512xbf16>
      %184 = vector.shape_cast %183 : vector<1x1x8x512xbf16> to vector<8x512xbf16>
      %185 = arith.extf %184 : vector<8x512xbf16> to vector<8x512xf32>
      %186 = arith.truncf %179 : vector<8x128xf32> to vector<8x128xbf16>
      %cst_62 = arith.constant dense<0.000000e+00> : vector<8x512xf32>
      %187 = tpu.matmul %186, %4, %cst_62 {dimension_numbers = #tpu.dot_dimension_numbers<[1], [0], [0], [1], [0, 0, 1, 1], [], []>} : vector<8x128xbf16>, vector<128x512xbf16>, vector<8x512xf32> -> vector<8x512xf32>
      %188 = arith.addf %185, %187 : vector<8x512xf32>
      %189 = vector.extract_strided_slice %188 {offsets = [0, 0], sizes = [8, 128], strides = [1, 1]} : vector<8x512xf32> to vector<8x128xf32>
      %190 = arith.negf %189 : vector<8x128xf32>
      %191 = math.exp %190 : vector<8x128xf32>
      %cst_63 = arith.constant 1.000000e+00 : f32
      %192 = vector.broadcast %cst_63 : f32 to vector<8x128xf32>
      %193 = arith.addf %192, %191 : vector<8x128xf32>
      %194 = arith.divf %192, %193 : vector<8x128xf32>
      %195 = vector.extract_strided_slice %188 {offsets = [0, 128], sizes = [8, 128], strides = [1, 1]} : vector<8x512xf32> to vector<8x128xf32>
      %196 = arith.negf %195 : vector<8x128xf32>
      %197 = math.exp %196 : vector<8x128xf32>
      %cst_64 = arith.constant 1.000000e+00 : f32
      %198 = vector.broadcast %cst_64 : f32 to vector<8x128xf32>
      %199 = arith.addf %198, %197 : vector<8x128xf32>
      %200 = arith.divf %198, %199 : vector<8x128xf32>
      %201 = vector.extract_strided_slice %188 {offsets = [0, 256], sizes = [8, 128], strides = [1, 1]} : vector<8x512xf32> to vector<8x128xf32>
      %202 = math.tanh %201 : vector<8x128xf32>
      %203 = vector.extract_strided_slice %188 {offsets = [0, 384], sizes = [8, 128], strides = [1, 1]} : vector<8x512xf32> to vector<8x128xf32>
      %204 = arith.negf %203 : vector<8x128xf32>
      %205 = math.exp %204 : vector<8x128xf32>
      %cst_65 = arith.constant 1.000000e+00 : f32
      %206 = vector.broadcast %cst_65 : f32 to vector<8x128xf32>
      %207 = arith.addf %206, %205 : vector<8x128xf32>
      %208 = arith.divf %206, %207 : vector<8x128xf32>
      %209 = arith.mulf %200, %177 : vector<8x128xf32>
      %210 = arith.mulf %194, %202 : vector<8x128xf32>
      %211 = arith.addf %209, %210 : vector<8x128xf32>
      %212 = math.tanh %211 : vector<8x128xf32>
      %213 = arith.mulf %208, %212 : vector<8x128xf32>
      %c2_66 = arith.constant 2 : index
      %c0_67 = arith.constant 0 : index
      %c0_68 = arith.constant 0 : index
      %214 = vector.load %arg6[%c2_66, %c0_67, %c0_68] : memref<8x8x128xf32, #tpu.memory_space<vmem>>, vector<1x8x128xf32>
      %215 = vector.shape_cast %214 : vector<1x8x128xf32> to vector<8x128xf32>
      %216 = vector.shape_cast %213 : vector<8x128xf32> to vector<1x8x128xf32>
      tpu.vector_store %arg6[%c2_66, %c0_67, %c0_68], %216 {strides = array<i32>} : memref<8x8x128xf32, #tpu.memory_space<vmem>>, vector<1x8x128xf32>,
      %c0_69 = arith.constant 0 : index
      %c1 = arith.constant 1 : index
      %c0_70 = arith.constant 0 : index
      %c0_71 = arith.constant 0 : index
      %217 = vector.load %arg2[%c0_69, %c1, %c0_70, %c0_71] : memref<1x8x8x512xbf16, #tpu.memory_space<vmem>>, vector<1x1x8x512xbf16>
      %218 = vector.shape_cast %217 : vector<1x1x8x512xbf16> to vector<8x512xbf16>
      %219 = arith.extf %218 : vector<8x512xbf16> to vector<8x512xf32>
      %220 = arith.truncf %213 : vector<8x128xf32> to vector<8x128xbf16>
      %cst_72 = arith.constant dense<0.000000e+00> : vector<8x512xf32>
      %221 = tpu.matmul %220, %4, %cst_72 {dimension_numbers = #tpu.dot_dimension_numbers<[1], [0], [0], [1], [0, 0, 1, 1], [], []>} : vector<8x128xbf16>, vector<128x512xbf16>, vector<8x512xf32> -> vector<8x512xf32>
      %222 = arith.addf %219, %221 : vector<8x512xf32>
      %223 = vector.extract_strided_slice %222 {offsets = [0, 0], sizes = [8, 128], strides = [1, 1]} : vector<8x512xf32> to vector<8x128xf32>
      %224 = arith.negf %223 : vector<8x128xf32>
      %225 = math.exp %224 : vector<8x128xf32>
      %cst_73 = arith.constant 1.000000e+00 : f32
      %226 = vector.broadcast %cst_73 : f32 to vector<8x128xf32>
      %227 = arith.addf %226, %225 : vector<8x128xf32>
      %228 = arith.divf %226, %227 : vector<8x128xf32>
      %229 = vector.extract_strided_slice %222 {offsets = [0, 128], sizes = [8, 128], strides = [1, 1]} : vector<8x512xf32> to vector<8x128xf32>
      %230 = arith.negf %229 : vector<8x128xf32>
      %231 = math.exp %230 : vector<8x128xf32>
      %cst_74 = arith.constant 1.000000e+00 : f32
      %232 = vector.broadcast %cst_74 : f32 to vector<8x128xf32>
      %233 = arith.addf %232, %231 : vector<8x128xf32>
      %234 = arith.divf %232, %233 : vector<8x128xf32>
      %235 = vector.extract_strided_slice %222 {offsets = [0, 256], sizes = [8, 128], strides = [1, 1]} : vector<8x512xf32> to vector<8x128xf32>
      %236 = math.tanh %235 : vector<8x128xf32>
      %237 = vector.extract_strided_slice %222 {offsets = [0, 384], sizes = [8, 128], strides = [1, 1]} : vector<8x512xf32> to vector<8x128xf32>
      %238 = arith.negf %237 : vector<8x128xf32>
      %239 = math.exp %238 : vector<8x128xf32>
      %cst_75 = arith.constant 1.000000e+00 : f32
      %240 = vector.broadcast %cst_75 : f32 to vector<8x128xf32>
      %241 = arith.addf %240, %239 : vector<8x128xf32>
      %242 = arith.divf %240, %241 : vector<8x128xf32>
      %243 = arith.mulf %234, %211 : vector<8x128xf32>
      %244 = arith.mulf %228, %236 : vector<8x128xf32>
      %245 = arith.addf %243, %244 : vector<8x128xf32>
      %246 = math.tanh %245 : vector<8x128xf32>
      %247 = arith.mulf %242, %246 : vector<8x128xf32>
      %c1_76 = arith.constant 1 : index
      %c0_77 = arith.constant 0 : index
      %c0_78 = arith.constant 0 : index
      %248 = vector.load %arg6[%c1_76, %c0_77, %c0_78] : memref<8x8x128xf32, #tpu.memory_space<vmem>>, vector<1x8x128xf32>
      %249 = vector.shape_cast %248 : vector<1x8x128xf32> to vector<8x128xf32>
      %250 = vector.shape_cast %247 : vector<8x128xf32> to vector<1x8x128xf32>
      tpu.vector_store %arg6[%c1_76, %c0_77, %c0_78], %250 {strides = array<i32>} : memref<8x8x128xf32, #tpu.memory_space<vmem>>, vector<1x8x128xf32>,
      %c0_79 = arith.constant 0 : index
      %c0_80 = arith.constant 0 : index
      %c0_81 = arith.constant 0 : index
      %c0_82 = arith.constant 0 : index
      %251 = vector.load %arg2[%c0_79, %c0_80, %c0_81, %c0_82] : memref<1x8x8x512xbf16, #tpu.memory_space<vmem>>, vector<1x1x8x512xbf16>
      %252 = vector.shape_cast %251 : vector<1x1x8x512xbf16> to vector<8x512xbf16>
      %253 = arith.extf %252 : vector<8x512xbf16> to vector<8x512xf32>
      %254 = arith.truncf %247 : vector<8x128xf32> to vector<8x128xbf16>
      %cst_83 = arith.constant dense<0.000000e+00> : vector<8x512xf32>
      %255 = tpu.matmul %254, %4, %cst_83 {dimension_numbers = #tpu.dot_dimension_numbers<[1], [0], [0], [1], [0, 0, 1, 1], [], []>} : vector<8x128xbf16>, vector<128x512xbf16>, vector<8x512xf32> -> vector<8x512xf32>
      %256 = arith.addf %253, %255 : vector<8x512xf32>
      %257 = vector.extract_strided_slice %256 {offsets = [0, 0], sizes = [8, 128], strides = [1, 1]} : vector<8x512xf32> to vector<8x128xf32>
      %258 = arith.negf %257 : vector<8x128xf32>
      %259 = math.exp %258 : vector<8x128xf32>
      %cst_84 = arith.constant 1.000000e+00 : f32
      %260 = vector.broadcast %cst_84 : f32 to vector<8x128xf32>
      %261 = arith.addf %260, %259 : vector<8x128xf32>
      %262 = arith.divf %260, %261 : vector<8x128xf32>
      %263 = vector.extract_strided_slice %256 {offsets = [0, 128], sizes = [8, 128], strides = [1, 1]} : vector<8x512xf32> to vector<8x128xf32>
      %264 = arith.negf %263 : vector<8x128xf32>
      %265 = math.exp %264 : vector<8x128xf32>
      %cst_85 = arith.constant 1.000000e+00 : f32
      %266 = vector.broadcast %cst_85 : f32 to vector<8x128xf32>
      %267 = arith.addf %266, %265 : vector<8x128xf32>
      %268 = arith.divf %266, %267 : vector<8x128xf32>
      %269 = vector.extract_strided_slice %256 {offsets = [0, 256], sizes = [8, 128], strides = [1, 1]} : vector<8x512xf32> to vector<8x128xf32>
      %270 = math.tanh %269 : vector<8x128xf32>
      %271 = vector.extract_strided_slice %256 {offsets = [0, 384], sizes = [8, 128], strides = [1, 1]} : vector<8x512xf32> to vector<8x128xf32>
      %272 = arith.negf %271 : vector<8x128xf32>
      %273 = math.exp %272 : vector<8x128xf32>
      %cst_86 = arith.constant 1.000000e+00 : f32
      %274 = vector.broadcast %cst_86 : f32 to vector<8x128xf32>
      %275 = arith.addf %274, %273 : vector<8x128xf32>
      %276 = arith.divf %274, %275 : vector<8x128xf32>
      %277 = arith.mulf %268, %245 : vector<8x128xf32>
      %278 = arith.mulf %262, %270 : vector<8x128xf32>
      %279 = arith.addf %277, %278 : vector<8x128xf32>
      %280 = math.tanh %279 : vector<8x128xf32>
      %281 = arith.mulf %276, %280 : vector<8x128xf32>
      %c0_87 = arith.constant 0 : index
      %c0_88 = arith.constant 0 : index
      %c0_89 = arith.constant 0 : index
      %282 = vector.load %arg6[%c0_87, %c0_88, %c0_89] : memref<8x8x128xf32, #tpu.memory_space<vmem>>, vector<1x8x128xf32>
      %283 = vector.shape_cast %282 : vector<1x8x128xf32> to vector<8x128xf32>
      %284 = vector.shape_cast %281 : vector<8x128xf32> to vector<1x8x128xf32>
      tpu.vector_store %arg6[%c0_87, %c0_88, %c0_89], %284 {strides = array<i32>} : memref<8x8x128xf32, #tpu.memory_space<vmem>>, vector<1x8x128xf32>,
      %c0_90 = arith.constant 0 : index
      %c0_91 = arith.constant 0 : index
      %285 = vector.load %arg7[%c0_90, %c0_91] : memref<8x128xf32, #tpu.memory_space<vmem>>, vector<8x128xf32>
      tpu.vector_store %arg7[%c0_90, %c0_91], %281 {strides = array<i32>} : memref<8x128xf32, #tpu.memory_space<vmem>>, vector<8x128xf32>,
      %c0_92 = arith.constant 0 : index
      %c0_93 = arith.constant 0 : index
      %286 = vector.load %arg8[%c0_92, %c0_93] : memref<8x128xf32, #tpu.memory_space<vmem>>, vector<8x128xf32>
      tpu.vector_store %arg8[%c0_92, %c0_93], %279 {strides = array<i32>} : memref<8x128xf32, #tpu.memory_space<vmem>>, vector<8x128xf32>,
    } else {
    }
    return
  }
  func.func @transform_0(%arg0: i32, %arg1: i32) -> (i32, i32, i32, i32) {
    %c2_i32 = arith.constant 2 : i32
    %0 = arith.muli %c2_i32, %arg1 : i32
    %c0_i32 = arith.constant 0 : i32
    %1 = arith.subi %c0_i32, %0 : i32
    %2 = arith.muli %arg0, %1 : i32
    %3 = arith.addi %arg1, %2 : i32
    %c0_i32_0 = arith.constant 0 : i32
    %c0_i32_1 = arith.constant 0 : i32
    %c0_i32_2 = arith.constant 0 : i32
    return %arg0, %3, %c0_i32_0, %c0_i32_1 : i32, i32, i32, i32
  }
  func.func @transform_1(%arg0: i32, %arg1: i32) -> (i32, i32, i32) {
    %c0_i32 = arith.constant 0 : i32
    %c0_i32_0 = arith.constant 0 : i32
    %c0_i32_1 = arith.constant 0 : i32
    return %arg0, %c0_i32, %c0_i32_0 : i32, i32, i32
  }
  func.func @transform_2(%arg0: i32, %arg1: i32) -> (i32, i32, i32) {
    %c0_i32 = arith.constant 0 : i32
    %c0_i32_0 = arith.constant 0 : i32
    %c0_i32_1 = arith.constant 0 : i32
    return %arg0, %c0_i32, %c0_i32_0 : i32, i32, i32
  }
  func.func @transform_3(%arg0: i32, %arg1: i32) -> (i32, i32, i32) {
    %c0_i32 = arith.constant 0 : i32
    %c0_i32_0 = arith.constant 0 : i32
    %c0_i32_1 = arith.constant 0 : i32
    return %arg0, %c0_i32, %c0_i32_0 : i32, i32, i32
  }
  func.func @transform_4(%arg0: i32, %arg1: i32) -> (i32, i32, i32) {
    %c2_i32 = arith.constant 2 : i32
    %0 = arith.muli %c2_i32, %arg1 : i32
    %c0_i32 = arith.constant 0 : i32
    %1 = arith.subi %c0_i32, %0 : i32
    %2 = arith.muli %arg0, %1 : i32
    %3 = arith.addi %arg1, %2 : i32
    %c0_i32_0 = arith.constant 0 : i32
    %c0_i32_1 = arith.constant 0 : i32
    return %3, %c0_i32_0, %arg0 : i32, i32, i32
  }
}

module attributes {stable_mosaic.version = 11 : i64} {
  func.func @_proj_kernel(%arg0: i32, %arg1: i32, %arg2: i32, %arg3: memref<64x256xf32, #tpu.memory_space<vmem>>, %arg4: memref<1x256x512xbf16, #tpu.memory_space<vmem>>, %arg5: memref<1x1x512xf32, #tpu.memory_space<vmem>>, %arg6: memref<1x64x512xbf16, #tpu.memory_space<vmem>>) attributes {dimension_semantics = [#tpu.dimension_semantics<parallel>, #tpu.dimension_semantics<parallel>, #tpu.dimension_semantics<parallel>], iteration_bounds = array<i64: 2, 1, 1>, scalar_prefetch = 0 : i64, scratch_operands = 0 : i64, tpu.core_type = #tpu.core_type<tc>, window_params = [{transform_indices = @transform_0, window_bounds = array<i64: 64, 256>}, {transform_indices = @transform_1, window_bounds = array<i64: 1, 256, 512>}, {transform_indices = @transform_2, window_bounds = array<i64: 1, 1, 512>}, {transform_indices = @transform_3, window_bounds = array<i64: 1, 64, 512>}]} {
    %c0 = arith.constant 0 : index
    %c0_0 = arith.constant 0 : index
    %0 = vector.load %arg3[%c0, %c0_0] : memref<64x256xf32, #tpu.memory_space<vmem>>, vector<64x256xf32>
    %1 = arith.truncf %0 : vector<64x256xf32> to vector<64x256xbf16>
    %c0_1 = arith.constant 0 : index
    %c0_2 = arith.constant 0 : index
    %c0_3 = arith.constant 0 : index
    %2 = vector.load %arg4[%c0_1, %c0_2, %c0_3] : memref<1x256x512xbf16, #tpu.memory_space<vmem>>, vector<1x256x512xbf16>
    %3 = vector.shape_cast %2 : vector<1x256x512xbf16> to vector<256x512xbf16>
    %cst = arith.constant dense<0.000000e+00> : vector<64x512xf32>
    %4 = tpu.matmul %1, %3, %cst {dimension_numbers = #tpu.dot_dimension_numbers<[1], [0], [0], [1], [0, 0, 1, 1], [], []>} : vector<64x256xbf16>, vector<256x512xbf16>, vector<64x512xf32> -> vector<64x512xf32>
    %c0_4 = arith.constant 0 : index
    %c0_5 = arith.constant 0 : index
    %c0_6 = arith.constant 0 : index
    %5 = vector.load %arg5[%c0_4, %c0_5, %c0_6] : memref<1x1x512xf32, #tpu.memory_space<vmem>>, vector<1x1x512xf32>
    %6 = vector.shape_cast %5 : vector<1x1x512xf32> to vector<1x512xf32>
    %7 = vector.broadcast %6 : vector<1x512xf32> to vector<64x512xf32>
    %8 = arith.addf %4, %7 : vector<64x512xf32>
    %9 = arith.truncf %8 : vector<64x512xf32> to vector<64x512xbf16>
    %c0_7 = arith.constant 0 : index
    %c0_8 = arith.constant 0 : index
    %c0_9 = arith.constant 0 : index
    %10 = vector.load %arg6[%c0_7, %c0_8, %c0_9] : memref<1x64x512xbf16, #tpu.memory_space<vmem>>, vector<1x64x512xbf16>
    %11 = vector.shape_cast %10 : vector<1x64x512xbf16> to vector<64x512xbf16>
    %12 = vector.shape_cast %9 : vector<64x512xbf16> to vector<1x64x512xbf16>
    tpu.vector_store %arg6[%c0_7, %c0_8, %c0_9], %12 {strides = array<i32>} : memref<1x64x512xbf16, #tpu.memory_space<vmem>>, vector<1x64x512xbf16>,
    return
  }
  func.func @transform_0(%arg0: i32, %arg1: i32, %arg2: i32) -> (i32, i32) {
    %c0_i32 = arith.constant 0 : i32
    %c0_i32_0 = arith.constant 0 : i32
    return %arg2, %c0_i32 : i32, i32
  }
  func.func @transform_1(%arg0: i32, %arg1: i32, %arg2: i32) -> (i32, i32, i32) {
    %c0_i32 = arith.constant 0 : i32
    %c0_i32_0 = arith.constant 0 : i32
    return %arg0, %c0_i32, %arg1 : i32, i32, i32
  }
  func.func @transform_2(%arg0: i32, %arg1: i32, %arg2: i32) -> (i32, i32, i32) {
    %c0_i32 = arith.constant 0 : i32
    %c0_i32_0 = arith.constant 0 : i32
    return %arg0, %c0_i32, %arg1 : i32, i32, i32
  }
  func.func @transform_3(%arg0: i32, %arg1: i32, %arg2: i32) -> (i32, i32, i32) {
    %c0_i32 = arith.constant 0 : i32
    return %arg0, %arg2, %arg1 : i32, i32, i32
  }
}

</mosaic_0001>

<bundles_post_ra>
// kernel: lstm_forward.4
= control target key start
LH: loop header
LB: loop body
LE: loop exit
PB: predicated region body
PF: predicated region fallthrough
CT: control target
= control target key end

     0   :  { %s889_s12 = smov 0   ;;  %s891_s13 = smov 0   ;;  %s1020_s0 = inlined_call_operand.vmem [shape: f32[64,16], index: 0, kind: input, shape index: {}]   ;;  %s1021_s1 = inlined_call_operand.vmem [shape: bf16[2,16,512], index: 1, kind: input, shape index: {}]   ;;  %s1022_s2 = inlined_call_operand.vmem [shape: f32[2,1,512], index: 2, kind: input, shape index: {}]   ;;  %s1023_s3 = inlined_call_operand.vmem [shape: bf16[2,64,512], index: 3, kind: output, shape index: {}]  }
   0x1   :  { %s893_s14 = smov 0  }
   0x2 LB: > { %s32_s15 = sadd.s32 1, %s862_s13  ;;  %p759_p0 = scmp.ge.s32.totalorder %s866_s14, 1  ;;  %s866_s14 = sphi %s893_s14, %s13_s14   ;;  %s862_s13 = sphi %s891_s13, %s1025_s13   ;;  %s858_s12 = sphi %s889_s12, %s1024_s12  }
   0x3   : > { %p34_p1 = scmp.ge.s32.totalorder %s32_s15, 2  ;;  %p194_p2 = scmp.lt.s32.totalorder %s866_s14, 3 }
   0x5   : > { %s1027_s15 = smov (%p34_p1, %s32_s15), 0  ;;  %p195_p3 = pnand %p759_p0, %p194_p2 }
   0x6   : > { %p251_p4 = scmp.lt.s32.totalorder (!%p195_p3), %s858_s12, 1  ;;  %v868_v0 = vmov (!%p195_p3), 0   ;;  %v286_v1 = vld [vmem:[%s1020_s0] sm:$0xff] (!%p195_p3)  ;;  %v287_v2 = vld [vmem:[%s1020_s0 + $0x8] sm:$0xff] (!%p195_p3)  ;;  %vm344_vm0 = vcmask (!%p195_p3), 130048   ;;  %v288_v8 = vld [vmem:[%s1020_s0 + $0x10] sm:$0xff] (!%p195_p3)  ;;  %v304_v17 = vlaneseq (!%p195_p3) }
   0x7   : > { %198 = sbr.rel (%p195_p3) target bundleno = 266 (0x10a), region = 32  ;;  %389 = vmatprep.mubr.bf16.mxu0 (!%p195_p3), %v868_v0  ;;  %462 = vmatprep.mubr.bf16.mxu1 (!%p195_p3), %v868_v0  ;;  %v294_v7 = vpack.c.bf16 (!%p195_p3), %v287_v2, %v286_v1  ;;  %v289_v9 = vld [vmem:[%s1020_s0 + $0x18] sm:$0xff] (!%p195_p3)  ;;  %v290_v11 = vld [vmem:[%s1020_s0 + $0x20] sm:$0xff] (!%p195_p3)  ;;  %v291_v12 = vld [vmem:[%s1020_s0 + $0x28] sm:$0xff] (!%p195_p3) }
   0x8   : > { %v295_v10 = vpack.c.bf16 (!%p195_p3), %v289_v9, %v288_v8  ;;  %v296_v13 = vpack.c.bf16 (!%p195_p3), %v291_v12, %v290_v11  ;;  %v292_v14 = vld [vmem:[%s1020_s0 + $0x30] sm:$0xff] (!%p195_p3)  ;;  %v293_v15 = vld [vmem:[%s1020_s0 + $0x38] sm:$0xff] (!%p195_p3)  ;;  %v305_v18 = vshrl.u32 (!%p195_p3), %v304_v17, 7 }
   0x9   : > { %v297_v16 = vpack.c.bf16 (!%p195_p3), %v293_v15, %v292_v14 }
   0xa   : > { %v306_v19 = vsub.s32 (!%p195_p3), 0, %v305_v18  ;;  %v314_v20 = vsub.s32 (!%p195_p3), 2, %v305_v18  ;;  %v310_v22 = vsub.s32 (!%p195_p3), 1, %v305_v18  ;;  %v318_v23 = vsub.s32 (!%p195_p3), 3, %v305_v18 }
   0xe   : > { %s1029_s12 = smov (!%p251_p4, %s858_s12), 1 }
   0xf   : > { %s795_s16 = sshll.u32 %s1029_s12, 5  ;;  %s762_s9 = sshll.u32 %s1029_s12, 2 }
  0x10   : > { %s258_s19 = scalar_lea.vmem %s1021_s1, %s795_s16  ;;  %s267_s16 = scalar_lea.vmem %s1022_s2, %s762_s9 }
  0x11   : > { %v838_v3 = vld [vmem:[%s258_s19 + $0x4] ss:$16 sps:$4 sm:$0xff]   ;;  %v840_v4 = vld [vmem:[%s258_s19 + $0xc] ss:$16 sps:$4 sm:$0xff]   ;;  %v842_v5 = vld [vmem:[%s258_s19] ss:$16 sps:$4 sm:$0xff]  }
  0x12   : > { %357 = vmatprep.subr.bf16.mxu0 %v838_v3  ;;  %v843_v6 = vld [vmem:[%s258_s19 + $0x8] ss:$16 sps:$4 sm:$0xff]   ;;  %430 = vmatprep.subr.bf16.mxu1 %v840_v4  ;;  %v302_v21 = vld [vmem:[%s267_s16] sm:$0xf]  ;;  %s796_s17 = sshll.u32 %s1029_s12, 7 }
  0x13   : > { %358 = vmatpush1.bf16.msra.mxu0 %v842_v5  ;;  %431 = vmatpush1.bf16.msra.mxu1 %v843_v6  ;;  %v949_v24 = vrot.slane %v302_v21, %v306_v19  ;;  %v951_v25 = vrot.slane %v302_v21, %v314_v20  ;;  %v953_v26 = vrot.slane %v302_v21, %v310_v22  ;;  %s965_s20 = scalar_lea.vmem %s1023_s3, %s796_s17 }
  0x14   : > { %v955_v27 = vrot.slane %v302_v21, %v318_v23 }
  0x16   : > { %769 = vmatmul.mubr.msk.bf16.vlgmr.msra.gmra.mrb[0].mxu0 %vm344_vm0, %v294_v7  ;;  %773 = vmatmul.mubr.msk.bf16.vlgmr.msra.gmra.mrb[0].mxu1 %vm344_vm0, %v294_v7 }
  0x17   : > { %399 = vmatprep.mubr.bf16.mxu0 %v868_v0  ;;  %472 = vmatprep.mubr.bf16.mxu1 %v868_v0 }
  0x1e   : > { %770 = vmatmul.mubr.msk.bf16.gmra.mrb[4].mxu0 %vm344_vm0, %v295_v10  ;;  %774 = vmatmul.mubr.msk.bf16.gmra.mrb[4].mxu1 %vm344_vm0, %v295_v10 }
  0x1f   : > { %409 = vmatprep.mubr.bf16.mxu0 %v868_v0  ;;  %482 = vmatprep.mubr.bf16.mxu1 %v868_v0 }
  0x26   : > { %771 = vmatmul.mubr.msk.bf16.gmra.mrb[8].mxu0 %vm344_vm0, %v296_v13  ;;  %775 = vmatmul.mubr.msk.bf16.gmra.mrb[8].mxu1 %vm344_vm0, %v296_v13 }
  0x27   : > { %419 = vmatprep.mubr.bf16.mxu0 %v868_v0  ;;  %492 = vmatprep.mubr.bf16.mxu1 %v868_v0 }
  0x2e   : > { %772 = vmatmul.mubr.msk.bf16.gmra.mrb[12].mxu0 %vm344_vm0, %v297_v16  ;;  %776 = vmatmul.mubr.msk.bf16.gmra.mrb[12].mxu1 %vm344_vm0, %v297_v16 }
  0xe9   : > { %v391_v28 = vpop.f32.mrb[0].mxu0  ;;  %v464_v29 = vpop.f32.mrb[0].mxu1 }
  0xea   : > { %v392_v30 = vadd.f32 %v391_v28, %v949_v24  ;;  %v465_v31 = vadd.f32 %v464_v29, %v951_v25  ;;  %v393_v32 = vpop.f32.mrb[1].mxu0  ;;  %v466_v33 = vpop.f32.mrb[1].mxu1 }
  0xeb   : > { %v394_v34 = vadd.f32 %v393_v32, %v953_v26  ;;  %v467_v35 = vadd.f32 %v466_v33, %v955_v27  ;;  %v395_v36 = vpop.f32.mrb[2].mxu0  ;;  %v468_v37 = vpop.f32.mrb[2].mxu1 }
  0xec   : > { %v396_v38 = vadd.f32 %v395_v36, %v949_v24  ;;  %v469_v39 = vadd.f32 %v468_v37, %v951_v25  ;;  %v397_v40 = vpop.f32.mrb[3].mxu0  ;;  %v470_v41 = vpop.f32.mrb[3].mxu1 }
  0xed   : > { %v797_v42 = vpack.c.bf16 %v394_v34, %v392_v30  ;;  %v798_v43 = vpack.c.bf16 %v467_v35, %v465_v31  ;;  %v398_v44 = vadd.f32 %v397_v40, %v953_v26  ;;  %v471_v45 = vadd.f32 %v470_v41, %v955_v27 }
  0xef   : > { %599 = vst [vmem:[%s965_s20] sm:$0xff] %v797_v42  ;;  %600 = vst [vmem:[%s965_s20 + $0x8] sm:$0xff] %v798_v43  ;;  %v799_v46 = vpack.c.bf16 %v398_v44, %v396_v38  ;;  %v800_v47 = vpack.c.bf16 %v471_v45, %v469_v39 }
  0xf1   : > { %601 = vst [vmem:[%s965_s20 + $0x10] sm:$0xff] %v799_v46  ;;  %602 = vst [vmem:[%s965_s20 + $0x18] sm:$0xff] %v800_v47  ;;  %v401_v48 = vpop.f32.mrb[4].mxu0  ;;  %v474_v49 = vpop.f32.mrb[4].mxu1 }
  0xf2   : > { %v402_v50 = vadd.f32 %v401_v48, %v949_v24  ;;  %v475_v51 = vadd.f32 %v474_v49, %v951_v25  ;;  %v403_v52 = vpop.f32.mrb[5].mxu0  ;;  %v476_v53 = vpop.f32.mrb[5].mxu1 }
  0xf3   : > { %v404_v54 = vadd.f32 %v403_v52, %v953_v26  ;;  %v477_v55 = vadd.f32 %v476_v53, %v955_v27  ;;  %v405_v56 = vpop.f32.mrb[6].mxu0  ;;  %v478_v57 = vpop.f32.mrb[6].mxu1 }
  0xf4   : > { %v406_v58 = vadd.f32 %v405_v56, %v949_v24  ;;  %v479_v59 = vadd.f32 %v478_v57, %v951_v25  ;;  %v407_v60 = vpop.f32.mrb[7].mxu0  ;;  %v480_v61 = vpop.f32.mrb[7].mxu1 }
  0xf5   : > { %v801_v62 = vpack.c.bf16 %v404_v54, %v402_v50  ;;  %v802_v63 = vpack.c.bf16 %v477_v55, %v475_v51  ;;  %v408_v0 = vadd.f32 %v407_v60, %v953_v26  ;;  %v481_v1 = vadd.f32 %v480_v61, %v955_v27 }
  0xf7   : > { %603 = vst [vmem:[%s965_s20 + $0x20] sm:$0xff] %v801_v62  ;;  %604 = vst [vmem:[%s965_s20 + $0x28] sm:$0xff] %v802_v63  ;;  %v803_v2 = vpack.c.bf16 %v408_v0, %v406_v58  ;;  %v804_v3 = vpack.c.bf16 %v481_v1, %v479_v59 }
  0xf9   : > { %605 = vst [vmem:[%s965_s20 + $0x30] sm:$0xff] %v803_v2  ;;  %606 = vst [vmem:[%s965_s20 + $0x38] sm:$0xff] %v804_v3  ;;  %v411_v4 = vpop.f32.mrb[8].mxu0  ;;  %v484_v5 = vpop.f32.mrb[8].mxu1 }
  0xfa   : > { %v412_v6 = vadd.f32 %v411_v4, %v949_v24  ;;  %v485_v7 = vadd.f32 %v484_v5, %v951_v25  ;;  %v413_v8 = vpop.f32.mrb[9].mxu0  ;;  %v486_v9 = vpop.f32.mrb[9].mxu1 }
  0xfb   : > { %v414_v10 = vadd.f32 %v413_v8, %v953_v26  ;;  %v487_v11 = vadd.f32 %v486_v9, %v955_v27  ;;  %v415_v12 = vpop.f32.mrb[10].mxu0  ;;  %v488_v13 = vpop.f32.mrb[10].mxu1 }
  0xfc   : > { %v416_v14 = vadd.f32 %v415_v12, %v949_v24  ;;  %v489_v15 = vadd.f32 %v488_v13, %v951_v25  ;;  %v417_v16 = vpop.f32.mrb[11].mxu0  ;;  %v490_v17 = vpop.f32.mrb[11].mxu1 }
  0xfd   : > { %v805_v18 = vpack.c.bf16 %v414_v10, %v412_v6  ;;  %v806_v19 = vpack.c.bf16 %v487_v11, %v485_v7  ;;  %v418_v20 = vadd.f32 %v417_v16, %v953_v26  ;;  %v491_v21 = vadd.f32 %v490_v17, %v955_v27 }
  0xff   : > { %607 = vst [vmem:[%s965_s20 + $0x40] sm:$0xff] %v805_v18  ;;  %608 = vst [vmem:[%s965_s20 + $0x48] sm:$0xff] %v806_v19  ;;  %v807_v22 = vpack.c.bf16 %v418_v20, %v416_v14  ;;  %v808_v23 = vpack.c.bf16 %v491_v21, %v489_v15 }
 0x101   : > { %609 = vst [vmem:[%s965_s20 + $0x50] sm:$0xff] %v807_v22  ;;  %610 = vst [vmem:[%s965_s20 + $0x58] sm:$0xff] %v808_v23  ;;  %v421_v28 = vpop.f32.mrb[12].mxu0  ;;  %v494_v29 = vpop.f32.mrb[12].mxu1 }
 0x102   : > { %v422_v30 = vadd.f32 %v421_v28, %v949_v24  ;;  %v495_v31 = vadd.f32 %v494_v29, %v951_v25  ;;  %v423_v32 = vpop.f32.mrb[13].mxu0  ;;  %v496_v33 = vpop.f32.mrb[13].mxu1 }
 0x103   : > { %v424_v34 = vadd.f32 %v423_v32, %v953_v26  ;;  %v497_v35 = vadd.f32 %v496_v33, %v955_v27  ;;  %v425_v36 = vpop.f32.mrb[14].mxu0  ;;  %v498_v37 = vpop.f32.mrb[14].mxu1 }
 0x104   : > { %v426_v38 = vadd.f32 %v425_v36, %v949_v24  ;;  %v499_v39 = vadd.f32 %v498_v37, %v951_v25  ;;  %v427_v40 = vpop.f32.mrb[15].mxu0  ;;  %v500_v41 = vpop.f32.mrb[15].mxu1 }
 0x105   : > { %v809_v42 = vpack.c.bf16 %v424_v34, %v422_v30  ;;  %v810_v43 = vpack.c.bf16 %v497_v35, %v495_v31  ;;  %v428_v44 = vadd.f32 %v427_v40, %v953_v26  ;;  %v501_v45 = vadd.f32 %v500_v41, %v955_v27 }
 0x107   : > { %611 = vst [vmem:[%s965_s20 + $0x60] sm:$0xff] %v809_v42  ;;  %612 = vst [vmem:[%s965_s20 + $0x68] sm:$0xff] %v810_v43  ;;  %v811_v46 = vpack.c.bf16 %v428_v44, %v426_v38  ;;  %v812_v47 = vpack.c.bf16 %v501_v45, %v499_v39 }
 0x109   : > { %613 = vst [vmem:[%s965_s20 + $0x70] sm:$0xff] %v811_v46  ;;  %614 = vst [vmem:[%s965_s20 + $0x78] sm:$0xff] %v812_v47 }
 0x10a PF: > { %s13_s14 = sadd.s32 1, %s866_s14   ;;  %s1024_s12 = smov %s862_s13 }
 0x10b   : > { %p10_p5 = scmp.ge.s32.totalorder %s13_s14, 4   ;;  %s1025_s13 = smov %s1027_s15 }
 0x10d   :  { %12 = sbr.rel (!%p10_p5) target bundleno = 2 (0x2), region = 68 }

// kernel: lstm_forward.6
= control target key start
LH: loop header
LB: loop body
LE: loop exit
PB: predicated region body
PF: predicated region fallthrough
CT: control target
= control target key end

     0   :  { %s1390_s12 = smov 0   ;;  %s1392_s13 = smov 0   ;;  %s1603_s0 = inlined_call_operand.vmem [shape: f32[64,256], index: 0, kind: input, shape index: {}]   ;;  %s1604_s1 = inlined_call_operand.vmem [shape: bf16[2,256,512], index: 1, kind: input, shape index: {}]   ;;  %s1605_s2 = inlined_call_operand.vmem [shape: f32[2,1,512], index: 2, kind: input, shape index: {}]   ;;  %s1606_s3 = inlined_call_operand.vmem [shape: bf16[2,64,512], index: 3, kind: output, shape index: {}]  }
   0x1   :  { %s1394_s14 = smov 0  }
   0x2 LB: > { %s32_s15 = sadd.s32 1, %s1364_s13  ;;  %p1120_p0 = scmp.ge.s32.totalorder %s1368_s14, 1  ;;  %s1368_s14 = sphi %s1394_s14, %s13_s14   ;;  %s1364_s13 = sphi %s1392_s13, %s1608_s13   ;;  %s1360_s12 = sphi %s1390_s12, %s1607_s12  }
   0x3   : > { %p34_p1 = scmp.ge.s32.totalorder %s32_s15, 2  ;;  %p195_p2 = scmp.lt.s32.totalorder %s1368_s14, 3 }
   0x5   : > { %s1610_s15 = smov (%p34_p1, %s32_s15), 0  ;;  %p196_p3 = pnand %p1120_p0, %p195_p2 }
   0x6   : > { %p254_p4 = scmp.lt.s32.totalorder (!%p196_p3), %s1360_s12, 1  ;;  %v289_v0 = vld [vmem:[%s1603_s0 + $0x8] sm:$0xff] (!%p196_p3)  ;;  %v291_v1 = vld [vmem:[%s1603_s0 + $0x18] sm:$0xff] (!%p196_p3) }
   0x7   : > { %199 = sbr.rel (%p196_p3) target bundleno = 326 (0x146), region = 32  ;;  %v305_v2 = vpack.c.bf16 (!%p196_p3), %v291_v1, %v289_v0  ;;  %v288_v1 = vld [vmem:[%s1603_s0] sm:$0xff] (!%p196_p3) }
   0x9   : > { %750 = vmatprep.mubr.bf16.mxu0 (!%p196_p3), %v305_v2  ;;  %823 = vmatprep.mubr.bf16.mxu1 (!%p196_p3), %v305_v2 }
   0xe   : > { %s1612_s12 = smov (!%p254_p4, %s1360_s12), 1 }
   0xf   : > { %s1208_s20 = sshll.u32 %s1612_s12, 9  ;;  %s1123_s29 = sshll.u32 %s1612_s12, 2 }
  0x10   : > { %s1420_s23 = scalar_lea.vmem %s1604_s1, %s1208_s20  ;;  %s270_s5 = scalar_lea.vmem %s1605_s2, %s1123_s29 }
  0x11   : > { %v1250_v3 = vld [vmem:[%s1420_s23 + $0x4] ss:$16 sps:$4 sm:$0xff]   ;;  %v1252_v4 = vld [vmem:[%s1420_s23 + $0xc] ss:$16 sps:$4 sm:$0xff]   ;;  %v1254_v5 = vld [vmem:[%s1420_s23] ss:$16 sps:$4 sm:$0xff]  }
  0x12   : > { %718 = vmatprep.subr.bf16.mxu0 %v1250_v3  ;;  %v1255_v6 = vld [vmem:[%s1420_s23 + $0x8] ss:$16 sps:$4 sm:$0xff]   ;;  %791 = vmatprep.subr.bf16.mxu1 %v1252_v4  ;;  %v1256_v7 = vld [vmem:[%s1420_s23 + $0x24] ss:$16 sps:$4 sm:$0xff]   ;;  %v1258_v8 = vld [vmem:[%s1420_s23 + $0x2c] ss:$16 sps:$4 sm:$0xff]  }
  0x13   : > { %719 = vmatpush1.bf16.msra.mxu0 %v1254_v5  ;;  %792 = vmatpush1.bf16.msra.mxu1 %v1255_v6  ;;  %v1260_v9 = vld [vmem:[%s1420_s23 + $0x20] ss:$16 sps:$4 sm:$0xff]   ;;  %v1261_v10 = vld [vmem:[%s1420_s23 + $0x28] ss:$16 sps:$4 sm:$0xff]   ;;  %v1262_v11 = vld [vmem:[%s1420_s23 + $0x44] ss:$16 sps:$4 sm:$0xff]  }
  0x14   : > { %720 = vmatprep.subr.bf16.mxu0 %v1256_v7  ;;  %793 = vmatprep.subr.bf16.mxu1 %v1258_v8  ;;  %v1264_v12 = vld [vmem:[%s1420_s23 + $0x4c] ss:$16 sps:$4 sm:$0xff]   ;;  %v1266_v13 = vld [vmem:[%s1420_s23 + $0x40] ss:$16 sps:$4 sm:$0xff]   ;;  %v1267_v14 = vld [vmem:[%s1420_s23 + $0x48] ss:$16 sps:$4 sm:$0xff]  }
  0x15   : > { %v1268_v15 = vld [vmem:[%s1420_s23 + $0x64] ss:$16 sps:$4 sm:$0xff]   ;;  %v1270_v16 = vld [vmem:[%s1420_s23 + $0x6c] ss:$16 sps:$4 sm:$0xff]   ;;  %v1272_v17 = vld [vmem:[%s1420_s23 + $0x60] ss:$16 sps:$4 sm:$0xff]  }
  0x16   : > { %v1273_v18 = vld [vmem:[%s1420_s23 + $0x68] ss:$16 sps:$4 sm:$0xff]   ;;  %v1274_v19 = vld [vmem:[%s1420_s23 + $0x84] ss:$16 sps:$4 sm:$0xff]   ;;  %v1276_v20 = vld [vmem:[%s1420_s23 + $0x8c] ss:$16 sps:$4 sm:$0xff]  }
  0x17   : > { %721 = vmatpush1.bf16.msra.mxu0 %v1260_v9  ;;  %794 = vmatpush1.bf16.msra.mxu1 %v1261_v10  ;;  %v1278_v21 = vld [vmem:[%s1420_s23 + $0x80] ss:$16 sps:$4 sm:$0xff]   ;;  %v1279_v22 = vld [vmem:[%s1420_s23 + $0x88] ss:$16 sps:$4 sm:$0xff]   ;;  %v1280_v23 = vld [vmem:[%s1420_s23 + $0xa4] ss:$16 sps:$4 sm:$0xff]  }
  0x18   : > { %722 = vmatprep.subr.bf16.mxu0 %v1262_v11  ;;  %795 = vmatprep.subr.bf16.mxu1 %v1264_v12  ;;  %v1282_v24 = vld [vmem:[%s1420_s23 + $0xac] ss:$16 sps:$4 sm:$0xff]   ;;  %v1284_v25 = vld [vmem:[%s1420_s23 + $0xa0] ss:$16 sps:$4 sm:$0xff]   ;;  %v1285_v26 = vld [vmem:[%s1420_s23 + $0xa8] ss:$16 sps:$4 sm:$0xff]  }
  0x19   : > { %v1286_v27 = vld [vmem:[%s1420_s23 + $0xc4] ss:$16 sps:$4 sm:$0xff]   ;;  %v1288_v28 = vld [vmem:[%s1420_s23 + $0xcc] ss:$16 sps:$4 sm:$0xff]   ;;  %v1290_v29 = vld [vmem:[%s1420_s23 + $0xc0] ss:$16 sps:$4 sm:$0xff]  }
  0x1a   : > { %v1291_v30 = vld [vmem:[%s1420_s23 + $0xc8] ss:$16 sps:$4 sm:$0xff]   ;;  %v1292_v31 = vld [vmem:[%s1420_s23 + $0xe4] ss:$16 sps:$4 sm:$0xff]   ;;  %v1294_v32 = vld [vmem:[%s1420_s23 + $0xec] ss:$16 sps:$4 sm:$0xff]  }
  0x1b   : > { %723 = vmatpush1.bf16.msra.mxu0 %v1266_v13  ;;  %796 = vmatpush1.bf16.msra.mxu1 %v1267_v14  ;;  %v1296_v33 = vld [vmem:[%s1420_s23 + $0xe0] ss:$16 sps:$4 sm:$0xff]   ;;  %v1297_v34 = vld [vmem:[%s1420_s23 + $0xe8] ss:$16 sps:$4 sm:$0xff]   ;;  %v1298_v35 = vld [vmem:[%s1420_s23 + $0x104] ss:$16 sps:$4 sm:$0xff]  }
  0x1c   : > { %724 = vmatprep.subr.bf16.mxu0 %v1268_v15  ;;  %797 = vmatprep.subr.bf16.mxu1 %v1270_v16  ;;  %v1300_v36 = vld [vmem:[%s1420_s23 + $0x10c] ss:$16 sps:$4 sm:$0xff]   ;;  %v1302_v37 = vld [vmem:[%s1420_s23 + $0x100] ss:$16 sps:$4 sm:$0xff]   ;;  %v1303_v38 = vld [vmem:[%s1420_s23 + $0x108] ss:$16 sps:$4 sm:$0xff]  }
  0x1d   : > { %v1304_v39 = vld [vmem:[%s1420_s23 + $0x124] ss:$16 sps:$4 sm:$0xff]   ;;  %v1306_v40 = vld [vmem:[%s1420_s23 + $0x12c] ss:$16 sps:$4 sm:$0xff]   ;;  %v1308_v41 = vld [vmem:[%s1420_s23 + $0x120] ss:$16 sps:$4 sm:$0xff]  }
  0x1e   : > { %v1309_v42 = vld [vmem:[%s1420_s23 + $0x128] ss:$16 sps:$4 sm:$0xff]   ;;  %v1310_v43 = vld [vmem:[%s1420_s23 + $0x144] ss:$16 sps:$4 sm:$0xff]   ;;  %v1312_v44 = vld [vmem:[%s1420_s23 + $0x14c] ss:$16 sps:$4 sm:$0xff]  }
  0x1f   : > { %725 = vmatpush1.bf16.msra.mxu0 %v1272_v17  ;;  %798 = vmatpush1.bf16.msra.mxu1 %v1273_v18  ;;  %v1314_v45 = vld [vmem:[%s1420_s23 + $0x140] ss:$16 sps:$4 sm:$0xff]   ;;  %v1315_v46 = vld [vmem:[%s1420_s23 + $0x148] ss:$16 sps:$4 sm:$0xff]   ;;  %v1316_v47 = vld [vmem:[%s1420_s23 + $0x164] ss:$16 sps:$4 sm:$0xff]  }
  0x20   : > { %726 = vmatprep.subr.bf16.mxu0 %v1274_v19  ;;  %799 = vmatprep.subr.bf16.mxu1 %v1276_v20  ;;  %v1318_v48 = vld [vmem:[%s1420_s23 + $0x16c] ss:$16 sps:$4 sm:$0xff]   ;;  %v1320_v49 = vld [vmem:[%s1420_s23 + $0x160] ss:$16 sps:$4 sm:$0xff]   ;;  %v1321_v50 = vld [vmem:[%s1420_s23 + $0x168] ss:$16 sps:$4 sm:$0xff]  }
  0x21   : > { %v1322_v51 = vld [vmem:[%s1420_s23 + $0x184] ss:$16 sps:$4 sm:$0xff]   ;;  %v1324_v52 = vld [vmem:[%s1420_s23 + $0x18c] ss:$16 sps:$4 sm:$0xff]   ;;  %v1326_v53 = vld [vmem:[%s1420_s23 + $0x180] ss:$16 sps:$4 sm:$0xff]  }
  0x22   : > { %v1327_v54 = vld [vmem:[%s1420_s23 + $0x188] ss:$16 sps:$4 sm:$0xff]   ;;  %v1328_v55 = vld [vmem:[%s1420_s23 + $0x1a4] ss:$16 sps:$4 sm:$0xff]   ;;  %v1330_v56 = vld [vmem:[%s1420_s23 + $0x1ac] ss:$16 sps:$4 sm:$0xff]  }
  0x23   : > { %727 = vmatpush1.bf16.msra.mxu0 %v1278_v21  ;;  %800 = vmatpush1.bf16.msra.mxu1 %v1279_v22  ;;  %v1332_v57 = vld [vmem:[%s1420_s23 + $0x1a0] ss:$16 sps:$4 sm:$0xff]   ;;  %v1333_v58 = vld [vmem:[%s1420_s23 + $0x1a8] ss:$16 sps:$4 sm:$0xff]   ;;  %v1334_v59 = vld [vmem:[%s1420_s23 + $0x1c4] ss:$16 sps:$4 sm:$0xff]  }
  0x24   : > { %728 = vmatprep.subr.bf16.mxu0 %v1280_v23  ;;  %801 = vmatprep.subr.bf16.mxu1 %v1282_v24  ;;  %v1336_v60 = vld [vmem:[%s1420_s23 + $0x1cc] ss:$16 sps:$4 sm:$0xff]   ;;  %v1338_v61 = vld [vmem:[%s1420_s23 + $0x1c0] ss:$16 sps:$4 sm:$0xff]   ;;  %v1339_v62 = vld [vmem:[%s1420_s23 + $0x1c8] ss:$16 sps:$4 sm:$0xff]   ;;  %v378_v24 = vlaneseq }
  0x25   : > { %v1340_v63 = vld [vmem:[%s1420_s23 + $0x1e4] ss:$16 sps:$4 sm:$0xff]   ;;  %v1342_v0 = vld [vmem:[%s1420_s23 + $0x1ec] ss:$16 sps:$4 sm:$0xff]   ;;  %v1344_v2 = vld [vmem:[%s1420_s23 + $0x1e0] ss:$16 sps:$4 sm:$0xff]  }
  0x26   : > { %v1345_v3 = vld [vmem:[%s1420_s23 + $0x1e8] ss:$16 sps:$4 sm:$0xff]   ;;  %v290_v4 = vld [vmem:[%s1603_s0 + $0x10] sm:$0xff]  ;;  %v292_v9 = vld [vmem:[%s1603_s0 + $0x20] sm:$0xff]  ;;  %s1209_s6 = sshll.u32 %s1612_s12, 7 }
  0x27   : > { %729 = vmatpush1.bf16.msra.mxu0 %v1284_v25  ;;  %802 = vmatpush1.bf16.msra.mxu1 %v1285_v26  ;;  %v293_v5 = vld [vmem:[%s1603_s0 + $0x28] sm:$0xff]  ;;  %v295_v6 = vld [vmem:[%s1603_s0 + $0x38] sm:$0xff]  ;;  %v304_v7 = vpack.c.bf16 %v290_v4, %v288_v1  ;;  %v294_v10 = vld [vmem:[%s1603_s0 + $0x30] sm:$0xff]  ;;  %v379_v25 = vshrl.u32 %v378_v24, 7  ;;  %s1548_s9 = scalar_lea.vmem %s1606_s3, %s1209_s6 }
  0x28   : > { %730 = vmatprep.subr.bf16.mxu0 %v1286_v27  ;;  %803 = vmatprep.subr.bf16.mxu1 %v1288_v28  ;;  %v307_v8 = vpack.c.bf16 %v295_v6, %v293_v5  ;;  %v297_v11 = vld [vmem:[%s1603_s0 + $0x48] sm:$0xff]  ;;  %v299_v12 = vld [vmem:[%s1603_s0 + $0x58] sm:$0xff]  ;;  %v306_v13 = vpack.c.bf16 %v294_v10, %v292_v9  ;;  %v296_v15 = vld [vmem:[%s1603_s0 + $0x40] sm:$0xff] }
  0x29   : > { %v309_v14 = vpack.c.bf16 %v299_v12, %v297_v11  ;;  %v298_v16 = vld [vmem:[%s1603_s0 + $0x50] sm:$0xff]  ;;  %v301_v17 = vld [vmem:[%s1603_s0 + $0x68] sm:$0xff]  ;;  %v303_v18 = vld [vmem:[%s1603_s0 + $0x78] sm:$0xff]  ;;  %v380_v26 = vsub.s32 0, %v379_v25  ;;  %v388_v27 = vsub.s32 2, %v379_v25 }
  0x2a   : > { %v308_v19 = vpack.c.bf16 %v298_v16, %v296_v15  ;;  %v311_v20 = vpack.c.bf16 %v303_v18, %v301_v17  ;;  %v300_v21 = vld [vmem:[%s1603_s0 + $0x60] sm:$0xff]  ;;  %v302_v22 = vld [vmem:[%s1603_s0 + $0x70] sm:$0xff] }
  0x2b   : > { %731 = vmatpush1.bf16.msra.mxu0 %v1290_v29  ;;  %804 = vmatpush1.bf16.msra.mxu1 %v1291_v30  ;;  %v310_v23 = vpack.c.bf16 %v302_v22, %v300_v21  ;;  %v376_v28 = vld [vmem:[%s270_s5] sm:$0xf]  ;;  %v384_v29 = vsub.s32 1, %v379_v25  ;;  %v392_v30 = vsub.s32 3, %v379_v25 }
  0x2c   : > { %732 = vmatprep.subr.bf16.mxu0 %v1292_v31  ;;  %805 = vmatprep.subr.bf16.mxu1 %v1294_v32  ;;  %v1532_v31 = vrot.slane %v376_v28, %v380_v26  ;;  %v1534_v32 = vrot.slane %v376_v28, %v388_v27 }
  0x2f   : > { %733 = vmatpush1.bf16.msra.mxu0 %v1296_v33  ;;  %806 = vmatpush1.bf16.msra.mxu1 %v1297_v34  ;;  %v1536_v33 = vrot.slane %v376_v28, %v384_v29  ;;  %v1538_v34 = vrot.slane %v376_v28, %v392_v30 }
  0x30   : > { %734 = vmatprep.subr.bf16.mxu0 %v1298_v35  ;;  %807 = vmatprep.subr.bf16.mxu1 %v1300_v36 }
  0x33   : > { %735 = vmatpush1.bf16.msra.mxu0 %v1302_v37  ;;  %808 = vmatpush1.bf16.msra.mxu1 %v1303_v38 }
  0x34   : > { %736 = vmatprep.subr.bf16.mxu0 %v1304_v39  ;;  %809 = vmatprep.subr.bf16.mxu1 %v1306_v40 }
  0x37   : > { %737 = vmatpush1.bf16.msra.mxu0 %v1308_v41  ;;  %810 = vmatpush1.bf16.msra.mxu1 %v1309_v42 }
  0x38   : > { %738 = vmatprep.subr.bf16.mxu0 %v1310_v43  ;;  %811 = vmatprep.subr.bf16.mxu1 %v1312_v44 }
  0x3b   : > { %739 = vmatpush1.bf16.msra.mxu0 %v1314_v45  ;;  %812 = vmatpush1.bf16.msra.mxu1 %v1315_v46 }
  0x3c   : > { %740 = vmatprep.subr.bf16.mxu0 %v1316_v47  ;;  %813 = vmatprep.subr.bf16.mxu1 %v1318_v48 }
  0x3f   : > { %741 = vmatpush1.bf16.msra.mxu0 %v1320_v49  ;;  %814 = vmatpush1.bf16.msra.mxu1 %v1321_v50 }
  0x40   : > { %742 = vmatprep.subr.bf16.mxu0 %v1322_v51  ;;  %815 = vmatprep.subr.bf16.mxu1 %v1324_v52 }
  0x43   : > { %743 = vmatpush1.bf16.msra.mxu0 %v1326_v53  ;;  %816 = vmatpush1.bf16.msra.mxu1 %v1327_v54 }
  0x44   : > { %744 = vmatprep.subr.bf16.mxu0 %v1328_v55  ;;  %817 = vmatprep.subr.bf16.mxu1 %v1330_v56 }
  0x47   : > { %745 = vmatpush1.bf16.msra.mxu0 %v1332_v57  ;;  %818 = vmatpush1.bf16.msra.mxu1 %v1333_v58 }
  0x48   : > { %746 = vmatprep.subr.bf16.mxu0 %v1334_v59  ;;  %819 = vmatprep.subr.bf16.mxu1 %v1336_v60 }
  0x4b   : > { %747 = vmatpush1.bf16.msra.mxu0 %v1338_v61  ;;  %820 = vmatpush1.bf16.msra.mxu1 %v1339_v62 }
  0x4c   : > { %748 = vmatprep.subr.bf16.mxu0 %v1340_v63  ;;  %821 = vmatprep.subr.bf16.mxu1 %v1342_v0 }
  0x4f   : > { %749 = vmatpush1.bf16.msra.mxu0 %v1344_v2  ;;  %822 = vmatpush1.bf16.msra.mxu1 %v1345_v3 }
  0x52   : > { %751 = vmatmul.mubr.bf16.vlgmr.msra.gmra.mrb[0].mxu0 %v304_v7  ;;  %824 = vmatmul.mubr.bf16.vlgmr.msra.gmra.mrb[0].mxu1 %v304_v7 }
  0x53   : > { %760 = vmatprep.mubr.bf16.mxu0 %v307_v8  ;;  %833 = vmatprep.mubr.bf16.mxu1 %v307_v8 }
  0x5a   : > { %761 = vmatmul.mubr.bf16.gmra.mrb[4].mxu0 %v306_v13  ;;  %834 = vmatmul.mubr.bf16.gmra.mrb[4].mxu1 %v306_v13 }
  0x5b   : > { %770 = vmatprep.mubr.bf16.mxu0 %v309_v14  ;;  %843 = vmatprep.mubr.bf16.mxu1 %v309_v14 }
  0x62   : > { %771 = vmatmul.mubr.bf16.gmra.mrb[8].mxu0 %v308_v19  ;;  %844 = vmatmul.mubr.bf16.gmra.mrb[8].mxu1 %v308_v19 }
  0x63   : > { %780 = vmatprep.mubr.bf16.mxu0 %v311_v20  ;;  %853 = vmatprep.mubr.bf16.mxu1 %v311_v20 }
  0x6a   : > { %781 = vmatmul.mubr.bf16.gmra.mrb[12].mxu0 %v310_v23  ;;  %854 = vmatmul.mubr.bf16.gmra.mrb[12].mxu1 %v310_v23 }
 0x125   : > { %v752_v35 = vpop.f32.mrb[0].mxu0  ;;  %v825_v36 = vpop.f32.mrb[0].mxu1 }
 0x126   : > { %v753_v37 = vadd.f32 %v752_v35, %v1532_v31  ;;  %v826_v38 = vadd.f32 %v825_v36, %v1534_v32  ;;  %v754_v39 = vpop.f32.mrb[1].mxu0  ;;  %v827_v40 = vpop.f32.mrb[1].mxu1 }
 0x127   : > { %v755_v41 = vadd.f32 %v754_v39, %v1536_v33  ;;  %v828_v42 = vadd.f32 %v827_v40, %v1538_v34  ;;  %v756_v43 = vpop.f32.mrb[2].mxu0  ;;  %v829_v44 = vpop.f32.mrb[2].mxu1 }
 0x128   : > { %v757_v45 = vadd.f32 %v756_v43, %v1532_v31  ;;  %v830_v46 = vadd.f32 %v829_v44, %v1534_v32  ;;  %v758_v47 = vpop.f32.mrb[3].mxu0  ;;  %v831_v48 = vpop.f32.mrb[3].mxu1 }
 0x129   : > { %v1210_v49 = vpack.c.bf16 %v755_v41, %v753_v37  ;;  %v1211_v50 = vpack.c.bf16 %v828_v42, %v826_v38  ;;  %v759_v51 = vadd.f32 %v758_v47, %v1536_v33  ;;  %v832_v52 = vadd.f32 %v831_v48, %v1538_v34 }
 0x12b   : > { %960 = vst [vmem:[%s1548_s9] sm:$0xff] %v1210_v49  ;;  %961 = vst [vmem:[%s1548_s9 + $0x8] sm:$0xff] %v1211_v50  ;;  %v1212_v53 = vpack.c.bf16 %v759_v51, %v757_v45  ;;  %v1213_v54 = vpack.c.bf16 %v832_v52, %v830_v46 }
 0x12d   : > { %962 = vst [vmem:[%s1548_s9 + $0x10] sm:$0xff] %v1212_v53  ;;  %963 = vst [vmem:[%s1548_s9 + $0x18] sm:$0xff] %v1213_v54  ;;  %v762_v55 = vpop.f32.mrb[4].mxu0  ;;  %v835_v56 = vpop.f32.mrb[4].mxu1 }
 0x12e   : > { %v763_v57 = vadd.f32 %v762_v55, %v1532_v31  ;;  %v836_v58 = vadd.f32 %v835_v56, %v1534_v32  ;;  %v764_v59 = vpop.f32.mrb[5].mxu0  ;;  %v837_v60 = vpop.f32.mrb[5].mxu1 }
 0x12f   : > { %v765_v61 = vadd.f32 %v764_v59, %v1536_v33  ;;  %v838_v62 = vadd.f32 %v837_v60, %v1538_v34  ;;  %v766_v63 = vpop.f32.mrb[6].mxu0  ;;  %v839_v0 = vpop.f32.mrb[6].mxu1 }
 0x130   : > { %v767_v1 = vadd.f32 %v766_v63, %v1532_v31  ;;  %v840_v2 = vadd.f32 %v839_v0, %v1534_v32  ;;  %v768_v3 = vpop.f32.mrb[7].mxu0  ;;  %v841_v4 = vpop.f32.mrb[7].mxu1 }
 0x131   : > { %v1214_v5 = vpack.c.bf16 %v765_v61, %v763_v57  ;;  %v1215_v6 = vpack.c.bf16 %v838_v62, %v836_v58  ;;  %v769_v7 = vadd.f32 %v768_v3, %v1536_v33  ;;  %v842_v8 = vadd.f32 %v841_v4, %v1538_v34 }
 0x133   : > { %964 = vst [vmem:[%s1548_s9 + $0x20] sm:$0xff] %v1214_v5  ;;  %965 = vst [vmem:[%s1548_s9 + $0x28] sm:$0xff] %v1215_v6  ;;  %v1216_v9 = vpack.c.bf16 %v769_v7, %v767_v1  ;;  %v1217_v10 = vpack.c.bf16 %v842_v8, %v840_v2 }
 0x135   : > { %966 = vst [vmem:[%s1548_s9 + $0x30] sm:$0xff] %v1216_v9  ;;  %967 = vst [vmem:[%s1548_s9 + $0x38] sm:$0xff] %v1217_v10  ;;  %v772_v11 = vpop.f32.mrb[8].mxu0  ;;  %v845_v12 = vpop.f32.mrb[8].mxu1 }
 0x136   : > { %v773_v13 = vadd.f32 %v772_v11, %v1532_v31  ;;  %v846_v14 = vadd.f32 %v845_v12, %v1534_v32  ;;  %v774_v15 = vpop.f32.mrb[9].mxu0  ;;  %v847_v16 = vpop.f32.mrb[9].mxu1 }
 0x137   : > { %v775_v17 = vadd.f32 %v774_v15, %v1536_v33  ;;  %v848_v18 = vadd.f32 %v847_v16, %v1538_v34  ;;  %v776_v19 = vpop.f32.mrb[10].mxu0  ;;  %v849_v20 = vpop.f32.mrb[10].mxu1 }
 0x138   : > { %v777_v21 = vadd.f32 %v776_v19, %v1532_v31  ;;  %v850_v22 = vadd.f32 %v849_v20, %v1534_v32  ;;  %v778_v23 = vpop.f32.mrb[11].mxu0  ;;  %v851_v24 = vpop.f32.mrb[11].mxu1 }
 0x139   : > { %v1218_v25 = vpack.c.bf16 %v775_v17, %v773_v13  ;;  %v1219_v26 = vpack.c.bf16 %v848_v18, %v846_v14  ;;  %v779_v27 = vadd.f32 %v778_v23, %v1536_v33  ;;  %v852_v28 = vadd.f32 %v851_v24, %v1538_v34 }
 0x13b   : > { %968 = vst [vmem:[%s1548_s9 + $0x40] sm:$0xff] %v1218_v25  ;;  %969 = vst [vmem:[%s1548_s9 + $0x48] sm:$0xff] %v1219_v26  ;;  %v1220_v29 = vpack.c.bf16 %v779_v27, %v777_v21  ;;  %v1221_v30 = vpack.c.bf16 %v852_v28, %v850_v22 }
 0x13d   : > { %970 = vst [vmem:[%s1548_s9 + $0x50] sm:$0xff] %v1220_v29  ;;  %971 = vst [vmem:[%s1548_s9 + $0x58] sm:$0xff] %v1221_v30  ;;  %v782_v35 = vpop.f32.mrb[12].mxu0  ;;  %v855_v36 = vpop.f32.mrb[12].mxu1 }
 0x13e   : > { %v783_v37 = vadd.f32 %v782_v35, %v1532_v31  ;;  %v856_v38 = vadd.f32 %v855_v36, %v1534_v32  ;;  %v784_v39 = vpop.f32.mrb[13].mxu0  ;;  %v857_v40 = vpop.f32.mrb[13].mxu1 }
 0x13f   : > { %v785_v41 = vadd.f32 %v784_v39, %v1536_v33  ;;  %v858_v42 = vadd.f32 %v857_v40, %v1538_v34  ;;  %v786_v43 = vpop.f32.mrb[14].mxu0  ;;  %v859_v44 = vpop.f32.mrb[14].mxu1 }
 0x140   : > { %v787_v45 = vadd.f32 %v786_v43, %v1532_v31  ;;  %v860_v46 = vadd.f32 %v859_v44, %v1534_v32  ;;  %v788_v47 = vpop.f32.mrb[15].mxu0  ;;  %v861_v48 = vpop.f32.mrb[15].mxu1 }
 0x141   : > { %v1222_v49 = vpack.c.bf16 %v785_v41, %v783_v37  ;;  %v1223_v50 = vpack.c.bf16 %v858_v42, %v856_v38  ;;  %v789_v51 = vadd.f32 %v788_v47, %v1536_v33  ;;  %v862_v52 = vadd.f32 %v861_v48, %v1538_v34 }
 0x143   : > { %972 = vst [vmem:[%s1548_s9 + $0x60] sm:$0xff] %v1222_v49  ;;  %973 = vst [vmem:[%s1548_s9 + $0x68] sm:$0xff] %v1223_v50  ;;  %v1224_v53 = vpack.c.bf16 %v789_v51, %v787_v45  ;;  %v1225_v54 = vpack.c.bf16 %v862_v52, %v860_v46 }
 0x145   : > { %974 = vst [vmem:[%s1548_s9 + $0x70] sm:$0xff] %v1224_v53  ;;  %975 = vst [vmem:[%s1548_s9 + $0x78] sm:$0xff] %v1225_v54 }
 0x146 PF: > { %s13_s14 = sadd.s32 1, %s1368_s14   ;;  %s1607_s12 = smov %s1364_s13 }
 0x147   : > { %p10_p5 = scmp.ge.s32.totalorder %s13_s14, 4   ;;  %s1608_s13 = smov %s1610_s15 }
 0x149   :  { %12 = sbr.rel (!%p10_p5) target bundleno = 2 (0x2), region = 68 }

// kernel: lstm_forward.5
= control target key start
LH: loop header
LB: loop body
LE: loop exit
PB: predicated region body
PF: predicated region fallthrough
CT: control target
= control target key end

     0   :  { %s3335_s15 = smov 0   ;;  %s3337_s16 = smov 0   ;;  %s4421_s0 = inlined_call_operand.vmem [shape: bf16[2,8,8,512], index: 0, kind: input, shape index: {}]   ;;  %s4422_s1 = inlined_call_operand.vmem [shape: f32[2,8,128], index: 1, kind: input, shape index: {}]   ;;  %s4423_s2 = inlined_call_operand.vmem [shape: f32[2,8,128], index: 2, kind: input, shape index: {}]   ;;  %s4424_s3 = inlined_call_operand.vmem [shape: bf16[2,128,512], index: 3, kind: input, shape index: {}]   ;;  %s4425_s4 = inlined_call_operand.vmem [shape: f32[8,8,256], index: 4, kind: output, shape index: {}]  }
   0x1   :  { %s3339_s17 = smov 0   ;;  %s3341_s18 = smov 0  }
   0x2   :  { %s3343_s19 = smov 0  }
   0x3 LB: > { %s2796_s20 = sadd.s32 4294967295, %s3306_s19   ;;  %s26_s21 = sadd.s32 1, %s3302_s18  ;;  %s3306_s19 = sphi %s3343_s19, %s14_s19   ;;  %s3302_s18 = sphi %s3341_s18, %s4529_s18   ;;  %s3298_s17 = sphi %s3339_s17, %s4528_s17   ;;  %s3294_s16 = sphi %s3337_s16, %s4527_s16   ;;  %s3290_s15 = sphi %s3335_s15, %s4526_s15  }
   0x4   : > { %p28_p0 = scmp.ge.s32.totalorder %s26_s21, 2  ;;  %s157_s22 = sadd.s32 1, %s3294_s16 }
   0x5   : > { %p167_p1 = scmp.ne.s32.totalorder %s3294_s16, %s3290_s15  ;;  %p168_p2 = scmp.eq.s32.totalorder %s2796_s20, 1 }
   0x6   : > { %s4531_s21 = smov (%p28_p0, %s26_s21), 0  ;;  %p2800_p4 = scmp.ge.s32.totalorder %s3306_s19, 1 }
   0x7   : > { %p3364_p3 = por %p168_p2, %p167_p1  ;;  %s153_s24 = ssub.s32 %s3302_s18, %s4531_s21 }
   0x8   : > { %p236_p5 = scmp.lt.s32.totalorder %s3306_s19, 3  ;;  %p155_p6 = scmp.eq.s32.totalorder %s153_s24, 0 }
   0xa   : > { %p237_p7 = pnand %p2800_p4, %p236_p5 }
   0xb   : > { %s3373_s25 = scalar_select %p155_p6, %s3294_s16, %s157_s22  }
   0xc   : > { %240 = sbr.rel (%p237_p7) target bundleno = 4263 (0x10a7), region = 36 }
  0x13   : > { %s280_s26 = sand.u32 1, %s3290_s15   ;;  %p288_p8 = scmp.lt.s32.totalorder %s3298_s17, 1 }
  0x14   : > { %s3376_s27 = sshll.u32 %s280_s26, 6  ;;  %p2808_p9 = scmp.ne.s32.totalorder %s3298_s17, 0 }
  0x15   : > { %s289_s28 = scalar_select %p288_p8, %s3298_s17, 1 }
  0x16   : > { %s3492_s24 = scalar_lea.vmem [#allocation4], %s3376_s27  ;;  %v4426_v44 = vmov (!%p2808_p9), 0  }
  0x17   : > { %s2968_s29 = sshll.u32 %s289_s28, 7  ;;  %s2804_s30 = sshll.u32 %s289_s28, 3  ;;  %566 = vmatprep.mubr.bf16.mxu0 (!%p2808_p9), %v4426_v44  ;;  %607 = vmatprep.mubr.bf16.mxu1 (!%p2808_p9), %v4426_v44 }
  0x18   : > { %s3382_s7 = scalar_lea.vmem %s4421_s0, %s2968_s29  ;;  %s305_s10 = scalar_lea.vmem %s4422_s1, %s2804_s30 }
  0x19   : > { %s2969_s11 = sshll.u32 %s289_s28, 8  ;;  %v325_v0 = vld [vmem:[%s305_s10] sm:$0xff]  ;;  %s309_s14 = scalar_lea.vmem %s4423_s2, %s2804_s30 }
  0x1a   : > { %s3393_s22 = scalar_lea.vmem %s4424_s3, %s2969_s11  ;;  %326 = vst [vmem:[#allocation2] sm:$0xff] %v325_v0  ;;  %v327_v1 = vld [vmem:[%s309_s14] sm:$0xff] }
  0x1b   : > { %v3396_v2 = vld [vmem:[%s3393_s22] sm:$0xff]  ;;  %v3399_v3 = vld [vmem:[%s3393_s22 + $0x8] sm:$0xff]  ;;  %v3402_v4 = vld [vmem:[%s3393_s22 + $0x10] sm:$0xff]  ;;  %328 = vst [vmem:[#allocation3] sm:$0xff] %v327_v1 }
  0x1c   : > { %v3405_v5 = vld [vmem:[%s3393_s22 + $0x18] sm:$0xff]  ;;  %v3408_v6 = vld [vmem:[%s3393_s22 + $0x20] sm:$0xff]  ;;  %v3411_v7 = vld [vmem:[%s3393_s22 + $0x28] sm:$0xff]  ;;  %v3497_v34 = vcombine.high (!%p2808_p9), %v3396_v2, %v3402_v4  ;;  %v3501_v35 = vcombine.low (!%p2808_p9), %v3396_v2, %v3402_v4 }
  0x1d   : > { %v3414_v8 = vld [vmem:[%s3393_s22 + $0x30] sm:$0xff]  ;;  %v3417_v9 = vld [vmem:[%s3393_s22 + $0x38] sm:$0xff]  ;;  %v3420_v10 = vld [vmem:[%s3393_s22 + $0x40] sm:$0xff]  ;;  %v3509_v37 = vcombine.high (!%p2808_p9), %v3399_v3, %v3405_v5  ;;  %v3514_v38 = vcombine.low (!%p2808_p9), %v3399_v3, %v3405_v5 }
  0x1e   : > { %4477 = vst [vmem:[#allocation5_spill] sm:$0xff] %v3420_v10  ;;  %v3423_v11 = vld [vmem:[%s3393_s22 + $0x48] sm:$0xff]  ;;  %v3426_v12 = vld [vmem:[%s3393_s22 + $0x50] sm:$0xff]  ;;  %v3429_v13 = vld [vmem:[%s3393_s22 + $0x58] sm:$0xff]  ;;  %v3505_v36 = vcombine.high (!%p2808_p9), %v3408_v6, %v3414_v8  ;;  %534 = vmatprep.subr.bf16.mxu0 (!%p2808_p9), %v3497_v34  ;;  %v3518_v39 = vcombine.high (!%p2808_p9), %v3411_v7, %v3417_v9  ;;  %v3523_v40 = vcombine.low (!%p2808_p9), %v3408_v6, %v3414_v8 }
  0x1f   : > { %4478 = vst [vmem:[#allocation6_spill] sm:$0xff] %v3423_v11  ;;  %4479 = vst [vmem:[#allocation7_spill] sm:$0xff] %v3426_v12  ;;  %v3432_v14 = vld [vmem:[%s3393_s22 + $0x60] sm:$0xff]  ;;  %v3435_v15 = vld [vmem:[%s3393_s22 + $0x68] sm:$0xff]  ;;  %535 = vmatpush1.bf16.msra.mxu0 (!%p2808_p9), %v3501_v35  ;;  %575 = vmatprep.subr.bf16.mxu1 (!%p2808_p9), %v3509_v37  ;;  %v3529_v41 = vcombine.high (!%p2808_p9), %v3420_v10, %v3426_v12  ;;  %v3534_v42 = vcombine.low (!%p2808_p9), %v3411_v7, %v3417_v9 }
  0x20   : > { %4480 = vst [vmem:[#allocation8_spill] sm:$0xff] %v3429_v13  ;;  %4481 = vst [vmem:[#allocation9_spill] sm:$0xff] %v3432_v14  ;;  %v3438_v16 = vld [vmem:[%s3393_s22 + $0x70] sm:$0xff]  ;;  %v3441_v17 = vld [vmem:[%s3393_s22 + $0x78] sm:$0xff]  ;;  %536 = vmatprep.subr.bf16.mxu0 (!%p2808_p9), %v3505_v36  ;;  %576 = vmatpush1.bf16.msra.mxu1 (!%p2808_p9), %v3514_v38  ;;  %v3539_v43 = vcombine.high (!%p2808_p9), %v3423_v11, %v3429_v13  ;;  %v3545_v45 = vcombine.low (!%p2808_p9), %v3420_v10, %v3426_v12 }
  0x21   : > { %4482 = vst [vmem:[#allocation10_spill] sm:$0xff] %v3435_v15  ;;  %4483 = vst [vmem:[#allocation11_spill] sm:$0xff] %v3438_v16  ;;  %v3444_v18 = vld [vmem:[%s3393_s22 + $0x80] sm:$0xff]  ;;  %v3447_v19 = vld [vmem:[%s3393_s22 + $0x88] sm:$0xff]  ;;  %577 = vmatprep.subr.bf16.mxu1 (!%p2808_p9), %v3518_v39  ;;  %v3550_v46 = vcombine.high (!%p2808_p9), %v3432_v14, %v3438_v16  ;;  %v3555_v47 = vcombine.low (!%p2808_p9), %v3423_v11, %v3429_v13  ;;  %v3560_v48 = vcombine.high (!%p2808_p9), %v3435_v15, %v3441_v17 }
  0x22   : > { %4484 = vst [vmem:[#allocation12_spill] sm:$0xff] %v3441_v17  ;;  %4485 = vst [vmem:[#allocation13_spill] sm:$0xff] %v3444_v18  ;;  %v3450_v20 = vld [vmem:[%s3393_s22 + $0x90] sm:$0xff]  ;;  %v3453_v21 = vld [vmem:[%s3393_s22 + $0x98] sm:$0xff]  ;;  %v3566_v49 = vcombine.low (!%p2808_p9), %v3432_v14, %v3438_v16  ;;  %v3576_v51 = vcombine.low (!%p2808_p9), %v3435_v15, %v3441_v17 }
  0x23   : > { %4486 = vst [vmem:[#allocation14_spill] sm:$0xff] %v3447_v19  ;;  %4487 = vst [vmem:[#allocation15_spill] sm:$0xff] %v3450_v20  ;;  %v3456_v22 = vld [vmem:[%s3393_s22 + $0xa0] sm:$0xff]  ;;  %v3459_v23 = vld [vmem:[%s3393_s22 + $0xa8] sm:$0xff]  ;;  %537 = vmatpush1.bf16.msra.mxu0 (!%p2808_p9), %v3523_v40  ;;  %v3571_v50 = vcombine.high (!%p2808_p9), %v3444_v18, %v3450_v20  ;;  %v3581_v52 = vcombine.high (!%p2808_p9), %v3447_v19, %v3453_v21  ;;  %v3586_v53 = vcombine.low (!%p2808_p9), %v3444_v18, %v3450_v20 }
  0x24   : > { %4488 = vst [vmem:[#allocation16_spill] sm:$0xff] %v3453_v21  ;;  %4489 = vst [vmem:[#allocation17_spill] sm:$0xff] %v3456_v22  ;;  %v3462_v24 = vld [vmem:[%s3393_s22 + $0xb0] sm:$0xff]  ;;  %v3465_v25 = vld [vmem:[%s3393_s22 + $0xb8] sm:$0xff]  ;;  %364 = sbr.rel (%p2808_p9) target bundleno = 2141 (0x85d), region = 44  ;;  %538 = vmatprep.subr.bf16.mxu0 (!%p2808_p9), %v3529_v41  ;;  %578 = vmatpush1.bf16.msra.mxu1 (!%p2808_p9), %v3534_v42  ;;  %v3596_v55 = vcombine.low (!%p2808_p9), %v3447_v19, %v3453_v21 }
  0x25   : > { %4490 = vst [vmem:[#allocation18_spill] sm:$0xff] %v3459_v23  ;;  %4491 = vst [vmem:[#allocation19_spill] sm:$0xff] %v3462_v24  ;;  %v3468_v26 = vld [vmem:[%s3393_s22 + $0xc0] sm:$0xff]  ;;  %v3471_v27 = vld [vmem:[%s3393_s22 + $0xc8] sm:$0xff]  ;;  %579 = vmatprep.subr.bf16.mxu1 (!%p2808_p9), %v3539_v43  ;;  %v3591_v54 = vcombine.high (!%p2808_p9), %v3456_v22, %v3462_v24  ;;  %v3601_v56 = vcombine.high (!%p2808_p9), %v3459_v23, %v3465_v25  ;;  %v3606_v57 = vcombine.low (!%p2808_p9), %v3456_v22, %v3462_v24 }
  0x26   : > { %4492 = vst [vmem:[#allocation20_spill] sm:$0xff] %v3465_v25  ;;  %4493 = vst [vmem:[#allocation21_spill] sm:$0xff] %v3468_v26  ;;  %v3474_v28 = vld [vmem:[%s3393_s22 + $0xd0] sm:$0xff]  ;;  %v3477_v29 = vld [vmem:[%s3393_s22 + $0xd8] sm:$0xff]  ;;  %v3616_v59 = vcombine.low (!%p2808_p9), %v3459_v23, %v3465_v25 }
  0x27   : > { %4494 = vst [vmem:[#allocation22_spill] sm:$0xff] %v3471_v27  ;;  %4495 = vst [vmem:[#allocation23_spill] sm:$0xff] %v3474_v28  ;;  %v3480_v30 = vld [vmem:[%s3393_s22 + $0xe0] sm:$0xff]  ;;  %v3483_v31 = vld [vmem:[%s3393_s22 + $0xe8] sm:$0xff]  ;;  %539 = vmatpush1.bf16.msra.mxu0 (!%p2808_p9), %v3545_v45  ;;  %v3611_v58 = vcombine.high (!%p2808_p9), %v3468_v26, %v3474_v28  ;;  %v3621_v60 = vcombine.high (!%p2808_p9), %v3471_v27, %v3477_v29  ;;  %v3626_v61 = vcombine.low (!%p2808_p9), %v3468_v26, %v3474_v28 }
  0x28   : > { %4496 = vst [vmem:[#allocation24_spill] sm:$0xff] %v3477_v29  ;;  %4497 = vst [vmem:[#allocation25_spill] sm:$0xff] %v3480_v30  ;;  %v3486_v32 = vld [vmem:[%s3393_s22 + $0xf0] sm:$0xff]  ;;  %v3489_v33 = vld [vmem:[%s3393_s22 + $0xf8] sm:$0xff]  ;;  %540 = vmatprep.subr.bf16.mxu0 (!%p2808_p9), %v3550_v46  ;;  %580 = vmatpush1.bf16.msra.mxu1 (!%p2808_p9), %v3555_v47  ;;  %v3636_v63 = vcombine.low (!%p2808_p9), %v3471_v27, %v3477_v29 }
  0x29   : > { %4498 = vst [vmem:[#allocation26_spill] sm:$0xff] %v3483_v31  ;;  %4499 = vst [vmem:[#allocation27_spill] sm:$0xff] %v3486_v32  ;;  %581 = vmatprep.subr.bf16.mxu1 (!%p2808_p9), %v3560_v48  ;;  %v3631_v62 = vcombine.high (!%p2808_p9), %v3480_v30, %v3486_v32  ;;  %v3641_v0 = vcombine.high (!%p2808_p9), %v3483_v31, %v3489_v33  ;;  %v3646_v1 = vcombine.low (!%p2808_p9), %v3480_v30, %v3486_v32  ;;  %v365_v44 = vld [vmem:[#allocation2] sm:$0xff] (!%p2808_p9)  ;;  %v368_v32 = vld [vmem:[%s3382_s7 + $0x8] sm:$0xff] (!%p2808_p9) }
  0x2a   : > { %4500 = vst [vmem:[#allocation28_spill] sm:$0xff] %v3489_v33  ;;  %v3652_v27 = vcombine.low (!%p2808_p9), %v3483_v31, %v3489_v33  ;;  %v373_v29 = vpack.c.bf16 (!%p2808_p9), %v365_v44, %v365_v44  ;;  %v4501_v31 = vmov (!%p2808_p9), 0   ;;  %v372_v18 = vunpack.c.h.bf16 (!%p2808_p9), %v368_v32 }
  0x2b   : > { %541 = vmatpush1.bf16.msra.mxu0 %v3566_v49  ;;  %v371_v16 = vunpack.c.l.bf16 %v368_v32 }
  0x2c   : > { %542 = vmatprep.subr.bf16.mxu0 %v3571_v50  ;;  %582 = vmatpush1.bf16.msra.mxu1 %v3576_v51 }
  0x2d   : > { %583 = vmatprep.subr.bf16.mxu1 %v3581_v52 }
  0x2f   : > { %543 = vmatpush1.bf16.msra.mxu0 %v3586_v53 }
  0x30   : > { %544 = vmatprep.subr.bf16.mxu0 %v3591_v54  ;;  %584 = vmatpush1.bf16.msra.mxu1 %v3596_v55 }
  0x31   : > { %585 = vmatprep.subr.bf16.mxu1 %v3601_v56 }
  0x33   : > { %545 = vmatpush1.bf16.msra.mxu0 %v3606_v57 }
  0x34   : > { %546 = vmatprep.subr.bf16.mxu0 %v3611_v58  ;;  %586 = vmatpush1.bf16.msra.mxu1 %v3616_v59 }
  0x35   : > { %587 = vmatprep.subr.bf16.mxu1 %v3621_v60 }
  0x37   : > { %547 = vmatpush1.bf16.msra.mxu0 %v3626_v61 }
  0x38   : > { %548 = vmatprep.subr.bf16.mxu0 %v3631_v62  ;;  %588 = vmatpush1.bf16.msra.mxu1 %v3636_v63 }
  0x39   : > { %589 = vmatprep.subr.bf16.mxu1 %v3641_v0 }
  0x3b   : > { %549 = vmatpush1.bf16.msra.mxu0 %v3646_v1 }
  0x3c   : > { %590 = vmatpush1.bf16.msra.mxu1 %v3652_v27  ;;  %653 = vmatprep.subr.bf16.mxu0 %v3497_v34 }
  0x3d   : > { %694 = vmatprep.subr.bf16.mxu1 %v3509_v37 }
  0x3e   : > { %567 = vmatmul.mubr.bf16.vlgmr.msra.gmra.mrb[0].mxu0 %v373_v29 }
  0x3f   : > { %608 = vmatmul.mubr.bf16.vlgmr.msra.gmra.mrb[0].mxu1 %v373_v29  ;;  %654 = vmatpush1.bf16.msra.mxu0 %v3501_v35  ;;  %v367_v29 = vld [vmem:[%s3382_s7] sm:$0xff] }
  0x40   : > { %695 = vmatpush1.bf16.msra.mxu1 %v3514_v38  ;;  %655 = vmatprep.subr.bf16.mxu0 %v3505_v36  ;;  %v369_v44 = vunpack.c.l.bf16 %v367_v29  ;;  %v370_v33 = vunpack.c.h.bf16 %v367_v29 }
  0x41   : > { %696 = vmatprep.subr.bf16.mxu1 %v3518_v39  ;;  %685 = vmatprep.mubr.bf16.mxu0 %v4501_v31 }
  0x42   : > { %726 = vmatprep.mubr.bf16.mxu1 %v4501_v31 }
  0x43   : > { %656 = vmatpush1.bf16.msra.mxu0 %v3523_v40 }
  0x44   : > { %697 = vmatpush1.bf16.msra.mxu1 %v3534_v42  ;;  %657 = vmatprep.subr.bf16.mxu0 %v3529_v41 }
  0x45   : > { %698 = vmatprep.subr.bf16.mxu1 %v3539_v43 }
  0x47   : > { %658 = vmatpush1.bf16.msra.mxu0 %v3545_v45 }
  0x48   : > { %699 = vmatpush1.bf16.msra.mxu1 %v3555_v47  ;;  %659 = vmatprep.subr.bf16.mxu0 %v3550_v46 }
  0x49   : > { %700 = vmatprep.subr.bf16.mxu1 %v3560_v48 }
  0x4b   : > { %660 = vmatpush1.bf16.msra.mxu0 %v3566_v49 }
  0x4c   : > { %701 = vmatpush1.bf16.msra.mxu1 %v3576_v51  ;;  %661 = vmatprep.subr.bf16.mxu0 %v3571_v50 }
  0x4d   : > { %702 = vmatprep.subr.bf16.mxu1 %v3581_v52 }
  0x4f   : > { %662 = vmatpush1.bf16.msra.mxu0 %v3586_v53 }
  0x50   : > { %703 = vmatpush1.bf16.msra.mxu1 %v3596_v55  ;;  %663 = vmatprep.subr.bf16.mxu0 %v3591_v54 }
  0x51   : > { %704 = vmatprep.subr.bf16.mxu1 %v3601_v56 }
  0x53   : > { %664 = vmatpush1.bf16.msra.mxu0 %v3606_v57 }
  0x54   : > { %705 = vmatpush1.bf16.msra.mxu1 %v3616_v59  ;;  %665 = vmatprep.subr.bf16.mxu0 %v3611_v58 }
  0x55   : > { %706 = vmatprep.subr.bf16.mxu1 %v3621_v60 }
  0x57   : > { %666 = vmatpush1.bf16.msra.mxu0 %v3626_v61 }
  0x58   : > { %707 = vmatpush1.bf16.msra.mxu1 %v3636_v63  ;;  %667 = vmatprep.subr.bf16.mxu0 %v3631_v62 }
  0x59   : > { %708 = vmatprep.subr.bf16.mxu1 %v3641_v0 }
  0x5b   : > { %668 = vmatpush1.bf16.msra.mxu0 %v3646_v1 }
  0x5c   : > { %709 = vmatpush1.bf16.msra.mxu1 %v3652_v27  ;;  %773 = vmatprep.subr.bf16.mxu0 %v3497_v34 }
  0x5d   : > { %814 = vmatprep.subr.bf16.mxu1 %v3509_v37 }
 0x111   : > { %v568_v30 = vpop.f32.mrb[0].mxu0 }
 0x112   : > { %v616_v26 = vadd.f32 %v568_v30, %v369_v44  ;;  %v570_v28 = vpop.f32.mrb[1].mxu0  ;;  %v609_v23 = vpop.f32.mrb[0].mxu1 }
 0x113   : > { %v617_v25 = vadd.f32 %v570_v28, %v370_v33  ;;  %v572_v22 = vpop.f32.mrb[2].mxu0  ;;  %v611_v24 = vpop.f32.mrb[1].mxu1  ;;  %v618_v29 = vadd.f32 %v609_v23, %v371_v16  ;;  %v2844_v23 = vld [vmem:[%s3382_s7 + $0x10] sm:$0xff] }
 0x114   : > { %v2841_v19 = vmul.f32 -1.442695, %v616_v26  ;;  %v573_v21 = vpop.f32.mrb[3].mxu0  ;;  %v613_v20 = vpop.f32.mrb[2].mxu1  ;;  %v619_v14 = vadd.f32 %v611_v24, %v372_v18  ;;  %v648_v26 = vunpack.c.l.bf16 %v2844_v23  ;;  %v649_v32 = vunpack.c.h.bf16 %v2844_v23 }
 0x115   : > { %v2842_v15 = vmul.f32 -1.442695, %v617_v25  ;;  %v614_v17 = vpop.f32.mrb[3].mxu1  ;;  %v366_v20 = vld [vmem:[#allocation3] sm:$0xff] }
 0x116   : > { %3012 = vpow2.f32 %v2841_v19  ;;  %v2843_v11 = vmul.f32 -1.442695, %v619_v14 }
 0x117   : > { %3014 = vpow2.f32 %v2842_v15 }
 0x118   : > { %3016 = vpow2.f32 %v2843_v11 }
 0x119   : > { %3018 = vtanh.f32 %v618_v29 }
 0x120   : > { %v3013_v13 = vpop.eup %3012 }
 0x121   : > { %v3015_v30 = vpop.eup %3014  ;;  %v623_v44 = vadd.f32 1.0, %v3013_v13 }
 0x122   : > { %v629_v28 = vadd.f32 1.0, %v3015_v30  ;;  %v3017_v21 = vpop.eup %3016 }
 0x123   : > { %3020 = vrcp.f32 %v623_v44  ;;  %v3019_v22 = vpop.eup %3018  ;;  %v636_v17 = vadd.f32 1.0, %v3017_v21  ;;  %v2845_v44 = vld [vmem:[%s3382_s7 + $0x18] sm:$0xff] }
 0x124   : > { %3022 = vrcp.f32 %v629_v28 }
 0x125   : > { %3024 = vrcp.f32 %v636_v17 }
 0x12d   : > { %v3021_v25 = vpop.eup %3020 }
 0x12e   : > { %v3023_v19 = vpop.eup %3022  ;;  %v640_v15 = vmul.f32 %v3021_v25, %v3019_v22 }
 0x12f   : > { %v639_v18 = vmul.f32 %v3023_v19, %v366_v20  ;;  %v3025_v11 = vpop.eup %3024 }
 0x131   : > { %v3695_v24 = vadd.f32 %v640_v15, %v639_v18 }
 0x133   : > { %3026 = vtanh.f32 %v3695_v24 }
 0x13d   : > { %v3027_v13 = vpop.eup %3026 }
 0x13e   : > { %v643_v14 = vmul.f32 %v3027_v13, %v3025_v11  ;;  %v651_v11 = vunpack.c.h.bf16 %v2845_v44 }
 0x140   : > { %644 = vst [vmem:[%s3492_s24] sm:$0xff] %v643_v14  ;;  %v652_v16 = vpack.c.bf16 %v643_v14, %v643_v14  ;;  %v650_v14 = vunpack.c.l.bf16 %v2845_v44 }
 0x142   : > { %686 = vmatmul.mubr.bf16.vlgmr.msra.gmra.mrb[4].mxu0 %v652_v16  ;;  %727 = vmatmul.mubr.bf16.vlgmr.msra.gmra.mrb[4].mxu1 %v652_v16 }
 0x143   : > { %774 = vmatpush1.bf16.msra.mxu0 %v3501_v35  ;;  %815 = vmatpush1.bf16.msra.mxu1 %v3514_v38 }
 0x144   : > { %775 = vmatprep.subr.bf16.mxu0 %v3505_v36  ;;  %816 = vmatprep.subr.bf16.mxu1 %v3518_v39 }
 0x145   : > { %805 = vmatprep.mubr.bf16.mxu0 %v4501_v31  ;;  %846 = vmatprep.mubr.bf16.mxu1 %v4501_v31 }
 0x147   : > { %776 = vmatpush1.bf16.msra.mxu0 %v3523_v40  ;;  %817 = vmatpush1.bf16.msra.mxu1 %v3534_v42 }
 0x148   : > { %777 = vmatprep.subr.bf16.mxu0 %v3529_v41  ;;  %818 = vmatprep.subr.bf16.mxu1 %v3539_v43 }
 0x14b   : > { %778 = vmatpush1.bf16.msra.mxu0 %v3545_v45  ;;  %819 = vmatpush1.bf16.msra.mxu1 %v3555_v47 }
 0x14c   : > { %779 = vmatprep.subr.bf16.mxu0 %v3550_v46  ;;  %820 = vmatprep.subr.bf16.mxu1 %v3560_v48 }
 0x14f   : > { %780 = vmatpush1.bf16.msra.mxu0 %v3566_v49  ;;  %821 = vmatpush1.bf16.msra.mxu1 %v3576_v51 }
 0x150   : > { %781 = vmatprep.subr.bf16.mxu0 %v3571_v50  ;;  %822 = vmatprep.subr.bf16.mxu1 %v3581_v52 }
 0x153   : > { %782 = vmatpush1.bf16.msra.mxu0 %v3586_v53  ;;  %823 = vmatpush1.bf16.msra.mxu1 %v3596_v55 }
 0x154   : > { %783 = vmatprep.subr.bf16.mxu0 %v3591_v54  ;;  %824 = vmatprep.subr.bf16.mxu1 %v3601_v56 }
 0x157   : > { %784 = vmatpush1.bf16.msra.mxu0 %v3606_v57  ;;  %825 = vmatpush1.bf16.msra.mxu1 %v3616_v59 }
 0x158   : > { %785 = vmatprep.subr.bf16.mxu0 %v3611_v58  ;;  %826 = vmatprep.subr.bf16.mxu1 %v3621_v60 }
 0x15b   : > { %786 = vmatpush1.bf16.msra.mxu0 %v3626_v61  ;;  %827 = vmatpush1.bf16.msra.mxu1 %v3636_v63 }
 0x15c   : > { %787 = vmatprep.subr.bf16.mxu0 %v3631_v62  ;;  %828 = vmatprep.subr.bf16.mxu1 %v3641_v0 }
 0x15f   : > { %788 = vmatpush1.bf16.msra.mxu0 %v3646_v1  ;;  %829 = vmatpush1.bf16.msra.mxu1 %v3652_v27 }
 0x160   : > { %893 = vmatprep.subr.bf16.mxu0 %v3497_v34  ;;  %934 = vmatprep.subr.bf16.mxu1 %v3509_v37 }
 0x215   : > { %v687_v33 = vpop.f32.mrb[4].mxu0  ;;  %v728_v29 = vpop.f32.mrb[4].mxu1 }
 0x216   : > { %v735_v30 = vadd.f32 %v687_v33, %v648_v26  ;;  %v689_v28 = vpop.f32.mrb[5].mxu0  ;;  %v730_v21 = vpop.f32.mrb[5].mxu1  ;;  %v737_v23 = vadd.f32 %v728_v29, %v650_v14  ;;  %v2851_v14 = vld [vmem:[%s3382_s7 + $0x28] sm:$0xff] }
 0x217   : > { %v736_v22 = vadd.f32 %v689_v28, %v649_v32  ;;  %v691_v20 = vpop.f32.mrb[6].mxu0  ;;  %v732_v25 = vpop.f32.mrb[6].mxu1  ;;  %v738_v13 = vadd.f32 %v730_v21, %v651_v11 }
 0x218   : > { %v2846_v17 = vmul.f32 -1.442695, %v735_v30  ;;  %v692_v19 = vpop.f32.mrb[7].mxu0  ;;  %v733_v15 = vpop.f32.mrb[7].mxu1 }
 0x219   : > { %v2847_v18 = vmul.f32 -1.442695, %v736_v22  ;;  %v2848_v16 = vmul.f32 -1.442695, %v738_v13 }
 0x21a   : > { %3028 = vpow2.f32 %v2846_v17 }
 0x21b   : > { %3030 = vpow2.f32 %v2847_v18 }
 0x21c   : > { %3032 = vpow2.f32 %v2848_v16 }
 0x21d   : > { %3034 = vtanh.f32 %v737_v23 }
 0x224   : > { %v3029_v10 = vpop.eup %3028 }
 0x225   : > { %v3031_v12 = vpop.eup %3030  ;;  %v742_v26 = vadd.f32 1.0, %v3029_v10 }
 0x226   : > { %v748_v33 = vadd.f32 1.0, %v3031_v12  ;;  %v3033_v32 = vpop.eup %3032 }
 0x227   : > { %3036 = vrcp.f32 %v742_v26  ;;  %v3035_v30 = vpop.eup %3034  ;;  %v755_v25 = vadd.f32 1.0, %v3033_v32 }
 0x228   : > { %3038 = vrcp.f32 %v748_v33 }
 0x229   : > { %3040 = vrcp.f32 %v755_v25  ;;  %v771_v25 = vunpack.c.h.bf16 %v2851_v14 }
 0x231   : > { %v3037_v28 = vpop.eup %3036 }
 0x232   : > { %v3039_v22 = vpop.eup %3038  ;;  %v759_v20 = vmul.f32 %v3037_v28, %v3035_v30 }
 0x233   : > { %v758_v21 = vmul.f32 %v3039_v22, %v3695_v24  ;;  %v3041_v10 = vpop.eup %3040  ;;  %v2850_v24 = vld [vmem:[%s3382_s7 + $0x20] sm:$0xff] }
 0x234   : > { %v768_v19 = vunpack.c.l.bf16 %v2850_v24  ;;  %v769_v15 = vunpack.c.h.bf16 %v2850_v24 }
 0x235   : > { %v3736_v44 = vadd.f32 %v759_v20, %v758_v21 }
 0x237   : > { %3042 = vtanh.f32 %v3736_v44 }
 0x241   : > { %v3043_v29 = vpop.eup %3042 }
 0x242   : > { %v762_v17 = vmul.f32 %v3043_v29, %v3041_v10  ;;  %v770_v10 = vunpack.c.l.bf16 %v2851_v14 }
 0x244   : > { %2849 = vst [vmem:[%s3492_s24 + $0x8] sm:$0xff] %v762_v17  ;;  %v772_v12 = vpack.c.bf16 %v762_v17, %v762_v17 }
 0x246   : > { %806 = vmatmul.mubr.bf16.vlgmr.msra.gmra.mrb[8].mxu0 %v772_v12  ;;  %847 = vmatmul.mubr.bf16.vlgmr.msra.gmra.mrb[8].mxu1 %v772_v12 }
 0x247   : > { %894 = vmatpush1.bf16.msra.mxu0 %v3501_v35  ;;  %935 = vmatpush1.bf16.msra.mxu1 %v3514_v38 }
 0x248   : > { %895 = vmatprep.subr.bf16.mxu0 %v3505_v36  ;;  %936 = vmatprep.subr.bf16.mxu1 %v3518_v39 }
 0x249   : > { %925 = vmatprep.mubr.bf16.mxu0 %v4501_v31  ;;  %966 = vmatprep.mubr.bf16.mxu1 %v4501_v31 }
 0x24b   : > { %896 = vmatpush1.bf16.msra.mxu0 %v3523_v40  ;;  %937 = vmatpush1.bf16.msra.mxu1 %v3534_v42 }
 0x24c   : > { %897 = vmatprep.subr.bf16.mxu0 %v3529_v41  ;;  %938 = vmatprep.subr.bf16.mxu1 %v3539_v43 }
 0x24f   : > { %898 = vmatpush1.bf16.msra.mxu0 %v3545_v45  ;;  %939 = vmatpush1.bf16.msra.mxu1 %v3555_v47 }
 0x250   : > { %899 = vmatprep.subr.bf16.mxu0 %v3550_v46  ;;  %940 = vmatprep.subr.bf16.mxu1 %v3560_v48 }
 0x253   : > { %900 = vmatpush1.bf16.msra.mxu0 %v3566_v49  ;;  %941 = vmatpush1.bf16.msra.mxu1 %v3576_v51 }
 0x254   : > { %901 = vmatprep.subr.bf16.mxu0 %v3571_v50  ;;  %942 = vmatprep.subr.bf16.mxu1 %v3581_v52 }
 0x257   : > { %902 = vmatpush1.bf16.msra.mxu0 %v3586_v53  ;;  %943 = vmatpush1.bf16.msra.mxu1 %v3596_v55 }
 0x258   : > { %903 = vmatprep.subr.bf16.mxu0 %v3591_v54  ;;  %944 = vmatprep.subr.bf16.mxu1 %v3601_v56 }
 0x25b   : > { %904 = vmatpush1.bf16.msra.mxu0 %v3606_v57  ;;  %945 = vmatpush1.bf16.msra.mxu1 %v3616_v59 }
 0x25c   : > { %905 = vmatprep.subr.bf16.mxu0 %v3611_v58  ;;  %946 = vmatprep.subr.bf16.mxu1 %v3621_v60 }
 0x25f   : > { %906 = vmatpush1.bf16.msra.mxu0 %v3626_v61  ;;  %947 = vmatpush1.bf16.msra.mxu1 %v3636_v63 }
 0x260   : > { %907 = vmatprep.subr.bf16.mxu0 %v3631_v62  ;;  %948 = vmatprep.subr.bf16.mxu1 %v3641_v0 }
 0x263   : > { %908 = vmatpush1.bf16.msra.mxu0 %v3646_v1  ;;  %949 = vmatpush1.bf16.msra.mxu1 %v3652_v27 }
 0x264   : > { %1013 = vmatprep.subr.bf16.mxu0 %v3497_v34  ;;  %1054 = vmatprep.subr.bf16.mxu1 %v3509_v37 }
 0x319   : > { %v807_v18 = vpop.f32.mrb[8].mxu0  ;;  %v848_v11 = vpop.f32.mrb[8].mxu1 }
 0x31a   : > { %v855_v13 = vadd.f32 %v807_v18, %v768_v19  ;;  %v809_v16 = vpop.f32.mrb[9].mxu0  ;;  %v850_v23 = vpop.f32.mrb[9].mxu1  ;;  %v857_v17 = vadd.f32 %v848_v11, %v770_v10 }
 0x31b   : > { %v856_v26 = vadd.f32 %v809_v16, %v769_v15  ;;  %v811_v33 = vpop.f32.mrb[10].mxu0  ;;  %v852_v32 = vpop.f32.mrb[10].mxu1  ;;  %v858_v21 = vadd.f32 %v850_v23, %v771_v25 }
 0x31c   : > { %v2852_v30 = vmul.f32 -1.442695, %v855_v13  ;;  %v812_v28 = vpop.f32.mrb[11].mxu0  ;;  %v853_v22 = vpop.f32.mrb[11].mxu1 }
 0x31d   : > { %v2853_v20 = vmul.f32 -1.442695, %v856_v26  ;;  %v2854_v29 = vmul.f32 -1.442695, %v858_v21 }
 0x31e   : > { %3044 = vpow2.f32 %v2852_v30 }
 0x31f   : > { %3046 = vpow2.f32 %v2853_v20 }
 0x320   : > { %3048 = vpow2.f32 %v2854_v29 }
 0x321   : > { %3050 = vtanh.f32 %v857_v17  ;;  %v2857_v17 = vld [vmem:[%s3382_s7 + $0x38] sm:$0xff] }
 0x328   : > { %v3045_v12 = vpop.eup %3044 }
 0x329   : > { %v3047_v24 = vpop.eup %3046  ;;  %v862_v19 = vadd.f32 1.0, %v3045_v12 }
 0x32a   : > { %v868_v18 = vadd.f32 1.0, %v3047_v24  ;;  %v3049_v15 = vpop.eup %3048 }
 0x32b   : > { %3052 = vrcp.f32 %v862_v19  ;;  %v3051_v13 = vpop.eup %3050  ;;  %v875_v32 = vadd.f32 1.0, %v3049_v15 }
 0x32c   : > { %3054 = vrcp.f32 %v868_v18 }
 0x32d   : > { %3056 = vrcp.f32 %v875_v32  ;;  %v891_v32 = vunpack.c.h.bf16 %v2857_v17 }
 0x335   : > { %v3053_v16 = vpop.eup %3052 }
 0x336   : > { %v3055_v26 = vpop.eup %3054  ;;  %v879_v33 = vmul.f32 %v3053_v16, %v3051_v13 }
 0x337   : > { %v878_v23 = vmul.f32 %v3055_v26, %v3736_v44  ;;  %v3057_v11 = vpop.eup %3056  ;;  %v2856_v44 = vld [vmem:[%s3382_s7 + $0x30] sm:$0xff] }
 0x338   : > { %v888_v20 = vunpack.c.l.bf16 %v2856_v44  ;;  %v889_v25 = vunpack.c.h.bf16 %v2856_v44 }
 0x339   : > { %v3777_v14 = vadd.f32 %v879_v33, %v878_v23 }
 0x33b   : > { %3058 = vtanh.f32 %v3777_v14 }
 0x345   : > { %v3059_v30 = vpop.eup %3058 }
 0x346   : > { %v882_v28 = vmul.f32 %v3059_v30, %v3057_v11  ;;  %v890_v11 = vunpack.c.l.bf16 %v2857_v17 }
 0x348   : > { %2855 = vst [vmem:[%s3492_s24 + $0x10] sm:$0xff] %v882_v28  ;;  %v892_v22 = vpack.c.bf16 %v882_v28, %v882_v28 }
 0x34a   : > { %926 = vmatmul.mubr.bf16.vlgmr.msra.gmra.mrb[12].mxu0 %v892_v22  ;;  %967 = vmatmul.mubr.bf16.vlgmr.msra.gmra.mrb[12].mxu1 %v892_v22 }
 0x34b   : > { %1014 = vmatpush1.bf16.msra.mxu0 %v3501_v35  ;;  %1055 = vmatpush1.bf16.msra.mxu1 %v3514_v38 }
 0x34c   : > { %1015 = vmatprep.subr.bf16.mxu0 %v3505_v36  ;;  %1056 = vmatprep.subr.bf16.mxu1 %v3518_v39 }
 0x34d   : > { %1045 = vmatprep.mubr.bf16.mxu0 %v4501_v31  ;;  %1086 = vmatprep.mubr.bf16.mxu1 %v4501_v31 }
 0x34f   : > { %1016 = vmatpush1.bf16.msra.mxu0 %v3523_v40  ;;  %1057 = vmatpush1.bf16.msra.mxu1 %v3534_v42 }
 0x350   : > { %1017 = vmatprep.subr.bf16.mxu0 %v3529_v41  ;;  %1058 = vmatprep.subr.bf16.mxu1 %v3539_v43 }
 0x353   : > { %1018 = vmatpush1.bf16.msra.mxu0 %v3545_v45  ;;  %1059 = vmatpush1.bf16.msra.mxu1 %v3555_v47 }
 0x354   : > { %1019 = vmatprep.subr.bf16.mxu0 %v3550_v46  ;;  %1060 = vmatprep.subr.bf16.mxu1 %v3560_v48 }
 0x357   : > { %1020 = vmatpush1.bf16.msra.mxu0 %v3566_v49  ;;  %1061 = vmatpush1.bf16.msra.mxu1 %v3576_v51 }
 0x358   : > { %1021 = vmatprep.subr.bf16.mxu0 %v3571_v50  ;;  %1062 = vmatprep.subr.bf16.mxu1 %v3581_v52 }
 0x35b   : > { %1022 = vmatpush1.bf16.msra.mxu0 %v3586_v53  ;;  %1063 = vmatpush1.bf16.msra.mxu1 %v3596_v55 }
 0x35c   : > { %1023 = vmatprep.subr.bf16.mxu0 %v3591_v54  ;;  %1064 = vmatprep.subr.bf16.mxu1 %v3601_v56 }
 0x35f   : > { %1024 = vmatpush1.bf16.msra.mxu0 %v3606_v57  ;;  %1065 = vmatpush1.bf16.msra.mxu1 %v3616_v59 }
 0x360   : > { %1025 = vmatprep.subr.bf16.mxu0 %v3611_v58  ;;  %1066 = vmatprep.subr.bf16.mxu1 %v3621_v60 }
 0x363   : > { %1026 = vmatpush1.bf16.msra.mxu0 %v3626_v61  ;;  %1067 = vmatpush1.bf16.msra.mxu1 %v3636_v63 }
 0x364   : > { %1027 = vmatprep.subr.bf16.mxu0 %v3631_v62  ;;  %1068 = vmatprep.subr.bf16.mxu1 %v3641_v0 }
 0x367   : > { %1028 = vmatpush1.bf16.msra.mxu0 %v3646_v1  ;;  %1069 = vmatpush1.bf16.msra.mxu1 %v3652_v27 }
 0x368   : > { %1133 = vmatprep.subr.bf16.mxu0 %v3497_v34  ;;  %1174 = vmatprep.subr.bf16.mxu1 %v3509_v37 }
 0x41d   : > { %v927_v21 = vpop.f32.mrb[12].mxu0  ;;  %v968_v10 = vpop.f32.mrb[12].mxu1 }
 0x41e   : > { %v975_v29 = vadd.f32 %v927_v21, %v888_v20  ;;  %v929_v12 = vpop.f32.mrb[13].mxu0  ;;  %v970_v24 = vpop.f32.mrb[13].mxu1  ;;  %v977_v28 = vadd.f32 %v968_v10, %v890_v11 }
 0x41f   : > { %v976_v19 = vadd.f32 %v929_v12, %v889_v25  ;;  %v931_v18 = vpop.f32.mrb[14].mxu0  ;;  %v972_v15 = vpop.f32.mrb[14].mxu1  ;;  %v978_v23 = vadd.f32 %v970_v24, %v891_v32 }
 0x420   : > { %v2858_v13 = vmul.f32 -1.442695, %v975_v29  ;;  %v932_v16 = vpop.f32.mrb[15].mxu0  ;;  %v973_v26 = vpop.f32.mrb[15].mxu1 }
 0x421   : > { %v2859_v33 = vmul.f32 -1.442695, %v976_v19  ;;  %v2860_v30 = vmul.f32 -1.442695, %v978_v23 }
 0x422   : > { %3060 = vpow2.f32 %v2858_v13 }
 0x423   : > { %3062 = vpow2.f32 %v2859_v33 }
 0x424   : > { %3064 = vpow2.f32 %v2860_v30 }
 0x425   : > { %3066 = vtanh.f32 %v977_v28  ;;  %v2863_v28 = vld [vmem:[%s3382_s7 + $0x48] sm:$0xff] }
 0x42c   : > { %v3061_v22 = vpop.eup %3060 }
 0x42d   : > { %v3063_v44 = vpop.eup %3062  ;;  %v982_v20 = vadd.f32 1.0, %v3061_v22 }
 0x42e   : > { %v988_v21 = vadd.f32 1.0, %v3063_v44  ;;  %v3065_v25 = vpop.eup %3064 }
 0x42f   : > { %3068 = vrcp.f32 %v982_v20  ;;  %v3067_v29 = vpop.eup %3066  ;;  %v995_v15 = vadd.f32 1.0, %v3065_v25 }
 0x430   : > { %3070 = vrcp.f32 %v988_v21 }
 0x431   : > { %3072 = vrcp.f32 %v995_v15  ;;  %v1011_v15 = vunpack.c.h.bf16 %v2863_v28 }
 0x439   : > { %v3069_v12 = vpop.eup %3068 }
 0x43a   : > { %v3071_v19 = vpop.eup %3070  ;;  %v999_v18 = vmul.f32 %v3069_v12, %v3067_v29 }
 0x43b   : > { %v998_v24 = vmul.f32 %v3071_v19, %v3777_v14  ;;  %v3073_v10 = vpop.eup %3072  ;;  %v2862_v14 = vld [vmem:[%s3382_s7 + $0x40] sm:$0xff] }
 0x43c   : > { %v1008_v33 = vunpack.c.l.bf16 %v2862_v14  ;;  %v1009_v32 = vunpack.c.h.bf16 %v2862_v14 }
 0x43d   : > { %v3818_v17 = vadd.f32 %v999_v18, %v998_v24 }
 0x43f   : > { %3074 = vtanh.f32 %v3818_v17 }
 0x449   : > { %v3075_v13 = vpop.eup %3074 }
 0x44a   : > { %v1002_v16 = vmul.f32 %v3075_v13, %v3073_v10  ;;  %v1010_v10 = vunpack.c.l.bf16 %v2863_v28 }
 0x44c   : > { %2861 = vst [vmem:[%s3492_s24 + $0x18] sm:$0xff] %v1002_v16  ;;  %v1012_v26 = vpack.c.bf16 %v1002_v16, %v1002_v16 }
 0x44e   : > { %1046 = vmatmul.mubr.bf16.vlgmr.msra.gmra.mrb[16].mxu0 %v1012_v26  ;;  %1087 = vmatmul.mubr.bf16.vlgmr.msra.gmra.mrb[16].mxu1 %v1012_v26 }
 0x44f   : > { %1134 = vmatpush1.bf16.msra.mxu0 %v3501_v35  ;;  %1175 = vmatpush1.bf16.msra.mxu1 %v3514_v38 }
 0x450   : > { %1135 = vmatprep.subr.bf16.mxu0 %v3505_v36  ;;  %1176 = vmatprep.subr.bf16.mxu1 %v3518_v39 }
 0x451   : > { %1165 = vmatprep.mubr.bf16.mxu0 %v4501_v31  ;;  %1206 = vmatprep.mubr.bf16.mxu1 %v4501_v31 }
 0x453   : > { %1136 = vmatpush1.bf16.msra.mxu0 %v3523_v40  ;;  %1177 = vmatpush1.bf16.msra.mxu1 %v3534_v42 }
 0x454   : > { %1137 = vmatprep.subr.bf16.mxu0 %v3529_v41  ;;  %1178 = vmatprep.subr.bf16.mxu1 %v3539_v43 }
 0x457   : > { %1138 = vmatpush1.bf16.msra.mxu0 %v3545_v45  ;;  %1179 = vmatpush1.bf16.msra.mxu1 %v3555_v47 }
 0x458   : > { %1139 = vmatprep.subr.bf16.mxu0 %v3550_v46  ;;  %1180 = vmatprep.subr.bf16.mxu1 %v3560_v48 }
 0x45b   : > { %1140 = vmatpush1.bf16.msra.mxu0 %v3566_v49  ;;  %1181 = vmatpush1.bf16.msra.mxu1 %v3576_v51 }
 0x45c   : > { %1141 = vmatprep.subr.bf16.mxu0 %v3571_v50  ;;  %1182 = vmatprep.subr.bf16.mxu1 %v3581_v52 }
 0x45f   : > { %1142 = vmatpush1.bf16.msra.mxu0 %v3586_v53  ;;  %1183 = vmatpush1.bf16.msra.mxu1 %v3596_v55 }
 0x460   : > { %1143 = vmatprep.subr.bf16.mxu0 %v3591_v54  ;;  %1184 = vmatprep.subr.bf16.mxu1 %v3601_v56 }
 0x463   : > { %1144 = vmatpush1.bf16.msra.mxu0 %v3606_v57  ;;  %1185 = vmatpush1.bf16.msra.mxu1 %v3616_v59 }
 0x464   : > { %1145 = vmatprep.subr.bf16.mxu0 %v3611_v58  ;;  %1186 = vmatprep.subr.bf16.mxu1 %v3621_v60 }
 0x467   : > { %1146 = vmatpush1.bf16.msra.mxu0 %v3626_v61  ;;  %1187 = vmatpush1.bf16.msra.mxu1 %v3636_v63 }
 0x468   : > { %1147 = vmatprep.subr.bf16.mxu0 %v3631_v62  ;;  %1188 = vmatprep.subr.bf16.mxu1 %v3641_v0 }
 0x46b   : > { %1148 = vmatpush1.bf16.msra.mxu0 %v3646_v1  ;;  %1189 = vmatpush1.bf16.msra.mxu1 %v3652_v27 }
 0x46c   : > { %1253 = vmatprep.subr.bf16.mxu0 %v3497_v34  ;;  %1294 = vmatprep.subr.bf16.mxu1 %v3509_v37 }
 0x521   : > { %v1047_v23 = vpop.f32.mrb[16].mxu0  ;;  %v1088_v11 = vpop.f32.mrb[16].mxu1 }
 0x522   : > { %v1095_v30 = vadd.f32 %v1047_v23, %v1008_v33  ;;  %v1049_v22 = vpop.f32.mrb[17].mxu0  ;;  %v1090_v44 = vpop.f32.mrb[17].mxu1  ;;  %v1097_v16 = vadd.f32 %v1088_v11, %v1010_v10 }
 0x523   : > { %v1096_v20 = vadd.f32 %v1049_v22, %v1009_v32  ;;  %v1051_v21 = vpop.f32.mrb[18].mxu0  ;;  %v1092_v25 = vpop.f32.mrb[18].mxu1  ;;  %v1098_v24 = vadd.f32 %v1090_v44, %v1011_v15 }
 0x524   : > { %v2864_v29 = vmul.f32 -1.442695, %v1095_v30  ;;  %v1052_v12 = vpop.f32.mrb[19].mxu0  ;;  %v1093_v19 = vpop.f32.mrb[19].mxu1 }
 0x525   : > { %v2865_v18 = vmul.f32 -1.442695, %v1096_v20  ;;  %v2866_v13 = vmul.f32 -1.442695, %v1098_v24 }
 0x526   : > { %3076 = vpow2.f32 %v2864_v29 }
 0x527   : > { %3078 = vpow2.f32 %v2865_v18 }
 0x528   : > { %3080 = vpow2.f32 %v2866_v13 }
 0x529   : > { %3082 = vtanh.f32 %v1097_v16  ;;  %v2869_v16 = vld [vmem:[%s3382_s7 + $0x58] sm:$0xff] }
 0x530   : > { %v3077_v26 = vpop.eup %3076 }
 0x531   : > { %v3079_v14 = vpop.eup %3078  ;;  %v1102_v33 = vadd.f32 1.0, %v3077_v26 }
 0x532   : > { %v1108_v23 = vadd.f32 1.0, %v3079_v14  ;;  %v3081_v32 = vpop.eup %3080 }
 0x533   : > { %3084 = vrcp.f32 %v1102_v33  ;;  %v3083_v30 = vpop.eup %3082  ;;  %v1115_v25 = vadd.f32 1.0, %v3081_v32 }
 0x534   : > { %3086 = vrcp.f32 %v1108_v23 }
 0x535   : > { %3088 = vrcp.f32 %v1115_v25  ;;  %v1131_v25 = vunpack.c.h.bf16 %v2869_v16 }
 0x53d   : > { %v3085_v22 = vpop.eup %3084 }
 0x53e   : > { %v3087_v20 = vpop.eup %3086  ;;  %v1119_v21 = vmul.f32 %v3085_v22, %v3083_v30 }
 0x53f   : > { %v1118_v44 = vmul.f32 %v3087_v20, %v3818_v17  ;;  %v3089_v11 = vpop.eup %3088  ;;  %v2868_v17 = vld [vmem:[%s3382_s7 + $0x50] sm:$0xff] }
 0x540   : > { %v1128_v18 = vunpack.c.l.bf16 %v2868_v17  ;;  %v1129_v15 = vunpack.c.h.bf16 %v2868_v17 }
 0x541   : > { %v3859_v28 = vadd.f32 %v1119_v21, %v1118_v44 }
 0x543   : > { %3090 = vtanh.f32 %v3859_v28 }
 0x54d   : > { %v3091_v29 = vpop.eup %3090 }
 0x54e   : > { %v1122_v12 = vmul.f32 %v3091_v29, %v3089_v11 }
 0x550   : > { %2867 = vst [vmem:[%s3492_s24 + $0x20] sm:$0xff] %v1122_v12  ;;  %v1132_v19 = vpack.c.bf16 %v1122_v12, %v1122_v12 }
 0x552   : > { %1166 = vmatmul.mubr.bf16.vlgmr.msra.gmra.mrb[20].mxu0 %v1132_v19  ;;  %1207 = vmatmul.mubr.bf16.vlgmr.msra.gmra.mrb[20].mxu1 %v1132_v19 }
 0x553   : > { %1254 = vmatpush1.bf16.msra.mxu0 %v3501_v35  ;;  %1295 = vmatpush1.bf16.msra.mxu1 %v3514_v38 }
 0x554   : > { %1255 = vmatprep.subr.bf16.mxu0 %v3505_v36  ;;  %1296 = vmatprep.subr.bf16.mxu1 %v3518_v39 }
 0x555   : > { %1285 = vmatprep.mubr.bf16.mxu0 %v4501_v31  ;;  %1326 = vmatprep.mubr.bf16.mxu1 %v4501_v31 }
 0x557   : > { %1256 = vmatpush1.bf16.msra.mxu0 %v3523_v40  ;;  %1297 = vmatpush1.bf16.msra.mxu1 %v3534_v42 }
 0x558   : > { %1257 = vmatprep.subr.bf16.mxu0 %v3529_v41  ;;  %1298 = vmatprep.subr.bf16.mxu1 %v3539_v43 }
 0x55b   : > { %1258 = vmatpush1.bf16.msra.mxu0 %v3545_v45  ;;  %1299 = vmatpush1.bf16.msra.mxu1 %v3555_v47 }
 0x55c   : > { %1259 = vmatprep.subr.bf16.mxu0 %v3550_v46  ;;  %1300 = vmatprep.subr.bf16.mxu1 %v3560_v48 }
 0x55f   : > { %1260 = vmatpush1.bf16.msra.mxu0 %v3566_v49  ;;  %1301 = vmatpush1.bf16.msra.mxu1 %v3576_v51 }
 0x560   : > { %1261 = vmatprep.subr.bf16.mxu0 %v3571_v50  ;;  %1302 = vmatprep.subr.bf16.mxu1 %v3581_v52 }
 0x563   : > { %1262 = vmatpush1.bf16.msra.mxu0 %v3586_v53  ;;  %1303 = vmatpush1.bf16.msra.mxu1 %v3596_v55 }
 0x564   : > { %1263 = vmatprep.subr.bf16.mxu0 %v3591_v54  ;;  %1304 = vmatprep.subr.bf16.mxu1 %v3601_v56 }
 0x567   : > { %1264 = vmatpush1.bf16.msra.mxu0 %v3606_v57  ;;  %1305 = vmatpush1.bf16.msra.mxu1 %v3616_v59 }
 0x568   : > { %1265 = vmatprep.subr.bf16.mxu0 %v3611_v58  ;;  %1306 = vmatprep.subr.bf16.mxu1 %v3621_v60 }
 0x56b   : > { %1266 = vmatpush1.bf16.msra.mxu0 %v3626_v61  ;;  %1307 = vmatpush1.bf16.msra.mxu1 %v3636_v63 }
 0x56c   : > { %1267 = vmatprep.subr.bf16.mxu0 %v3631_v62  ;;  %1308 = vmatprep.subr.bf16.mxu1 %v3641_v0 }
 0x56f   : > { %1268 = vmatpush1.bf16.msra.mxu0 %v3646_v1  ;;  %1309 = vmatpush1.bf16.msra.mxu1 %v3652_v27 }
 0x570   : > { %1373 = vmatprep.subr.bf16.mxu0 %v3497_v34  ;;  %1414 = vmatprep.subr.bf16.mxu1 %v3509_v37  ;;  %v1130_v37 = vunpack.c.l.bf16 %v2869_v16 }
 0x625   : > { %v1167_v24 = vpop.f32.mrb[20].mxu0  ;;  %v1208_v10 = vpop.f32.mrb[20].mxu1 }
 0x626   : > { %v1215_v13 = vadd.f32 %v1167_v24, %v1128_v18  ;;  %v1169_v26 = vpop.f32.mrb[21].mxu0  ;;  %v1210_v14 = vpop.f32.mrb[21].mxu1  ;;  %v1217_v11 = vadd.f32 %v1208_v10, %v1130_v37  ;;  %v2880_v37 = vld [vmem:[%s3382_s7 + $0x70] sm:$0xff] }
 0x627   : > { %v1216_v33 = vadd.f32 %v1169_v26, %v1129_v15  ;;  %v1171_v23 = vpop.f32.mrb[22].mxu0  ;;  %v1212_v32 = vpop.f32.mrb[22].mxu1  ;;  %v1218_v34 = vadd.f32 %v1210_v14, %v1131_v25 }
 0x628   : > { %v2870_v30 = vmul.f32 -1.442695, %v1215_v13  ;;  %v1172_v22 = vpop.f32.mrb[23].mxu0  ;;  %v1213_v20 = vpop.f32.mrb[23].mxu1 }
 0x629   : > { %v2871_v21 = vmul.f32 -1.442695, %v1216_v33  ;;  %v2872_v44 = vmul.f32 -1.442695, %v1218_v34 }
 0x62a   : > { %3092 = vpow2.f32 %v2870_v30 }
 0x62b   : > { %3094 = vpow2.f32 %v2871_v21 }
 0x62c   : > { %3096 = vpow2.f32 %v2872_v44  ;;  %v1368_v44 = vunpack.c.l.bf16 %v2880_v37 }
 0x62d   : > { %3098 = vtanh.f32 %v1217_v11  ;;  %v1369_v11 = vunpack.c.h.bf16 %v2880_v37 }
 0x634   : > { %v3093_v29 = vpop.eup %3092 }
 0x635   : > { %v3095_v12 = vpop.eup %3094  ;;  %v1222_v19 = vadd.f32 1.0, %v3093_v29 }
 0x636   : > { %v1228_v17 = vadd.f32 1.0, %v3095_v12  ;;  %v3097_v18 = vpop.eup %3096 }
 0x637   : > { %3100 = vrcp.f32 %v1222_v19  ;;  %v3099_v15 = vpop.eup %3098  ;;  %v1235_v33 = vadd.f32 1.0, %v3097_v18 }
 0x638   : > { %3102 = vrcp.f32 %v1228_v17  ;;  %v2881_v17 = vld [vmem:[%s3382_s7 + $0x78] sm:$0xff] }
 0x639   : > { %3104 = vrcp.f32 %v1235_v33 }
 0x641   : > { %v3101_v24 = vpop.eup %3100 }
 0x642   : > { %v3103_v13 = vpop.eup %3102  ;;  %v1239_v26 = vmul.f32 %v3101_v24, %v3099_v15 }
 0x643   : > { %v1238_v14 = vmul.f32 %v3103_v13, %v3859_v28  ;;  %v3105_v10 = vpop.eup %3104 }
 0x645   : > { %v3900_v16 = vadd.f32 %v1239_v26, %v1238_v14 }
 0x647   : > { %3106 = vtanh.f32 %v3900_v16 }
 0x651   : > { %v3107_v23 = vpop.eup %3106 }
 0x652   : > { %v1242_v32 = vmul.f32 %v3107_v23, %v3105_v10  ;;  %v1371_v23 = vunpack.c.h.bf16 %v2881_v17 }
 0x654   : > { %2873 = vst [vmem:[%s3492_s24 + $0x28] sm:$0xff] %v1242_v32  ;;  %v1252_v30 = vpack.c.bf16 %v1242_v32, %v1242_v32 }
 0x656   : > { %1286 = vmatmul.mubr.bf16.vlgmr.msra.gmra.mrb[24].mxu0 %v1252_v30  ;;  %1327 = vmatmul.mubr.bf16.vlgmr.msra.gmra.mrb[24].mxu1 %v1252_v30  ;;  %v1370_v30 = vunpack.c.l.bf16 %v2881_v17 }
 0x657   : > { %1374 = vmatpush1.bf16.msra.mxu0 %v3501_v35  ;;  %1415 = vmatpush1.bf16.msra.mxu1 %v3514_v38 }
 0x658   : > { %1375 = vmatprep.subr.bf16.mxu0 %v3505_v36  ;;  %1416 = vmatprep.subr.bf16.mxu1 %v3518_v39 }
 0x659   : > { %1405 = vmatprep.mubr.bf16.mxu0 %v4501_v31  ;;  %1446 = vmatprep.mubr.bf16.mxu1 %v4501_v31  ;;  %v2874_v31 = vld [vmem:[%s3382_s7 + $0x60] sm:$0xff] }
 0x65a   : > { %v1248_v35 = vunpack.c.l.bf16 %v2874_v31  ;;  %v1249_v36 = vunpack.c.h.bf16 %v2874_v31 }
 0x65b   : > { %1376 = vmatpush1.bf16.msra.mxu0 %v3523_v40  ;;  %1417 = vmatpush1.bf16.msra.mxu1 %v3534_v42 }
 0x65c   : > { %1377 = vmatprep.subr.bf16.mxu0 %v3529_v41  ;;  %1418 = vmatprep.subr.bf16.mxu1 %v3539_v43  ;;  %v2875_v41 = vld [vmem:[%s3382_s7 + $0x68] sm:$0xff] }
 0x65f   : > { %1378 = vmatpush1.bf16.msra.mxu0 %v3545_v45  ;;  %1419 = vmatpush1.bf16.msra.mxu1 %v3555_v47 }
 0x660   : > { %1379 = vmatprep.subr.bf16.mxu0 %v3550_v46  ;;  %1420 = vmatprep.subr.bf16.mxu1 %v3560_v48 }
 0x663   : > { %1380 = vmatpush1.bf16.msra.mxu0 %v3566_v49  ;;  %1421 = vmatpush1.bf16.msra.mxu1 %v3576_v51 }
 0x664   : > { %1381 = vmatprep.subr.bf16.mxu0 %v3571_v50  ;;  %1422 = vmatprep.subr.bf16.mxu1 %v3581_v52  ;;  %v1251_v52 = vunpack.c.h.bf16 %v2875_v41 }
 0x667   : > { %1382 = vmatpush1.bf16.msra.mxu0 %v3586_v53  ;;  %1423 = vmatpush1.bf16.msra.mxu1 %v3596_v55  ;;  %v1250_v53 = vunpack.c.l.bf16 %v2875_v41 }
 0x668   : > { %1383 = vmatprep.subr.bf16.mxu0 %v3591_v54  ;;  %1424 = vmatprep.subr.bf16.mxu1 %v3601_v56 }
 0x66b   : > { %1384 = vmatpush1.bf16.msra.mxu0 %v3606_v57  ;;  %1425 = vmatpush1.bf16.msra.mxu1 %v3616_v59 }
 0x66c   : > { %1385 = vmatprep.subr.bf16.mxu0 %v3611_v58  ;;  %1426 = vmatprep.subr.bf16.mxu1 %v3621_v60 }
 0x66f   : > { %1386 = vmatpush1.bf16.msra.mxu0 %v3626_v61  ;;  %1427 = vmatpush1.bf16.msra.mxu1 %v3636_v63 }
 0x670   : > { %1387 = vmatprep.subr.bf16.mxu0 %v3631_v62  ;;  %1428 = vmatprep.subr.bf16.mxu1 %v3641_v0 }
 0x673   : > { %1388 = vmatpush1.bf16.msra.mxu0 %v3646_v1  ;;  %1429 = vmatpush1.bf16.msra.mxu1 %v3652_v27 }
 0x729   : > { %v1287_v38 = vpop.f32.mrb[24].mxu0  ;;  %v1328_v39 = vpop.f32.mrb[24].mxu1 }
 0x72a   : > { %v1335_v40 = vadd.f32 %v1287_v38, %v1248_v35  ;;  %v1289_v42 = vpop.f32.mrb[25].mxu0  ;;  %v1330_v43 = vpop.f32.mrb[25].mxu1  ;;  %v1337_v55 = vadd.f32 %v1328_v39, %v1250_v53 }
 0x72b   : > { %v1336_v45 = vadd.f32 %v1289_v42, %v1249_v36  ;;  %v1291_v46 = vpop.f32.mrb[26].mxu0  ;;  %v1332_v47 = vpop.f32.mrb[26].mxu1  ;;  %v1338_v27 = vadd.f32 %v1330_v43, %v1251_v52 }
 0x72c   : > { %v2876_v48 = vmul.f32 -1.442695, %v1335_v40  ;;  %v1292_v49 = vpop.f32.mrb[27].mxu0  ;;  %v1333_v50 = vpop.f32.mrb[27].mxu1 }
 0x72d   : > { %v2877_v51 = vmul.f32 -1.442695, %v1336_v45  ;;  %v2878_v54 = vmul.f32 -1.442695, %v1338_v27 }
 0x72e   : > { %3108 = vpow2.f32 %v2876_v48 }
 0x72f   : > { %3110 = vpow2.f32 %v2877_v51 }
 0x730   : > { %3112 = vpow2.f32 %v2878_v54 }
 0x731   : > { %3114 = vtanh.f32 %v1337_v55 }
 0x738   : > { %v3109_v56 = vpop.eup %3108 }
 0x739   : > { %v3111_v57 = vpop.eup %3110  ;;  %v1342_v58 = vadd.f32 1.0, %v3109_v56 }
 0x73a   : > { %v1348_v59 = vadd.f32 1.0, %v3111_v57  ;;  %v3113_v60 = vpop.eup %3112 }
 0x73b   : > { %3116 = vrcp.f32 %v1342_v58  ;;  %v3115_v61 = vpop.eup %3114  ;;  %v1355_v1 = vadd.f32 1.0, %v3113_v60 }
 0x73c   : > { %3118 = vrcp.f32 %v1348_v59 }
 0x73d   : > { %3120 = vrcp.f32 %v1355_v1 }
 0x745   : > { %v3117_v62 = vpop.eup %3116 }
 0x746   : > { %v3119_v63 = vpop.eup %3118  ;;  %v1359_v0 = vmul.f32 %v3117_v62, %v3115_v61 }
 0x747   : > { %v1358_v28 = vmul.f32 %v3119_v63, %v3900_v16  ;;  %v3121_v20 = vpop.eup %3120 }
 0x749   : > { %v1360_v22 = vadd.f32 %v1359_v0, %v1358_v28 }
 0x74b   : > { %3122 = vtanh.f32 %v1360_v22 }
 0x755   : > { %v3123_v21 = vpop.eup %3122 }
 0x756   : > { %v1362_v25 = vmul.f32 %v3123_v21, %v3121_v20 }
 0x758   : > { %2879 = vst [vmem:[%s3492_s24 + $0x30] sm:$0xff] %v1362_v25  ;;  %v1372_v34 = vpack.c.bf16 %v1362_v25, %v1362_v25 }
 0x75a   : > { %1406 = vmatmul.mubr.bf16.vlgmr.msra.gmra.mrb[28].mxu0 %v1372_v34  ;;  %1447 = vmatmul.mubr.bf16.vlgmr.msra.gmra.mrb[28].mxu1 %v1372_v34 }
 0x82d   : > { %v1407_v29 = vpop.f32.mrb[28].mxu0  ;;  %v1448_v12 = vpop.f32.mrb[28].mxu1 }
 0x82e   : > { %v1455_v19 = vadd.f32 %v1407_v29, %v1368_v44  ;;  %v1409_v18 = vpop.f32.mrb[29].mxu0  ;;  %v1450_v15 = vpop.f32.mrb[29].mxu1  ;;  %v1457_v35 = vadd.f32 %v1448_v12, %v1370_v30 }
 0x82f   : > { %v1456_v24 = vadd.f32 %v1409_v18, %v1369_v11  ;;  %v1411_v13 = vpop.f32.mrb[30].mxu0  ;;  %v1452_v26 = vpop.f32.mrb[30].mxu1  ;;  %v1458_v32 = vadd.f32 %v1450_v15, %v1371_v23 }
 0x830   : > { %v2882_v33 = vmul.f32 -1.442695, %v1455_v19  ;;  %v1412_v14 = vpop.f32.mrb[31].mxu0  ;;  %v1453_v16 = vpop.f32.mrb[31].mxu1 }
 0x831   : > { %v2883_v10 = vmul.f32 -1.442695, %v1456_v24  ;;  %v2884_v31 = vmul.f32 -1.442695, %v1458_v32 }
 0x832   : > { %3124 = vpow2.f32 %v2882_v33 }
 0x833   : > { %3126 = vpow2.f32 %v2883_v10 }
 0x834   : > { %3128 = vpow2.f32 %v2884_v31 }
 0x835   : > { %3130 = vtanh.f32 %v1457_v35 }
 0x83c   : > { %v3125_v36 = vpop.eup %3124 }
 0x83d   : > { %v3127_v38 = vpop.eup %3126  ;;  %v1462_v39 = vadd.f32 1.0, %v3125_v36 }
 0x83e   : > { %v1468_v40 = vadd.f32 1.0, %v3127_v38  ;;  %v3129_v41 = vpop.eup %3128 }
 0x83f   : > { %3132 = vrcp.f32 %v1462_v39  ;;  %v3131_v42 = vpop.eup %3130  ;;  %v1475_v47 = vadd.f32 1.0, %v3129_v41 }
 0x840   : > { %3134 = vrcp.f32 %v1468_v40 }
 0x841   : > { %3136 = vrcp.f32 %v1475_v47 }
 0x849   : > { %v3133_v43 = vpop.eup %3132 }
 0x84a   : > { %v3135_v45 = vpop.eup %3134  ;;  %v1479_v46 = vmul.f32 %v3133_v43, %v3131_v42 }
 0x84b   : > { %v1478_v48 = vmul.f32 %v3135_v45, %v1360_v22  ;;  %v3137_v50 = vpop.eup %3136 }
 0x84d   : > { %v1480_v49 = vadd.f32 %v1479_v46, %v1478_v48 }
 0x84f   : > { %3138 = vtanh.f32 %v1480_v49  ;;  %1486 = vst [vmem:[#allocation3] sm:$0xff] %v1480_v49 }
 0x859   : > { %v3139_v51 = vpop.eup %3138 }
 0x85a   : > { %v1482_v52 = vmul.f32 %v3139_v51, %v3137_v50 }
 0x85c   : > { %2885 = vst [vmem:[%s3492_s24 + $0x38] sm:$0xff] %v1482_v52  ;;  %1485 = vst [vmem:[#allocation2] sm:$0xff] %v1482_v52 }
 0x85d PF: > { %p2886_p10 = scmp.ne.s32.totalorder %s3298_s17, 1 }
 0x85e   : > { %v3946_v27 = vcombine.high (!%p2886_p10), %v3396_v2, %v3402_v4  ;;  %v3950_v53 = vcombine.low (!%p2886_p10), %v3396_v2, %v3402_v4  ;;  %v3954_v54 = vcombine.high (!%p2886_p10), %v3408_v6, %v3414_v8  ;;  %v3958_v55 = vcombine.high (!%p2886_p10), %v3399_v3, %v3405_v5  ;;  %v4502_v4 = vld [vmem:[#allocation7_spill] sm:$0xff] (!%p2886_p10)  ;;  %v4503_v58 = vld [vmem:[#allocation5_spill] sm:$0xff] (!%p2886_p10)  ;;  %v4505_v60 = vld [vmem:[#allocation6_spill] sm:$0xff] (!%p2886_p10) }
 0x85f   : > { %1490 = sbr.rel (%p2886_p10) target bundleno = 4255 (0x109f), region = 48  ;;  %v3963_v56 = vcombine.low (!%p2886_p10), %v3399_v3, %v3405_v5  ;;  %v3967_v57 = vcombine.high (!%p2886_p10), %v3411_v7, %v3417_v9  ;;  %v3972_v2 = vcombine.low (!%p2886_p10), %v3408_v6, %v3414_v8  ;;  %v3978_v59 = vcombine.high (!%p2886_p10), %v4503_v58, %v4502_v4  ;;  %v4504_v5 = vld [vmem:[#allocation8_spill] sm:$0xff] (!%p2886_p10)  ;;  %v4506_v62 = vld [vmem:[#allocation11_spill] sm:$0xff] (!%p2886_p10)  ;;  %v4509_v1 = vld [vmem:[#allocation10_spill] sm:$0xff] (!%p2886_p10) }
 0x860   : > { %1661 = vmatprep.subr.bf16.mxu0 (!%p2886_p10), %v3946_v27  ;;  %1702 = vmatprep.subr.bf16.mxu1 (!%p2886_p10), %v3958_v55  ;;  %v3983_v3 = vcombine.low (!%p2886_p10), %v3411_v7, %v3417_v9  ;;  %v3988_v6 = vcombine.high (!%p2886_p10), %v4505_v60, %v4504_v5  ;;  %v3309_v8 = vmov (!%p2886_p10), 0   ;;  %v3994_v61 = vcombine.low (!%p2886_p10), %v4503_v58, %v4502_v4  ;;  %v4507_v7 = vld [vmem:[#allocation9_spill] sm:$0xff] (!%p2886_p10)  ;;  %v4508_v0 = vld [vmem:[#allocation12_spill] sm:$0xff] (!%p2886_p10)  ;;  %v4510_v20 = vld [vmem:[#allocation15_spill] sm:$0xff] (!%p2886_p10) }
 0x861   : > { %1662 = vmatpush1.bf16.msra.mxu0 (!%p2886_p10), %v3950_v53  ;;  %1703 = vmatpush1.bf16.msra.mxu1 (!%p2886_p10), %v3963_v56  ;;  %v3999_v9 = vcombine.high (!%p2886_p10), %v4507_v7, %v4506_v62  ;;  %v4004_v63 = vcombine.low (!%p2886_p10), %v4505_v60, %v4504_v5  ;;  %v4009_v28 = vcombine.high (!%p2886_p10), %v4509_v1, %v4508_v0  ;;  %v4511_v21 = vld [vmem:[#allocation13_spill] sm:$0xff] (!%p2886_p10)  ;;  %v4512_v37 = vld [vmem:[#allocation16_spill] sm:$0xff] (!%p2886_p10)  ;;  %v4513_v44 = vld [vmem:[#allocation14_spill] sm:$0xff] (!%p2886_p10) }
 0x862   : > { %1663 = vmatprep.subr.bf16.mxu0 (!%p2886_p10), %v3954_v54  ;;  %1704 = vmatprep.subr.bf16.mxu1 (!%p2886_p10), %v3967_v57  ;;  %v4015_v22 = vcombine.low (!%p2886_p10), %v4507_v7, %v4506_v62  ;;  %v4020_v25 = vcombine.high (!%p2886_p10), %v4511_v21, %v4510_v20  ;;  %v4025_v34 = vcombine.low (!%p2886_p10), %v4509_v1, %v4508_v0  ;;  %v4514_v12 = vld [vmem:[#allocation19_spill] sm:$0xff] (!%p2886_p10)  ;;  %v4515_v19 = vld [vmem:[#allocation17_spill] sm:$0xff] (!%p2886_p10)  ;;  %v4516_v15 = vld [vmem:[#allocation20_spill] sm:$0xff] (!%p2886_p10) }
 0x863   : > { %1693 = vmatprep.mubr.bf16.mxu0 (!%p2886_p10), %v3309_v8  ;;  %1734 = vmatprep.mubr.bf16.mxu1 (!%p2886_p10), %v3309_v8  ;;  %v4030_v11 = vcombine.high (!%p2886_p10), %v4513_v44, %v4512_v37  ;;  %v4035_v29 = vcombine.low (!%p2886_p10), %v4511_v21, %v4510_v20  ;;  %v4040_v17 = vcombine.high (!%p2886_p10), %v4515_v19, %v4514_v12  ;;  %v4517_v24 = vld [vmem:[#allocation18_spill] sm:$0xff] (!%p2886_p10)  ;;  %v4518_v33 = vld [vmem:[#allocation23_spill] sm:$0xff] (!%p2886_p10)  ;;  %v4519_v14 = vld [vmem:[#allocation21_spill] sm:$0xff] (!%p2886_p10) }
 0x864   : > { %v4045_v18 = vcombine.low (!%p2886_p10), %v4513_v44, %v4512_v37  ;;  %v4050_v13 = vcombine.high (!%p2886_p10), %v4517_v24, %v4516_v15  ;;  %v4055_v26 = vcombine.low (!%p2886_p10), %v4515_v19, %v4514_v12  ;;  %v4060_v16 = vcombine.high (!%p2886_p10), %v4519_v14, %v4518_v33  ;;  %v4520_v23 = vld [vmem:[#allocation24_spill] sm:$0xff] (!%p2886_p10)  ;;  %v4521_v32 = vld [vmem:[#allocation22_spill] sm:$0xff] (!%p2886_p10)  ;;  %v4522_v35 = vld [vmem:[#allocation27_spill] sm:$0xff] (!%p2886_p10) }
 0x865   : > { %1664 = vmatpush1.bf16.msra.mxu0 (!%p2886_p10), %v3972_v2  ;;  %1705 = vmatpush1.bf16.msra.mxu1 (!%p2886_p10), %v3983_v3  ;;  %v4065_v10 = vcombine.low (!%p2886_p10), %v4517_v24, %v4516_v15  ;;  %v4070_v30 = vcombine.high (!%p2886_p10), %v4521_v32, %v4520_v23  ;;  %v4075_v31 = vcombine.low (!%p2886_p10), %v4519_v14, %v4518_v33  ;;  %v4523_v36 = vld [vmem:[#allocation25_spill] sm:$0xff] (!%p2886_p10)  ;;  %v4524_v40 = vld [vmem:[#allocation28_spill] sm:$0xff] (!%p2886_p10)  ;;  %v4525_v41 = vld [vmem:[#allocation26_spill] sm:$0xff] (!%p2886_p10) }
 0x866   : > { %1665 = vmatprep.subr.bf16.mxu0 %v3978_v59  ;;  %1706 = vmatprep.subr.bf16.mxu1 %v3988_v6  ;;  %v4080_v38 = vcombine.high %v4523_v36, %v4522_v35  ;;  %v4085_v39 = vcombine.low %v4521_v32, %v4520_v23  ;;  %v4090_v42 = vcombine.high %v4525_v41, %v4524_v40  ;;  %v1491_v45 = vld [vmem:[#allocation2] sm:$0xff]  ;;  %v2887_v48 = vld [vmem:[%s3382_s7 + $0x70] sm:$0xff]  ;;  %v2888_v52 = vld [vmem:[%s3382_s7 + $0x78] sm:$0xff] }
 0x867   : > { %v4095_v43 = vcombine.low %v4523_v36, %v4522_v35  ;;  %v4101_v46 = vcombine.low %v4525_v41, %v4524_v40  ;;  %v1500_v47 = vpack.c.bf16 %v1491_v45, %v1491_v45  ;;  %v1496_v49 = vunpack.c.l.bf16 %v2887_v48  ;;  %v1492_v40 = vld [vmem:[#allocation3] sm:$0xff] }
 0x868   : > { %v1497_v50 = vunpack.c.h.bf16 %v2887_v48  ;;  %v1499_v20 = vunpack.c.h.bf16 %v2888_v52  ;;  %v1498_v19 = vunpack.c.l.bf16 %v2888_v52 }
 0x869   : > { %1666 = vmatpush1.bf16.msra.mxu0 %v3994_v61  ;;  %1707 = vmatpush1.bf16.msra.mxu1 %v4004_v63 }
 0x86a   : > { %1667 = vmatprep.subr.bf16.mxu0 %v3999_v9  ;;  %1708 = vmatprep.subr.bf16.mxu1 %v4009_v28 }
 0x86d   : > { %1668 = vmatpush1.bf16.msra.mxu0 %v4015_v22  ;;  %1709 = vmatpush1.bf16.msra.mxu1 %v4025_v34 }
 0x86e   : > { %1669 = vmatprep.subr.bf16.mxu0 %v4020_v25  ;;  %1710 = vmatprep.subr.bf16.mxu1 %v4030_v11 }
 0x871   : > { %1670 = vmatpush1.bf16.msra.mxu0 %v4035_v29  ;;  %1711 = vmatpush1.bf16.msra.mxu1 %v4045_v18 }
 0x872   : > { %1671 = vmatprep.subr.bf16.mxu0 %v4040_v17  ;;  %1712 = vmatprep.subr.bf16.mxu1 %v4050_v13 }
 0x875   : > { %1672 = vmatpush1.bf16.msra.mxu0 %v4055_v26  ;;  %1713 = vmatpush1.bf16.msra.mxu1 %v4065_v10 }
 0x876   : > { %1673 = vmatprep.subr.bf16.mxu0 %v4060_v16  ;;  %1714 = vmatprep.subr.bf16.mxu1 %v4070_v30 }
 0x879   : > { %1674 = vmatpush1.bf16.msra.mxu0 %v4075_v31  ;;  %1715 = vmatpush1.bf16.msra.mxu1 %v4085_v39 }
 0x87a   : > { %1675 = vmatprep.subr.bf16.mxu0 %v4080_v38  ;;  %1716 = vmatprep.subr.bf16.mxu1 %v4090_v42 }
 0x87d   : > { %1676 = vmatpush1.bf16.msra.mxu0 %v4095_v43  ;;  %1717 = vmatpush1.bf16.msra.mxu1 %v4101_v46 }
 0x87e   : > { %1781 = vmatprep.subr.bf16.mxu0 %v3946_v27  ;;  %1822 = vmatprep.subr.bf16.mxu1 %v3958_v55 }
 0x880   : > { %1694 = vmatmul.mubr.bf16.vlgmr.msra.gmra.mrb[0].mxu0 %v1500_v47  ;;  %1735 = vmatmul.mubr.bf16.vlgmr.msra.gmra.mrb[0].mxu1 %v1500_v47 }
 0x881   : > { %1782 = vmatpush1.bf16.msra.mxu0 %v3950_v53  ;;  %1823 = vmatpush1.bf16.msra.mxu1 %v3963_v56 }
 0x882   : > { %1783 = vmatprep.subr.bf16.mxu0 %v3954_v54  ;;  %1824 = vmatprep.subr.bf16.mxu1 %v3967_v57 }
 0x883   : > { %1813 = vmatprep.mubr.bf16.mxu0 %v3309_v8  ;;  %1854 = vmatprep.mubr.bf16.mxu1 %v3309_v8 }
 0x885   : > { %1784 = vmatpush1.bf16.msra.mxu0 %v3972_v2  ;;  %1825 = vmatpush1.bf16.msra.mxu1 %v3983_v3 }
 0x886   : > { %1785 = vmatprep.subr.bf16.mxu0 %v3978_v59  ;;  %1826 = vmatprep.subr.bf16.mxu1 %v3988_v6 }
 0x889   : > { %1786 = vmatpush1.bf16.msra.mxu0 %v3994_v61  ;;  %1827 = vmatpush1.bf16.msra.mxu1 %v4004_v63 }
 0x88a   : > { %1787 = vmatprep.subr.bf16.mxu0 %v3999_v9  ;;  %1828 = vmatprep.subr.bf16.mxu1 %v4009_v28 }
 0x88d   : > { %1788 = vmatpush1.bf16.msra.mxu0 %v4015_v22  ;;  %1829 = vmatpush1.bf16.msra.mxu1 %v4025_v34 }
 0x88e   : > { %1789 = vmatprep.subr.bf16.mxu0 %v4020_v25  ;;  %1830 = vmatprep.subr.bf16.mxu1 %v4030_v11 }
 0x891   : > { %1790 = vmatpush1.bf16.msra.mxu0 %v4035_v29  ;;  %1831 = vmatpush1.bf16.msra.mxu1 %v4045_v18 }
 0x892   : > { %1791 = vmatprep.subr.bf16.mxu0 %v4040_v17  ;;  %1832 = vmatprep.subr.bf16.mxu1 %v4050_v13 }
 0x895   : > { %1792 = vmatpush1.bf16.msra.mxu0 %v4055_v26  ;;  %1833 = vmatpush1.bf16.msra.mxu1 %v4065_v10 }
 0x896   : > { %1793 = vmatprep.subr.bf16.mxu0 %v4060_v16  ;;  %1834 = vmatprep.subr.bf16.mxu1 %v4070_v30 }
 0x899   : > { %1794 = vmatpush1.bf16.msra.mxu0 %v4075_v31  ;;  %1835 = vmatpush1.bf16.msra.mxu1 %v4085_v39 }
 0x89a   : > { %1795 = vmatprep.subr.bf16.mxu0 %v4080_v38  ;;  %1836 = vmatprep.subr.bf16.mxu1 %v4090_v42 }
 0x89d   : > { %1796 = vmatpush1.bf16.msra.mxu0 %v4095_v43  ;;  %1837 = vmatpush1.bf16.msra.mxu1 %v4101_v46 }
 0x89e   : > { %1901 = vmatprep.subr.bf16.mxu0 %v3946_v27  ;;  %1942 = vmatprep.subr.bf16.mxu1 %v3958_v55 }
 0x953   : > { %v1695_v51 = vpop.f32.mrb[0].mxu0  ;;  %v1736_v5 = vpop.f32.mrb[0].mxu1 }
 0x954   : > { %v1743_v4 = vadd.f32 %v1695_v51, %v1496_v49  ;;  %v1697_v58 = vpop.f32.mrb[1].mxu0  ;;  %v1738_v7 = vpop.f32.mrb[1].mxu1  ;;  %v1745_v24 = vadd.f32 %v1736_v5, %v1498_v19  ;;  %v2925_v5 = vld [vmem:[%s3382_s7 + $0x60] sm:$0xff] }
 0x955   : > { %v1744_v60 = vadd.f32 %v1697_v58, %v1497_v50  ;;  %v1699_v62 = vpop.f32.mrb[2].mxu0  ;;  %v1740_v21 = vpop.f32.mrb[2].mxu1  ;;  %v1746_v12 = vadd.f32 %v1738_v7, %v1499_v20  ;;  %v2926_v20 = vld [vmem:[%s3382_s7 + $0x68] sm:$0xff] }
 0x956   : > { %v2921_v0 = vmul.f32 -1.442695, %v1743_v4  ;;  %v1700_v1 = vpop.f32.mrb[3].mxu0  ;;  %v1741_v44 = vpop.f32.mrb[3].mxu1  ;;  %v1777_v62 = vunpack.c.h.bf16 %v2925_v5 }
 0x957   : > { %v2922_v37 = vmul.f32 -1.442695, %v1744_v60  ;;  %v2923_v15 = vmul.f32 -1.442695, %v1746_v12  ;;  %v1776_v60 = vunpack.c.l.bf16 %v2925_v5 }
 0x958   : > { %3140 = vpow2.f32 %v2921_v0 }
 0x959   : > { %3142 = vpow2.f32 %v2922_v37 }
 0x95a   : > { %3144 = vpow2.f32 %v2923_v15 }
 0x95b   : > { %3146 = vtanh.f32 %v1745_v24 }
 0x962   : > { %v3141_v33 = vpop.eup %3140 }
 0x963   : > { %v3143_v14 = vpop.eup %3142  ;;  %v1750_v23 = vadd.f32 1.0, %v3141_v33 }
 0x964   : > { %v1756_v32 = vadd.f32 1.0, %v3143_v14  ;;  %v3145_v35 = vpop.eup %3144 }
 0x965   : > { %3148 = vrcp.f32 %v1750_v23  ;;  %v3147_v36 = vpop.eup %3146  ;;  %v1763_v45 = vadd.f32 1.0, %v3145_v35  ;;  %v1779_v23 = vunpack.c.h.bf16 %v2926_v20  ;;  %v1778_v35 = vunpack.c.l.bf16 %v2926_v20 }
 0x966   : > { %3150 = vrcp.f32 %v1756_v32 }
 0x967   : > { %3152 = vrcp.f32 %v1763_v45 }
 0x96f   : > { %v3149_v41 = vpop.eup %3148 }
 0x970   : > { %v3151_v47 = vpop.eup %3150  ;;  %v1767_v48 = vmul.f32 %v3149_v41, %v3147_v36 }
 0x971   : > { %v1766_v49 = vmul.f32 %v3151_v47, %v1492_v40  ;;  %v3153_v51 = vpop.eup %3152 }
 0x973   : > { %v4144_v50 = vadd.f32 %v1767_v48, %v1766_v49 }
 0x975   : > { %3154 = vtanh.f32 %v4144_v50 }
 0x97f   : > { %v3155_v52 = vpop.eup %3154 }
 0x980   : > { %v1770_v4 = vmul.f32 %v3155_v52, %v3153_v51 }
 0x982   : > { %2924 = vst [vmem:[%s3492_s24 + $0x38] sm:$0xff] %v1770_v4  ;;  %v1780_v58 = vpack.c.bf16 %v1770_v4, %v1770_v4 }
 0x984   : > { %1814 = vmatmul.mubr.bf16.vlgmr.msra.gmra.mrb[4].mxu0 %v1780_v58  ;;  %1855 = vmatmul.mubr.bf16.vlgmr.msra.gmra.mrb[4].mxu1 %v1780_v58 }
 0x985   : > { %1902 = vmatpush1.bf16.msra.mxu0 %v3950_v53  ;;  %1943 = vmatpush1.bf16.msra.mxu1 %v3963_v56 }
 0x986   : > { %1903 = vmatprep.subr.bf16.mxu0 %v3954_v54  ;;  %1944 = vmatprep.subr.bf16.mxu1 %v3967_v57 }
 0x987   : > { %1933 = vmatprep.mubr.bf16.mxu0 %v3309_v8  ;;  %1974 = vmatprep.mubr.bf16.mxu1 %v3309_v8 }
 0x989   : > { %1904 = vmatpush1.bf16.msra.mxu0 %v3972_v2  ;;  %1945 = vmatpush1.bf16.msra.mxu1 %v3983_v3 }
 0x98a   : > { %1905 = vmatprep.subr.bf16.mxu0 %v3978_v59  ;;  %1946 = vmatprep.subr.bf16.mxu1 %v3988_v6 }
 0x98d   : > { %1906 = vmatpush1.bf16.msra.mxu0 %v3994_v61  ;;  %1947 = vmatpush1.bf16.msra.mxu1 %v4004_v63 }
 0x98e   : > { %1907 = vmatprep.subr.bf16.mxu0 %v3999_v9  ;;  %1948 = vmatprep.subr.bf16.mxu1 %v4009_v28 }
 0x991   : > { %1908 = vmatpush1.bf16.msra.mxu0 %v4015_v22  ;;  %1949 = vmatpush1.bf16.msra.mxu1 %v4025_v34 }
 0x992   : > { %1909 = vmatprep.subr.bf16.mxu0 %v4020_v25  ;;  %1950 = vmatprep.subr.bf16.mxu1 %v4030_v11 }
 0x995   : > { %1910 = vmatpush1.bf16.msra.mxu0 %v4035_v29  ;;  %1951 = vmatpush1.bf16.msra.mxu1 %v4045_v18 }
 0x996   : > { %1911 = vmatprep.subr.bf16.mxu0 %v4040_v17  ;;  %1952 = vmatprep.subr.bf16.mxu1 %v4050_v13 }
 0x999   : > { %1912 = vmatpush1.bf16.msra.mxu0 %v4055_v26  ;;  %1953 = vmatpush1.bf16.msra.mxu1 %v4065_v10 }
 0x99a   : > { %1913 = vmatprep.subr.bf16.mxu0 %v4060_v16  ;;  %1954 = vmatprep.subr.bf16.mxu1 %v4070_v30 }
 0x99d   : > { %1914 = vmatpush1.bf16.msra.mxu0 %v4075_v31  ;;  %1955 = vmatpush1.bf16.msra.mxu1 %v4085_v39 }
 0x99e   : > { %1915 = vmatprep.subr.bf16.mxu0 %v4080_v38  ;;  %1956 = vmatprep.subr.bf16.mxu1 %v4090_v42 }
 0x9a1   : > { %1916 = vmatpush1.bf16.msra.mxu0 %v4095_v43  ;;  %1957 = vmatpush1.bf16.msra.mxu1 %v4101_v46 }
 0x9a2   : > { %2021 = vmatprep.subr.bf16.mxu0 %v3946_v27  ;;  %2062 = vmatprep.subr.bf16.mxu1 %v3958_v55 }
 0xa57   : > { %v1815_v7 = vpop.f32.mrb[4].mxu0  ;;  %v1856_v0 = vpop.f32.mrb[4].mxu1 }
 0xa58   : > { %v1863_v1 = vadd.f32 %v1815_v7, %v1776_v60  ;;  %v1817_v21 = vpop.f32.mrb[5].mxu0  ;;  %v1858_v37 = vpop.f32.mrb[5].mxu1  ;;  %v1865_v40 = vadd.f32 %v1856_v0, %v1778_v35 }
 0xa59   : > { %v1864_v44 = vadd.f32 %v1817_v21, %v1777_v62  ;;  %v1819_v12 = vpop.f32.mrb[6].mxu0  ;;  %v1860_v19 = vpop.f32.mrb[6].mxu1  ;;  %v1866_v32 = vadd.f32 %v1858_v37, %v1779_v23 }
 0xa5a   : > { %v2927_v15 = vmul.f32 -1.442695, %v1863_v1  ;;  %v1820_v24 = vpop.f32.mrb[7].mxu0  ;;  %v1861_v33 = vpop.f32.mrb[7].mxu1 }
 0xa5b   : > { %v2928_v14 = vmul.f32 -1.442695, %v1864_v44  ;;  %v2929_v36 = vmul.f32 -1.442695, %v1866_v32 }
 0xa5c   : > { %3156 = vpow2.f32 %v2927_v15  ;;  %v2932_v15 = vld [vmem:[%s3382_s7 + $0x58] sm:$0xff] }
 0xa5d   : > { %3158 = vpow2.f32 %v2928_v14 }
 0xa5e   : > { %3160 = vpow2.f32 %v2929_v36 }
 0xa5f   : > { %3162 = vtanh.f32 %v1865_v40 }
 0xa66   : > { %v3157_v41 = vpop.eup %3156 }
 0xa67   : > { %v3159_v45 = vpop.eup %3158  ;;  %v1870_v47 = vadd.f32 1.0, %v3157_v41 }
 0xa68   : > { %v1876_v48 = vadd.f32 1.0, %v3159_v45  ;;  %v3161_v49 = vpop.eup %3160  ;;  %v1899_v45 = vunpack.c.h.bf16 %v2932_v15 }
 0xa69   : > { %3164 = vrcp.f32 %v1870_v47  ;;  %v3163_v51 = vpop.eup %3162  ;;  %v1883_v5 = vadd.f32 1.0, %v3161_v49 }
 0xa6a   : > { %3166 = vrcp.f32 %v1876_v48  ;;  %v1898_v48 = vunpack.c.l.bf16 %v2932_v15 }
 0xa6b   : > { %3168 = vrcp.f32 %v1883_v5 }
 0xa73   : > { %v3165_v52 = vpop.eup %3164 }
 0xa74   : > { %v3167_v4 = vpop.eup %3166  ;;  %v1887_v58 = vmul.f32 %v3165_v52, %v3163_v51 }
 0xa75   : > { %v1886_v60 = vmul.f32 %v3167_v4, %v4144_v50  ;;  %v3169_v7 = vpop.eup %3168  ;;  %v2931_v50 = vld [vmem:[%s3382_s7 + $0x50] sm:$0xff] }
 0xa76   : > { %v1896_v21 = vunpack.c.l.bf16 %v2931_v50  ;;  %v1897_v37 = vunpack.c.h.bf16 %v2931_v50 }
 0xa77   : > { %v4185_v62 = vadd.f32 %v1887_v58, %v1886_v60 }
 0xa79   : > { %3170 = vtanh.f32 %v4185_v62 }
 0xa83   : > { %v3171_v0 = vpop.eup %3170 }
 0xa84   : > { %v1890_v1 = vmul.f32 %v3171_v0, %v3169_v7 }
 0xa86   : > { %2930 = vst [vmem:[%s3492_s24 + $0x30] sm:$0xff] %v1890_v1  ;;  %v1900_v20 = vpack.c.bf16 %v1890_v1, %v1890_v1 }
 0xa88   : > { %1934 = vmatmul.mubr.bf16.vlgmr.msra.gmra.mrb[8].mxu0 %v1900_v20  ;;  %1975 = vmatmul.mubr.bf16.vlgmr.msra.gmra.mrb[8].mxu1 %v1900_v20 }
 0xa89   : > { %2022 = vmatpush1.bf16.msra.mxu0 %v3950_v53  ;;  %2063 = vmatpush1.bf16.msra.mxu1 %v3963_v56 }
 0xa8a   : > { %2023 = vmatprep.subr.bf16.mxu0 %v3954_v54  ;;  %2064 = vmatprep.subr.bf16.mxu1 %v3967_v57 }
 0xa8b   : > { %2053 = vmatprep.mubr.bf16.mxu0 %v3309_v8  ;;  %2094 = vmatprep.mubr.bf16.mxu1 %v3309_v8 }
 0xa8d   : > { %2024 = vmatpush1.bf16.msra.mxu0 %v3972_v2  ;;  %2065 = vmatpush1.bf16.msra.mxu1 %v3983_v3 }
 0xa8e   : > { %2025 = vmatprep.subr.bf16.mxu0 %v3978_v59  ;;  %2066 = vmatprep.subr.bf16.mxu1 %v3988_v6 }
 0xa91   : > { %2026 = vmatpush1.bf16.msra.mxu0 %v3994_v61  ;;  %2067 = vmatpush1.bf16.msra.mxu1 %v4004_v63 }
 0xa92   : > { %2027 = vmatprep.subr.bf16.mxu0 %v3999_v9  ;;  %2068 = vmatprep.subr.bf16.mxu1 %v4009_v28 }
 0xa95   : > { %2028 = vmatpush1.bf16.msra.mxu0 %v4015_v22  ;;  %2069 = vmatpush1.bf16.msra.mxu1 %v4025_v34 }
 0xa96   : > { %2029 = vmatprep.subr.bf16.mxu0 %v4020_v25  ;;  %2070 = vmatprep.subr.bf16.mxu1 %v4030_v11 }
 0xa99   : > { %2030 = vmatpush1.bf16.msra.mxu0 %v4035_v29  ;;  %2071 = vmatpush1.bf16.msra.mxu1 %v4045_v18 }
 0xa9a   : > { %2031 = vmatprep.subr.bf16.mxu0 %v4040_v17  ;;  %2072 = vmatprep.subr.bf16.mxu1 %v4050_v13 }
 0xa9d   : > { %2032 = vmatpush1.bf16.msra.mxu0 %v4055_v26  ;;  %2073 = vmatpush1.bf16.msra.mxu1 %v4065_v10 }
 0xa9e   : > { %2033 = vmatprep.subr.bf16.mxu0 %v4060_v16  ;;  %2074 = vmatprep.subr.bf16.mxu1 %v4070_v30 }
 0xaa1   : > { %2034 = vmatpush1.bf16.msra.mxu0 %v4075_v31  ;;  %2075 = vmatpush1.bf16.msra.mxu1 %v4085_v39 }
 0xaa2   : > { %2035 = vmatprep.subr.bf16.mxu0 %v4080_v38  ;;  %2076 = vmatprep.subr.bf16.mxu1 %v4090_v42 }
 0xaa5   : > { %2036 = vmatpush1.bf16.msra.mxu0 %v4095_v43  ;;  %2077 = vmatpush1.bf16.msra.mxu1 %v4101_v46 }
 0xaa6   : > { %2141 = vmatprep.subr.bf16.mxu0 %v3946_v27  ;;  %2182 = vmatprep.subr.bf16.mxu1 %v3958_v55 }
 0xb5b   : > { %v1935_v44 = vpop.f32.mrb[8].mxu0  ;;  %v1976_v12 = vpop.f32.mrb[8].mxu1 }
 0xb5c   : > { %v1983_v19 = vadd.f32 %v1935_v44, %v1896_v21  ;;  %v1937_v24 = vpop.f32.mrb[9].mxu0  ;;  %v1978_v33 = vpop.f32.mrb[9].mxu1  ;;  %v1985_v51 = vadd.f32 %v1976_v12, %v1898_v48 }
 0xb5d   : > { %v1984_v14 = vadd.f32 %v1937_v24, %v1897_v37  ;;  %v1939_v23 = vpop.f32.mrb[10].mxu0  ;;  %v1980_v32 = vpop.f32.mrb[10].mxu1  ;;  %v1986_v47 = vadd.f32 %v1978_v33, %v1899_v45 }
 0xb5e   : > { %v2933_v35 = vmul.f32 -1.442695, %v1983_v19  ;;  %v1940_v36 = vpop.f32.mrb[11].mxu0  ;;  %v1981_v40 = vpop.f32.mrb[11].mxu1 }
 0xb5f   : > { %v2934_v41 = vmul.f32 -1.442695, %v1984_v14  ;;  %v2935_v49 = vmul.f32 -1.442695, %v1986_v47 }
 0xb60   : > { %3172 = vpow2.f32 %v2933_v35  ;;  %v2938_v35 = vld [vmem:[%s3382_s7 + $0x48] sm:$0xff] }
 0xb61   : > { %3174 = vpow2.f32 %v2934_v41 }
 0xb62   : > { %3176 = vpow2.f32 %v2935_v49 }
 0xb63   : > { %3178 = vtanh.f32 %v1985_v51 }
 0xb6a   : > { %v3173_v52 = vpop.eup %3172 }
 0xb6b   : > { %v3175_v4 = vpop.eup %3174  ;;  %v1990_v58 = vadd.f32 1.0, %v3173_v52 }
 0xb6c   : > { %v1996_v5 = vadd.f32 1.0, %v3175_v4  ;;  %v3177_v60 = vpop.eup %3176  ;;  %v2019_v4 = vunpack.c.h.bf16 %v2938_v35 }
 0xb6d   : > { %3180 = vrcp.f32 %v1990_v58  ;;  %v3179_v7 = vpop.eup %3178  ;;  %v2003_v50 = vadd.f32 1.0, %v3177_v60 }
 0xb6e   : > { %3182 = vrcp.f32 %v1996_v5  ;;  %v2018_v5 = vunpack.c.l.bf16 %v2938_v35 }
 0xb6f   : > { %3184 = vrcp.f32 %v2003_v50 }
 0xb77   : > { %v3181_v0 = vpop.eup %3180 }
 0xb78   : > { %v3183_v1 = vpop.eup %3182  ;;  %v2007_v20 = vmul.f32 %v3181_v0, %v3179_v7 }
 0xb79   : > { %v2006_v21 = vmul.f32 %v3183_v1, %v4185_v62  ;;  %v3185_v44 = vpop.eup %3184  ;;  %v2937_v62 = vld [vmem:[%s3382_s7 + $0x40] sm:$0xff] }
 0xb7a   : > { %v2016_v24 = vunpack.c.l.bf16 %v2937_v62  ;;  %v2017_v33 = vunpack.c.h.bf16 %v2937_v62 }
 0xb7b   : > { %v4226_v37 = vadd.f32 %v2007_v20, %v2006_v21 }
 0xb7d   : > { %3186 = vtanh.f32 %v4226_v37 }
 0xb87   : > { %v3187_v12 = vpop.eup %3186 }
 0xb88   : > { %v2010_v19 = vmul.f32 %v3187_v12, %v3185_v44 }
 0xb8a   : > { %2936 = vst [vmem:[%s3492_s24 + $0x28] sm:$0xff] %v2010_v19  ;;  %v2020_v15 = vpack.c.bf16 %v2010_v19, %v2010_v19 }
 0xb8c   : > { %2054 = vmatmul.mubr.bf16.vlgmr.msra.gmra.mrb[12].mxu0 %v2020_v15  ;;  %2095 = vmatmul.mubr.bf16.vlgmr.msra.gmra.mrb[12].mxu1 %v2020_v15 }
 0xb8d   : > { %2142 = vmatpush1.bf16.msra.mxu0 %v3950_v53  ;;  %2183 = vmatpush1.bf16.msra.mxu1 %v3963_v56 }
 0xb8e   : > { %2143 = vmatprep.subr.bf16.mxu0 %v3954_v54  ;;  %2184 = vmatprep.subr.bf16.mxu1 %v3967_v57 }
 0xb8f   : > { %2173 = vmatprep.mubr.bf16.mxu0 %v3309_v8  ;;  %2214 = vmatprep.mubr.bf16.mxu1 %v3309_v8 }
 0xb91   : > { %2144 = vmatpush1.bf16.msra.mxu0 %v3972_v2  ;;  %2185 = vmatpush1.bf16.msra.mxu1 %v3983_v3 }
 0xb92   : > { %2145 = vmatprep.subr.bf16.mxu0 %v3978_v59  ;;  %2186 = vmatprep.subr.bf16.mxu1 %v3988_v6 }
 0xb95   : > { %2146 = vmatpush1.bf16.msra.mxu0 %v3994_v61  ;;  %2187 = vmatpush1.bf16.msra.mxu1 %v4004_v63 }
 0xb96   : > { %2147 = vmatprep.subr.bf16.mxu0 %v3999_v9  ;;  %2188 = vmatprep.subr.bf16.mxu1 %v4009_v28 }
 0xb99   : > { %2148 = vmatpush1.bf16.msra.mxu0 %v4015_v22  ;;  %2189 = vmatpush1.bf16.msra.mxu1 %v4025_v34 }
 0xb9a   : > { %2149 = vmatprep.subr.bf16.mxu0 %v4020_v25  ;;  %2190 = vmatprep.subr.bf16.mxu1 %v4030_v11 }
 0xb9d   : > { %2150 = vmatpush1.bf16.msra.mxu0 %v4035_v29  ;;  %2191 = vmatpush1.bf16.msra.mxu1 %v4045_v18 }
 0xb9e   : > { %2151 = vmatprep.subr.bf16.mxu0 %v4040_v17  ;;  %2192 = vmatprep.subr.bf16.mxu1 %v4050_v13 }
 0xba1   : > { %2152 = vmatpush1.bf16.msra.mxu0 %v4055_v26  ;;  %2193 = vmatpush1.bf16.msra.mxu1 %v4065_v10 }
 0xba2   : > { %2153 = vmatprep.subr.bf16.mxu0 %v4060_v16  ;;  %2194 = vmatprep.subr.bf16.mxu1 %v4070_v30 }
 0xba5   : > { %2154 = vmatpush1.bf16.msra.mxu0 %v4075_v31  ;;  %2195 = vmatpush1.bf16.msra.mxu1 %v4085_v39 }
 0xba6   : > { %2155 = vmatprep.subr.bf16.mxu0 %v4080_v38  ;;  %2196 = vmatprep.subr.bf16.mxu1 %v4090_v42 }
 0xba9   : > { %2156 = vmatpush1.bf16.msra.mxu0 %v4095_v43  ;;  %2197 = vmatpush1.bf16.msra.mxu1 %v4101_v46 }
 0xbaa   : > { %2261 = vmatprep.subr.bf16.mxu0 %v3946_v27  ;;  %2302 = vmatprep.subr.bf16.mxu1 %v3958_v55 }
 0xc5f   : > { %v2055_v14 = vpop.f32.mrb[12].mxu0  ;;  %v2096_v23 = vpop.f32.mrb[12].mxu1 }
 0xc60   : > { %v2103_v32 = vadd.f32 %v2055_v14, %v2016_v24  ;;  %v2057_v36 = vpop.f32.mrb[13].mxu0  ;;  %v2098_v40 = vpop.f32.mrb[13].mxu1  ;;  %v2105_v7 = vadd.f32 %v2096_v23, %v2018_v5 }
 0xc61   : > { %v2104_v41 = vadd.f32 %v2057_v36, %v2017_v33  ;;  %v2059_v45 = vpop.f32.mrb[14].mxu0  ;;  %v2100_v47 = vpop.f32.mrb[14].mxu1  ;;  %v2106_v58 = vadd.f32 %v2098_v40, %v2019_v4 }
 0xc62   : > { %v2939_v48 = vmul.f32 -1.442695, %v2103_v32  ;;  %v2060_v49 = vpop.f32.mrb[15].mxu0  ;;  %v2101_v51 = vpop.f32.mrb[15].mxu1 }
 0xc63   : > { %v2940_v52 = vmul.f32 -1.442695, %v2104_v41  ;;  %v2941_v60 = vmul.f32 -1.442695, %v2106_v58 }
 0xc64   : > { %3188 = vpow2.f32 %v2939_v48  ;;  %v2944_v48 = vld [vmem:[%s3382_s7 + $0x38] sm:$0xff] }
 0xc65   : > { %3190 = vpow2.f32 %v2940_v52 }
 0xc66   : > { %3192 = vpow2.f32 %v2941_v60 }
 0xc67   : > { %3194 = vtanh.f32 %v2105_v7 }
 0xc6e   : > { %v3189_v0 = vpop.eup %3188 }
 0xc6f   : > { %v3191_v1 = vpop.eup %3190  ;;  %v2110_v20 = vadd.f32 1.0, %v3189_v0 }
 0xc70   : > { %v2116_v50 = vadd.f32 1.0, %v3191_v1  ;;  %v3193_v21 = vpop.eup %3192  ;;  %v2139_v1 = vunpack.c.h.bf16 %v2944_v48 }
 0xc71   : > { %3196 = vrcp.f32 %v2110_v20  ;;  %v3195_v44 = vpop.eup %3194  ;;  %v2123_v62 = vadd.f32 1.0, %v3193_v21 }
 0xc72   : > { %3198 = vrcp.f32 %v2116_v50  ;;  %v2138_v50 = vunpack.c.l.bf16 %v2944_v48 }
 0xc73   : > { %3200 = vrcp.f32 %v2123_v62 }
 0xc7b   : > { %v3197_v12 = vpop.eup %3196 }
 0xc7c   : > { %v3199_v19 = vpop.eup %3198  ;;  %v2127_v15 = vmul.f32 %v3197_v12, %v3195_v44 }
 0xc7d   : > { %v2126_v24 = vmul.f32 %v3199_v19, %v4226_v37  ;;  %v3201_v14 = vpop.eup %3200  ;;  %v2943_v37 = vld [vmem:[%s3382_s7 + $0x30] sm:$0xff] }
 0xc7e   : > { %v2136_v36 = vunpack.c.l.bf16 %v2943_v37  ;;  %v2137_v40 = vunpack.c.h.bf16 %v2943_v37 }
 0xc7f   : > { %v4267_v33 = vadd.f32 %v2127_v15, %v2126_v24 }
 0xc81   : > { %3202 = vtanh.f32 %v4267_v33 }
 0xc8b   : > { %v3203_v23 = vpop.eup %3202 }
 0xc8c   : > { %v2130_v32 = vmul.f32 %v3203_v23, %v3201_v14 }
 0xc8e   : > { %2942 = vst [vmem:[%s3492_s24 + $0x20] sm:$0xff] %v2130_v32  ;;  %v2140_v35 = vpack.c.bf16 %v2130_v32, %v2130_v32 }
 0xc90   : > { %2174 = vmatmul.mubr.bf16.vlgmr.msra.gmra.mrb[16].mxu0 %v2140_v35  ;;  %2215 = vmatmul.mubr.bf16.vlgmr.msra.gmra.mrb[16].mxu1 %v2140_v35 }
 0xc91   : > { %2262 = vmatpush1.bf16.msra.mxu0 %v3950_v53  ;;  %2303 = vmatpush1.bf16.msra.mxu1 %v3963_v56 }
 0xc92   : > { %2263 = vmatprep.subr.bf16.mxu0 %v3954_v54  ;;  %2304 = vmatprep.subr.bf16.mxu1 %v3967_v57 }
 0xc93   : > { %2293 = vmatprep.mubr.bf16.mxu0 %v3309_v8  ;;  %2334 = vmatprep.mubr.bf16.mxu1 %v3309_v8 }
 0xc95   : > { %2264 = vmatpush1.bf16.msra.mxu0 %v3972_v2  ;;  %2305 = vmatpush1.bf16.msra.mxu1 %v3983_v3 }
 0xc96   : > { %2265 = vmatprep.subr.bf16.mxu0 %v3978_v59  ;;  %2306 = vmatprep.subr.bf16.mxu1 %v3988_v6 }
 0xc99   : > { %2266 = vmatpush1.bf16.msra.mxu0 %v3994_v61  ;;  %2307 = vmatpush1.bf16.msra.mxu1 %v4004_v63 }
 0xc9a   : > { %2267 = vmatprep.subr.bf16.mxu0 %v3999_v9  ;;  %2308 = vmatprep.subr.bf16.mxu1 %v4009_v28 }
 0xc9d   : > { %2268 = vmatpush1.bf16.msra.mxu0 %v4015_v22  ;;  %2309 = vmatpush1.bf16.msra.mxu1 %v4025_v34 }
 0xc9e   : > { %2269 = vmatprep.subr.bf16.mxu0 %v4020_v25  ;;  %2310 = vmatprep.subr.bf16.mxu1 %v4030_v11 }
 0xca1   : > { %2270 = vmatpush1.bf16.msra.mxu0 %v4035_v29  ;;  %2311 = vmatpush1.bf16.msra.mxu1 %v4045_v18 }
 0xca2   : > { %2271 = vmatprep.subr.bf16.mxu0 %v4040_v17  ;;  %2312 = vmatprep.subr.bf16.mxu1 %v4050_v13 }
 0xca5   : > { %2272 = vmatpush1.bf16.msra.mxu0 %v4055_v26  ;;  %2313 = vmatpush1.bf16.msra.mxu1 %v4065_v10 }
 0xca6   : > { %2273 = vmatprep.subr.bf16.mxu0 %v4060_v16  ;;  %2314 = vmatprep.subr.bf16.mxu1 %v4070_v30 }
 0xca9   : > { %2274 = vmatpush1.bf16.msra.mxu0 %v4075_v31  ;;  %2315 = vmatpush1.bf16.msra.mxu1 %v4085_v39 }
 0xcaa   : > { %2275 = vmatprep.subr.bf16.mxu0 %v4080_v38  ;;  %2316 = vmatprep.subr.bf16.mxu1 %v4090_v42 }
 0xcad   : > { %2276 = vmatpush1.bf16.msra.mxu0 %v4095_v43  ;;  %2317 = vmatpush1.bf16.msra.mxu1 %v4101_v46 }
 0xcae   : > { %2381 = vmatprep.subr.bf16.mxu0 %v3946_v27  ;;  %2422 = vmatprep.subr.bf16.mxu1 %v3958_v55 }
 0xd63   : > { %v2175_v41 = vpop.f32.mrb[16].mxu0  ;;  %v2216_v45 = vpop.f32.mrb[16].mxu1 }
 0xd64   : > { %v2223_v47 = vadd.f32 %v2175_v41, %v2136_v36  ;;  %v2177_v49 = vpop.f32.mrb[17].mxu0  ;;  %v2218_v51 = vpop.f32.mrb[17].mxu1  ;;  %v2225_v44 = vadd.f32 %v2216_v45, %v2138_v50 }
 0xd65   : > { %v2224_v52 = vadd.f32 %v2177_v49, %v2137_v40  ;;  %v2179_v4 = vpop.f32.mrb[18].mxu0  ;;  %v2220_v58 = vpop.f32.mrb[18].mxu1  ;;  %v2226_v20 = vadd.f32 %v2218_v51, %v2139_v1 }
 0xd66   : > { %v2945_v5 = vmul.f32 -1.442695, %v2223_v47  ;;  %v2180_v60 = vpop.f32.mrb[19].mxu0  ;;  %v2221_v7 = vpop.f32.mrb[19].mxu1 }
 0xd67   : > { %v2946_v0 = vmul.f32 -1.442695, %v2224_v52  ;;  %v2947_v21 = vmul.f32 -1.442695, %v2226_v20 }
 0xd68   : > { %3204 = vpow2.f32 %v2945_v5  ;;  %v2950_v5 = vld [vmem:[%s3382_s7 + $0x28] sm:$0xff] }
 0xd69   : > { %3206 = vpow2.f32 %v2946_v0 }
 0xd6a   : > { %3208 = vpow2.f32 %v2947_v21 }
 0xd6b   : > { %3210 = vtanh.f32 %v2225_v44 }
 0xd72   : > { %v3205_v12 = vpop.eup %3204 }
 0xd73   : > { %v3207_v19 = vpop.eup %3206  ;;  %v2230_v15 = vadd.f32 1.0, %v3205_v12 }
 0xd74   : > { %v2236_v62 = vadd.f32 1.0, %v3207_v19  ;;  %v3209_v24 = vpop.eup %3208  ;;  %v2259_v19 = vunpack.c.h.bf16 %v2950_v5 }
 0xd75   : > { %3212 = vrcp.f32 %v2230_v15  ;;  %v3211_v14 = vpop.eup %3210  ;;  %v2243_v37 = vadd.f32 1.0, %v3209_v24 }
 0xd76   : > { %3214 = vrcp.f32 %v2236_v62 }
 0xd77   : > { %3216 = vrcp.f32 %v2243_v37 }
 0xd7f   : > { %v3213_v23 = vpop.eup %3212 }
 0xd80   : > { %v3215_v32 = vpop.eup %3214  ;;  %v2247_v35 = vmul.f32 %v3213_v23, %v3211_v14 }
 0xd81   : > { %v2246_v36 = vmul.f32 %v3215_v32, %v4267_v33  ;;  %v3217_v41 = vpop.eup %3216  ;;  %v2949_v33 = vld [vmem:[%s3382_s7 + $0x20] sm:$0xff] }
 0xd82   : > { %v2256_v49 = vunpack.c.l.bf16 %v2949_v33  ;;  %v2257_v51 = vunpack.c.h.bf16 %v2949_v33 }
 0xd83   : > { %v4308_v40 = vadd.f32 %v2247_v35, %v2246_v36 }
 0xd85   : > { %3218 = vtanh.f32 %v4308_v40 }
 0xd8f   : > { %v3219_v45 = vpop.eup %3218 }
 0xd90   : > { %v2250_v47 = vmul.f32 %v3219_v45, %v3217_v41 }
 0xd92   : > { %2948 = vst [vmem:[%s3492_s24 + $0x18] sm:$0xff] %v2250_v47  ;;  %v2260_v48 = vpack.c.bf16 %v2250_v47, %v2250_v47 }
 0xd94   : > { %2294 = vmatmul.mubr.bf16.vlgmr.msra.gmra.mrb[20].mxu0 %v2260_v48  ;;  %2335 = vmatmul.mubr.bf16.vlgmr.msra.gmra.mrb[20].mxu1 %v2260_v48 }
 0xd95   : > { %2382 = vmatpush1.bf16.msra.mxu0 %v3950_v53  ;;  %2423 = vmatpush1.bf16.msra.mxu1 %v3963_v56 }
 0xd96   : > { %2383 = vmatprep.subr.bf16.mxu0 %v3954_v54  ;;  %2424 = vmatprep.subr.bf16.mxu1 %v3967_v57 }
 0xd97   : > { %2413 = vmatprep.mubr.bf16.mxu0 %v3309_v8  ;;  %2454 = vmatprep.mubr.bf16.mxu1 %v3309_v8 }
 0xd99   : > { %2384 = vmatpush1.bf16.msra.mxu0 %v3972_v2  ;;  %2425 = vmatpush1.bf16.msra.mxu1 %v3983_v3 }
 0xd9a   : > { %2385 = vmatprep.subr.bf16.mxu0 %v3978_v59  ;;  %2426 = vmatprep.subr.bf16.mxu1 %v3988_v6 }
 0xd9d   : > { %2386 = vmatpush1.bf16.msra.mxu0 %v3994_v61  ;;  %2427 = vmatpush1.bf16.msra.mxu1 %v4004_v63 }
 0xd9e   : > { %2387 = vmatprep.subr.bf16.mxu0 %v3999_v9  ;;  %2428 = vmatprep.subr.bf16.mxu1 %v4009_v28 }
 0xda1   : > { %2388 = vmatpush1.bf16.msra.mxu0 %v4015_v22  ;;  %2429 = vmatpush1.bf16.msra.mxu1 %v4025_v34 }
 0xda2   : > { %2389 = vmatprep.subr.bf16.mxu0 %v4020_v25  ;;  %2430 = vmatprep.subr.bf16.mxu1 %v4030_v11 }
 0xda5   : > { %2390 = vmatpush1.bf16.msra.mxu0 %v4035_v29  ;;  %2431 = vmatpush1.bf16.msra.mxu1 %v4045_v18 }
 0xda6   : > { %2391 = vmatprep.subr.bf16.mxu0 %v4040_v17  ;;  %2432 = vmatprep.subr.bf16.mxu1 %v4050_v13 }
 0xda9   : > { %2392 = vmatpush1.bf16.msra.mxu0 %v4055_v26  ;;  %2433 = vmatpush1.bf16.msra.mxu1 %v4065_v10 }
 0xdaa   : > { %2393 = vmatprep.subr.bf16.mxu0 %v4060_v16  ;;  %2434 = vmatprep.subr.bf16.mxu1 %v4070_v30 }
 0xdad   : > { %2394 = vmatpush1.bf16.msra.mxu0 %v4075_v31  ;;  %2435 = vmatpush1.bf16.msra.mxu1 %v4085_v39 }
 0xdae   : > { %2395 = vmatprep.subr.bf16.mxu0 %v4080_v38  ;;  %2436 = vmatprep.subr.bf16.mxu1 %v4090_v42 }
 0xdb1   : > { %2396 = vmatpush1.bf16.msra.mxu0 %v4095_v43  ;;  %2437 = vmatpush1.bf16.msra.mxu1 %v4101_v46 }
 0xdb2   : > { %2500 = vmatprep.subr.bf16.mxu0 %v3946_v27  ;;  %2541 = vmatprep.subr.bf16.mxu1 %v3958_v55  ;;  %v2258_v55 = vunpack.c.l.bf16 %v2950_v5 }
 0xe67   : > { %v2295_v52 = vpop.f32.mrb[20].mxu0  ;;  %v2336_v4 = vpop.f32.mrb[20].mxu1 }
 0xe68   : > { %v2343_v58 = vadd.f32 %v2295_v52, %v2256_v49  ;;  %v2297_v60 = vpop.f32.mrb[21].mxu0  ;;  %v2338_v7 = vpop.f32.mrb[21].mxu1  ;;  %v2345_v62 = vadd.f32 %v2336_v4, %v2258_v55 }
 0xe69   : > { %v2344_v0 = vadd.f32 %v2297_v60, %v2257_v51  ;;  %v2299_v1 = vpop.f32.mrb[22].mxu0  ;;  %v2340_v20 = vpop.f32.mrb[22].mxu1  ;;  %v2346_v27 = vadd.f32 %v2338_v7, %v2259_v19  ;;  %v2494_v19 = vld [vmem:[%s3382_s7 + $0x8] sm:$0xff] }
 0xe6a   : > { %v2951_v50 = vmul.f32 -1.442695, %v2343_v58  ;;  %v2300_v21 = vpop.f32.mrb[23].mxu0  ;;  %v2341_v44 = vpop.f32.mrb[23].mxu1  ;;  %v2493_v1 = vld [vmem:[%s3382_s7] sm:$0xff] }
 0xe6b   : > { %v2952_v12 = vmul.f32 -1.442695, %v2344_v0  ;;  %v2953_v15 = vmul.f32 -1.442695, %v2346_v27  ;;  %v2495_v20 = vunpack.c.l.bf16 %v2493_v1 }
 0xe6c   : > { %3220 = vpow2.f32 %v2951_v50  ;;  %v2496_v50 = vunpack.c.h.bf16 %v2493_v1 }
 0xe6d   : > { %3222 = vpow2.f32 %v2952_v12 }
 0xe6e   : > { %3224 = vpow2.f32 %v2953_v15 }
 0xe6f   : > { %3226 = vtanh.f32 %v2345_v62 }
 0xe76   : > { %v3221_v24 = vpop.eup %3220 }
 0xe77   : > { %v3223_v14 = vpop.eup %3222  ;;  %v2350_v23 = vadd.f32 1.0, %v3221_v24 }
 0xe78   : > { %v2356_v32 = vadd.f32 1.0, %v3223_v14  ;;  %v3225_v35 = vpop.eup %3224 }
 0xe79   : > { %3228 = vrcp.f32 %v2350_v23  ;;  %v3227_v37 = vpop.eup %3226  ;;  %v2363_v47 = vadd.f32 1.0, %v3225_v35 }
 0xe7a   : > { %3230 = vrcp.f32 %v2356_v32 }
 0xe7b   : > { %3232 = vrcp.f32 %v2363_v47 }
 0xe83   : > { %v3229_v36 = vpop.eup %3228 }
 0xe84   : > { %v3231_v41 = vpop.eup %3230  ;;  %v2367_v45 = vmul.f32 %v3229_v36, %v3227_v37  ;;  %v2498_v37 = vunpack.c.h.bf16 %v2494_v19 }
 0xe85   : > { %v2366_v48 = vmul.f32 %v3231_v41, %v4308_v40  ;;  %v3233_v49 = vpop.eup %3232  ;;  %v2497_v41 = vunpack.c.l.bf16 %v2494_v19 }
 0xe87   : > { %v4349_v33 = vadd.f32 %v2367_v45, %v2366_v48 }
 0xe89   : > { %3234 = vtanh.f32 %v4349_v33 }
 0xe93   : > { %v3235_v51 = vpop.eup %3234 }
 0xe94   : > { %v2370_v52 = vmul.f32 %v3235_v51, %v3233_v49 }
 0xe96   : > { %2954 = vst [vmem:[%s3492_s24 + $0x10] sm:$0xff] %v2370_v52  ;;  %v2380_v4 = vpack.c.bf16 %v2370_v52, %v2370_v52 }
 0xe98   : > { %2414 = vmatmul.mubr.bf16.vlgmr.msra.gmra.mrb[24].mxu0 %v2380_v4  ;;  %2455 = vmatmul.mubr.bf16.vlgmr.msra.gmra.mrb[24].mxu1 %v2380_v4 }
 0xe99   : > { %2501 = vmatpush1.bf16.msra.mxu0 %v3950_v53  ;;  %2542 = vmatpush1.bf16.msra.mxu1 %v3963_v56  ;;  %v2955_v53 = vld [vmem:[%s3382_s7 + $0x10] sm:$0xff] }
 0xe9a   : > { %2502 = vmatprep.subr.bf16.mxu0 %v3954_v54  ;;  %2543 = vmatprep.subr.bf16.mxu1 %v3967_v57  ;;  %v2376_v54 = vunpack.c.l.bf16 %v2955_v53  ;;  %v2377_v56 = vunpack.c.h.bf16 %v2955_v53 }
 0xe9b   : > { %2532 = vmatprep.mubr.bf16.mxu0 %v3309_v8  ;;  %2573 = vmatprep.mubr.bf16.mxu1 %v3309_v8 }
 0xe9d   : > { %2503 = vmatpush1.bf16.msra.mxu0 %v3972_v2  ;;  %2544 = vmatpush1.bf16.msra.mxu1 %v3983_v3  ;;  %v2956_v3 = vld [vmem:[%s3382_s7 + $0x18] sm:$0xff] }
 0xe9e   : > { %2504 = vmatprep.subr.bf16.mxu0 %v3978_v59  ;;  %2545 = vmatprep.subr.bf16.mxu1 %v3988_v6 }
 0xea1   : > { %2505 = vmatpush1.bf16.msra.mxu0 %v3994_v61  ;;  %2546 = vmatpush1.bf16.msra.mxu1 %v4004_v63 }
 0xea2   : > { %2506 = vmatprep.subr.bf16.mxu0 %v3999_v9  ;;  %2547 = vmatprep.subr.bf16.mxu1 %v4009_v28 }
 0xea5   : > { %2507 = vmatpush1.bf16.msra.mxu0 %v4015_v22  ;;  %2548 = vmatpush1.bf16.msra.mxu1 %v4025_v34 }
 0xea6   : > { %2508 = vmatprep.subr.bf16.mxu0 %v4020_v25  ;;  %2549 = vmatprep.subr.bf16.mxu1 %v4030_v11  ;;  %v2379_v11 = vunpack.c.h.bf16 %v2956_v3 }
 0xea9   : > { %2509 = vmatpush1.bf16.msra.mxu0 %v4035_v29  ;;  %2550 = vmatpush1.bf16.msra.mxu1 %v4045_v18 }
 0xeaa   : > { %2510 = vmatprep.subr.bf16.mxu0 %v4040_v17  ;;  %2551 = vmatprep.subr.bf16.mxu1 %v4050_v13  ;;  %v2378_v17 = vunpack.c.l.bf16 %v2956_v3 }
 0xead   : > { %2511 = vmatpush1.bf16.msra.mxu0 %v4055_v26  ;;  %2552 = vmatpush1.bf16.msra.mxu1 %v4065_v10 }
 0xeae   : > { %2512 = vmatprep.subr.bf16.mxu0 %v4060_v16  ;;  %2553 = vmatprep.subr.bf16.mxu1 %v4070_v30 }
 0xeb1   : > { %2513 = vmatpush1.bf16.msra.mxu0 %v4075_v31  ;;  %2554 = vmatpush1.bf16.msra.mxu1 %v4085_v39 }
 0xeb2   : > { %2514 = vmatprep.subr.bf16.mxu0 %v4080_v38  ;;  %2555 = vmatprep.subr.bf16.mxu1 %v4090_v42 }
 0xeb5   : > { %2515 = vmatpush1.bf16.msra.mxu0 %v4095_v43  ;;  %2556 = vmatpush1.bf16.msra.mxu1 %v4101_v46 }
 0xf6b   : > { %v2415_v57 = vpop.f32.mrb[24].mxu0  ;;  %v2456_v2 = vpop.f32.mrb[24].mxu1 }
 0xf6c   : > { %v2463_v59 = vadd.f32 %v2415_v57, %v2376_v54  ;;  %v2417_v6 = vpop.f32.mrb[25].mxu0  ;;  %v2458_v8 = vpop.f32.mrb[25].mxu1  ;;  %v2465_v13 = vadd.f32 %v2456_v2, %v2378_v17 }
 0xf6d   : > { %v2464_v61 = vadd.f32 %v2417_v6, %v2377_v56  ;;  %v2419_v9 = vpop.f32.mrb[26].mxu0  ;;  %v2460_v63 = vpop.f32.mrb[26].mxu1  ;;  %v2466_v29 = vadd.f32 %v2458_v8, %v2379_v11 }
 0xf6e   : > { %v2957_v28 = vmul.f32 -1.442695, %v2463_v59  ;;  %v2420_v22 = vpop.f32.mrb[27].mxu0  ;;  %v2461_v25 = vpop.f32.mrb[27].mxu1 }
 0xf6f   : > { %v2958_v34 = vmul.f32 -1.442695, %v2464_v61  ;;  %v2959_v18 = vmul.f32 -1.442695, %v2466_v29 }
 0xf70   : > { %3236 = vpow2.f32 %v2957_v28 }
 0xf71   : > { %3238 = vpow2.f32 %v2958_v34 }
 0xf72   : > { %3240 = vpow2.f32 %v2959_v18 }
 0xf73   : > { %3242 = vtanh.f32 %v2465_v13 }
 0xf7a   : > { %v3237_v26 = vpop.eup %3236 }
 0xf7b   : > { %v3239_v16 = vpop.eup %3238  ;;  %v2470_v10 = vadd.f32 1.0, %v3237_v26 }
 0xf7c   : > { %v2476_v30 = vadd.f32 1.0, %v3239_v16  ;;  %v3241_v31 = vpop.eup %3240 }
 0xf7d   : > { %3244 = vrcp.f32 %v2470_v10  ;;  %v3243_v38 = vpop.eup %3242  ;;  %v2483_v46 = vadd.f32 1.0, %v3241_v31 }
 0xf7e   : > { %3246 = vrcp.f32 %v2476_v30 }
 0xf7f   : > { %3248 = vrcp.f32 %v2483_v46 }
 0xf87   : > { %v3245_v39 = vpop.eup %3244 }
 0xf88   : > { %v3247_v42 = vpop.eup %3246  ;;  %v2487_v43 = vmul.f32 %v3245_v39, %v3243_v38 }
 0xf89   : > { %v2486_v40 = vmul.f32 %v3247_v42, %v4349_v33  ;;  %v3249_v5 = vpop.eup %3248 }
 0xf8b   : > { %v2488_v58 = vadd.f32 %v2487_v43, %v2486_v40 }
 0xf8d   : > { %3250 = vtanh.f32 %v2488_v58 }
 0xf97   : > { %v3251_v60 = vpop.eup %3250 }
 0xf98   : > { %v2490_v7 = vmul.f32 %v3251_v60, %v3249_v5 }
 0xf9a   : > { %2960 = vst [vmem:[%s3492_s24 + $0x8] sm:$0xff] %v2490_v7  ;;  %v2499_v0 = vpack.c.bf16 %v2490_v7, %v2490_v7 }
 0xf9c   : > { %2533 = vmatmul.mubr.bf16.vlgmr.msra.gmra.mrb[28].mxu0 %v2499_v0  ;;  %2574 = vmatmul.mubr.bf16.vlgmr.msra.gmra.mrb[28].mxu1 %v2499_v0 }
0x106f   : > { %v2534_v21 = vpop.f32.mrb[28].mxu0  ;;  %v2575_v44 = vpop.f32.mrb[28].mxu1 }
0x1070   : > { %v2582_v12 = vadd.f32 %v2534_v21, %v2495_v20  ;;  %v2536_v27 = vpop.f32.mrb[29].mxu0  ;;  %v2577_v55 = vpop.f32.mrb[29].mxu1  ;;  %v2584_v47 = vadd.f32 %v2575_v44, %v2497_v41 }
0x1071   : > { %v2583_v15 = vadd.f32 %v2536_v27, %v2496_v50  ;;  %v2538_v62 = vpop.f32.mrb[30].mxu0  ;;  %v2579_v24 = vpop.f32.mrb[30].mxu1  ;;  %v2585_v36 = vadd.f32 %v2577_v55, %v2498_v37 }
0x1072   : > { %v2961_v14 = vmul.f32 -1.442695, %v2582_v12  ;;  %v2539_v23 = vpop.f32.mrb[31].mxu0  ;;  %v2580_v32 = vpop.f32.mrb[31].mxu1 }
0x1073   : > { %v2962_v35 = vmul.f32 -1.442695, %v2583_v15  ;;  %v2963_v45 = vmul.f32 -1.442695, %v2585_v36 }
0x1074   : > { %3252 = vpow2.f32 %v2961_v14 }
0x1075   : > { %3254 = vpow2.f32 %v2962_v35 }
0x1076   : > { %3256 = vpow2.f32 %v2963_v45 }
0x1077   : > { %3258 = vtanh.f32 %v2584_v47 }
0x107e   : > { %v3253_v48 = vpop.eup %3252 }
0x107f   : > { %v3255_v33 = vpop.eup %3254  ;;  %v2589_v49 = vadd.f32 1.0, %v3253_v48 }
0x1080   : > { %v2595_v51 = vadd.f32 1.0, %v3255_v33  ;;  %v3257_v52 = vpop.eup %3256 }
0x1081   : > { %3260 = vrcp.f32 %v2589_v49  ;;  %v3259_v4 = vpop.eup %3258  ;;  %v2602_v57 = vadd.f32 1.0, %v3257_v52 }
0x1082   : > { %3262 = vrcp.f32 %v2595_v51 }
0x1083   : > { %3264 = vrcp.f32 %v2602_v57 }
0x108b   : > { %v3261_v53 = vpop.eup %3260 }
0x108c   : > { %v3263_v54 = vpop.eup %3262  ;;  %v2606_v56 = vmul.f32 %v3261_v53, %v3259_v4 }
0x108d   : > { %v2605_v2 = vmul.f32 %v3263_v54, %v2488_v58  ;;  %v3265_v3 = vpop.eup %3264 }
0x108f   : > { %v2607_v59 = vadd.f32 %v2606_v56, %v2605_v2 }
0x1091   : > { %3266 = vtanh.f32 %v2607_v59  ;;  %2612 = vst [vmem:[#allocation3] sm:$0xff] %v2607_v59 }
0x109b   : > { %v3267_v6 = vpop.eup %3266 }
0x109c   : > { %v2609_v8 = vmul.f32 %v3267_v6, %v3265_v3 }
0x109e   : > { %2610 = vst [vmem:[%s3492_s24] sm:$0xff] %v2609_v8  ;;  %2611 = vst [vmem:[#allocation2] sm:$0xff] %v2609_v8 }
0x109f PF: > { %2619 = sbr.rel (!%p3364_p3) target bundleno = 4263 (0x10a7), region = 52  ;;  %s2965_s26 = sshll.u32 (%p3364_p3), %s3298_s17, 3  ;;  %v2672_v9 = vld [vmem:[%s3492_s24 + $0x8] sm:$0xff] (%p3364_p3)  ;;  %v2674_v63 = vld [vmem:[%s3492_s24 + $0x10] sm:$0xff] (%p3364_p3)  ;;  %v2676_v28 = vld [vmem:[%s3492_s24 + $0x18] sm:$0xff] (%p3364_p3) }
0x10a0   : > { %s2628_s29 = scalar_lea.vmem (%p3364_p3), %s4425_s4, %s2965_s26  ;;  %v2678_v22 = vld [vmem:[%s3492_s24 + $0x20] sm:$0xff] (%p3364_p3)  ;;  %v2680_v25 = vld [vmem:[%s3492_s24 + $0x28] sm:$0xff] (%p3364_p3)  ;;  %v2682_v34 = vld [vmem:[%s3492_s24 + $0x30] sm:$0xff] (%p3364_p3) }
0x10a1   : > { %2673 = vst [vmem:[%s2628_s29 + $0x10] sm:$0xff] (%p3364_p3), %v2672_v9  ;;  %2675 = vst [vmem:[%s2628_s29 + $0x20] sm:$0xff] (%p3364_p3), %v2674_v63  ;;  %v2684_v11 = vld [vmem:[%s3492_s24 + $0x38] sm:$0xff] (%p3364_p3) }
0x10a2   : > { %2677 = vst [vmem:[%s2628_s29 + $0x30] sm:$0xff] (%p3364_p3), %v2676_v28  ;;  %2679 = vst [vmem:[%s2628_s29 + $0x40] sm:$0xff] (%p3364_p3), %v2678_v22 }
0x10a3   : > { %2681 = vst [vmem:[%s2628_s29 + $0x50] sm:$0xff] (%p3364_p3), %v2680_v25  ;;  %2683 = vst [vmem:[%s2628_s29 + $0x60] sm:$0xff] (%p3364_p3), %v2682_v34 }
0x10a4   : > { %2685 = vst [vmem:[%s2628_s29 + $0x70] sm:$0xff] (%p3364_p3), %v2684_v11 }
0x10a5   : > { %v2670_v61 = vld [vmem:[%s3492_s24] sm:$0xff] (%p3364_p3) }
0x10a6   : > { %2671 = vst [vmem:[%s2628_s29] sm:$0xff] %v2670_v61 }
0x10a7 PF: > { %s14_s19 = sadd.s32 1, %s3306_s19   ;;  %s4526_s15 = smov %s3294_s16 }
0x10a8   : > { %p11_p11 = scmp.ge.s32.totalorder %s14_s19, 4   ;;  %s4527_s16 = smov %s3373_s25 }
0x10a9   : > { %s4528_s17 = smov %s3302_s18  ;;  %s4529_s18 = smov %s4531_s21 }
0x10aa   :  { %13 = sbr.rel (!%p11_p11) target bundleno = 3 (0x3), region = 153 }

</bundles_post_ra>
